<compile_context>
chip_gen: v7x
topology: tpu7x:2x2x1
jax: 0.10.0
libtpu: 0.0.40
codegen_flags: <defaults>
</compile_context>

<pallas_src>
import jax
import jax.numpy as jnp
from jax.experimental import pallas as pl
from jax.experimental.pallas import tpu as pltpu

_LANE = 128  # padded output-channel width for lane-dense stores


def _vmem_limit_bytes():
    # ~75% of the physical per-core VMEM (48 MiB on v7x, 96 MiB on v5e/v6e), capped.
    try:
        cap = int(pltpu.get_tpu_info().vmem_capacity_bytes)
    except Exception:  # pragma: no cover - conservative fallback
        cap = 64 << 20
    return min(cap * 3 // 4, 100 << 20)


def _choose_tiling(n):
    """Pick tile_n in {512, 256, 128} and pad N to a multiple of 2*tile_n.

    The factor 2 gives phase 1 two whole point-halves (v7x megacore split).
    Prefers the largest tile whose padding overhead is <= 25% of N.
    """
    choices = []
    for t in (512, 256, 128):
        span = 2 * t
        n_pad = -(-n // span) * span
        choices.append((t, n_pad))
    for t, n_pad in choices:
        if n_pad - n <= max(n // 4, 0):
            return t, n_pad
    return min(choices, key=lambda c: (c[1], -c[0]))


# --------------------------- kernel 1: conv4 + global max ---------------------------

def _gmax_kernel(x_ref, w4_ref, t4_ref, g_ref):
    n = pl.program_id(2)
    x = x_ref[0]                                                       # (tile_n, 512) bf16
    h = jnp.dot(x, w4_ref[...], preferred_element_type=jnp.float32)   # (tile_n, 1024) f32
    h = h + t4_ref[...]                                                # bn4 shift (scale folded)
    h = jnp.maximum(h, 0.2 * h)                                        # leaky_relu(0.2)
    m = jnp.max(h, axis=0, keepdims=True)                              # (1, 1024) per-tile max

    @pl.when(n == 0)
    def _():
        g_ref[0, 0] = m

    @pl.when(n > 0)
    def _():
        g_ref[0, 0] = jnp.maximum(g_ref[0, 0], m)


# --------------------------- kernel 2: conv5 / conv6 / conv7 ------------------------

def _head_kernel(x_ref, t5b_ref, w5x_ref, w6_ref, t6_ref, w7_ref, b7_ref, out_ref):
    x = x_ref[0]                                                       # (tile_n, 512) bf16

    # conv5 on cat(repeat(g), x): the g contribution is pre-folded into t5b per batch.
    y = jnp.dot(x, w5x_ref[...], preferred_element_type=jnp.float32)  # (tile_n, 512)
    y = y + t5b_ref[0]                                                 # (1, 512) broadcast
    y = jnp.maximum(y, 0.2 * y)
    # TODO(synk): dp5 dropout is eval-mode identity; no mask sampling implemented.

    z = jnp.dot(y.astype(jnp.bfloat16), w6_ref[...],
                preferred_element_type=jnp.float32) + t6_ref[...]      # (tile_n, 256)
    z = jnp.maximum(z, 0.2 * z)

    o = jnp.dot(z.astype(jnp.bfloat16), w7_ref[...],
                preferred_element_type=jnp.float32) + b7_ref[...]      # (tile_n, 128)
    out_ref[0] = o.astype(out_ref.dtype)                               # bf16 lane-dense store


# ------------------------------------ wrapper ---------------------------------------

def segmentation_mlp_forward(x_bcn, params):
    """x_bcn: (B, 512, N) float32 (PyTorch NCL).  Returns (B, num_seg, N) float32."""
    B, C_in, N = x_bcn.shape
    assert C_in == 512
    num_seg = params["num_seg"]
    tile_n, n_pad = _choose_tiling(N)
    n_half = n_pad // (2 * tile_n)        # tiles per point-half (phase 1)
    n_tiles = n_pad // tile_n             # tiles total       (phase 2)
    vmem = _vmem_limit_bytes()

    # glue: cast before transpose (halves the transpose HBM pass), channels -> lanes.
    x_bnc = jnp.transpose(x_bcn.astype(jnp.bfloat16), (0, 2, 1))       # (B, N, 512) bf16
    if n_pad != N:
        # replicate point 0 so the global max is unaffected; padded rows are sliced off.
        pad = jnp.broadcast_to(x_bnc[:, :1, :], (B, n_pad - N, 512))
        x_bnc = jnp.concatenate([x_bnc, pad], axis=1)                  # (B, n_pad, 512)

    # constant-index weight/bias blocks: never re-DMA'd -> single buffer.
    def const3(shape):
        return pl.BlockSpec(shape, lambda b, h, n: (0,) * len(shape),
                            pipeline_mode=pl.Buffered(1))

    def const2(shape):
        return pl.BlockSpec(shape, lambda b, n: (0,) * len(shape),
                            pipeline_mode=pl.Buffered(1))

    # ---- phase 1: per-half partial max of leaky_relu(x @ w4 + t4) ----
    gmax_cost = pl.CostEstimate(
        flops=2 * B * n_pad * 512 * 1024,
        transcendentals=0,
        bytes_accessed=(B * n_pad * 512 * 2 + 512 * 1024 * 2
                        + 1024 * 4 + B * 2 * 1024 * 4),
    )
    g_halves = pl.pallas_call(
        _gmax_kernel,
        out_shape=jax.ShapeDtypeStruct((B, 2, 1, 1024), jnp.float32),
        grid_spec=pltpu.PrefetchScalarGridSpec(
            num_scalar_prefetch=0,
            grid=(B, 2, n_half),
            in_specs=[
                pl.BlockSpec((1, tile_n, 512),
                             lambda b, h, n: (b, h * n_half + n, 0)),    # x tile
                const3((512, 1024)),                                     # w4 (bn4 folded)
                const3((1, 1024)),                                       # t4
            ],
            out_specs=pl.BlockSpec((1, 1, 1, 1024),
                                   lambda b, h, n: (b, h, 0, 0)),
        ),
        compiler_params=pltpu.CompilerParams(
            dimension_semantics=("parallel", "parallel", "arbitrary"),
            vmem_limit_bytes=vmem,
        ),
        cost_estimate=gmax_cost,
    )(x_bnc, params["w4"], params["t4"])

    # glue: combine halves and hoist the per-batch global-feature matvec out of phase 2:
    #   t5_b = g @ w5g + t5   (tiny (B,1024)x(1024,512) einsum, computed once per batch)
    g = jnp.max(g_halves, axis=(1, 2)).astype(jnp.bfloat16)            # (B, 1024)
    t5b = (jnp.einsum("bc,cd->bd", g, params["w5g"],
                      preferred_element_type=jnp.float32)
           + params["t5"]).reshape(B, 1, 512)                          # (B, 1, 512) f32

    # ---- phase 2: conv5(x) + t5_b -> conv6 -> conv7 (output padded to 128 lanes) ----
    head_cost = pl.CostEstimate(
        flops=2 * B * n_pad * (512 * 512 + 512 * 256 + 256 * _LANE),
        transcendentals=0,
        bytes_accessed=(B * n_pad * 512 * 2 + B * n_pad * _LANE * 2
                        + (512 * 512 + 512 * 256 + 256 * _LANE) * 2
                        + B * 512 * 4 + (256 + _LANE) * 4),
    )
    out_pad = pl.pallas_call(
        _head_kernel,
        out_shape=jax.ShapeDtypeStruct((B, n_pad, _LANE), jnp.bfloat16),
        grid_spec=pltpu.PrefetchScalarGridSpec(
            num_scalar_prefetch=0,
            grid=(B, n_tiles),
            in_specs=[
                pl.BlockSpec((1, tile_n, 512), lambda b, n: (b, n, 0)),  # x tile
                pl.BlockSpec((1, 1, 512), lambda b, n: (b, 0, 0)),       # t5_b (per batch)
                const2((512, 512)),                                      # w5 residual part
                const2((512, 256)),                                      # w6
                const2((1, 256)),                                        # t6 (bias + bn folded)
                const2((256, _LANE)),                                    # w7 (lane-padded)
                const2((1, _LANE)),                                      # b7 (lane-padded)
            ],
            out_specs=pl.BlockSpec((1, tile_n, _LANE), lambda b, n: (b, n, 0)),
        ),
        compiler_params=pltpu.CompilerParams(
            dimension_semantics=("parallel", "parallel"),
            vmem_limit_bytes=vmem,
        ),
        cost_estimate=head_cost,
    )(x_bnc, t5b,
      params["w5x"], params["w6"], params["t6"],
      params["w7"], params["b7"])

    # glue: back to PyTorch layout (B, num_seg, N).  Transpose runs on the bf16
    # 128-lane padded slab (lane-friendly, half the bytes of f32), then slices.
    out = jnp.transpose(out_pad, (0, 2, 1))[:, :num_seg, :N]
    return out.astype(jnp.float32)


# ----------------------------- parameter construction -------------------------------

def make_params(key, num_seg):
    """Deterministic synthetic parameters, folded + cast to kernel-ready form."""
    ks = jax.random.split(key, 16)
    eps = 1e-5

    def bn(kg, kb, km, kv, c):
        gamma = 1.0 + 0.1 * jax.random.normal(kg, (c,), jnp.float32)
        beta = 0.1 * jax.random.normal(kb, (c,), jnp.float32)
        mean = 0.1 * jax.random.normal(km, (c,), jnp.float32)
        var = 1.0 + 0.1 * jax.random.uniform(kv, (c,), jnp.float32)
        scale = gamma / jnp.sqrt(var + eps)
        shift = beta - mean * scale
        return scale, shift

    # conv weights in PyTorch layout (out, in).
    w4 = 0.02 * jax.random.normal(ks[0], (1024, 512), jnp.float32)        # conv4, no bias
    w5 = 0.02 * jax.random.normal(ks[1], (512, 1536), jnp.float32)        # conv5
    b5 = 0.02 * jax.random.normal(ks[2], (512,), jnp.float32)
    w6 = 0.02 * jax.random.normal(ks[3], (256, 512), jnp.float32)         # conv6
    b6 = 0.02 * jax.random.normal(ks[4], (256,), jnp.float32)
    w7 = 0.02 * jax.random.normal(ks[5], (num_seg, 256), jnp.float32)     # conv7
    b7 = 0.02 * jax.random.normal(ks[6], (num_seg,), jnp.float32)

    s4, t4 = bn(ks[7], ks[8], ks[9], ks[10], 1024)
    s5, t5 = bn(ks[11], ks[12], ks[13], ks[14], 512)
    s6, t6 = bn(ks[15], ks[0], ks[1], ks[2], 256)   # reuse keys deterministically

    # fold conv biases into the BN shifts:  bn(z + b) = s*z + (s*b + t)
    t5 = t5 + s5 * b5
    t6 = t6 + s6 * b6

    # fold BN scales into the (transposed) weights, cast to bf16 for the MXU.
    w4_f = (jnp.transpose(w4) * s4[None, :]).astype(jnp.bfloat16)             # (512, 1024)
    w5g_f = (jnp.transpose(w5[:, :1024]) * s5[None, :]).astype(jnp.bfloat16)  # (1024, 512)
    w5x_f = (jnp.transpose(w5[:, 1024:]) * s5[None, :]).astype(jnp.bfloat16)  # (512, 512)
    w6_f = (jnp.transpose(w6) * s6[None, :]).astype(jnp.bfloat16)             # (512, 256)

    # conv7: zero-pad output channels to 128 lanes for dense stores.
    w7_p = jnp.zeros((256, _LANE), jnp.float32).at[:, :num_seg].set(jnp.transpose(w7))
    b7_p = jnp.zeros((_LANE,), jnp.float32).at[:num_seg].set(b7)

    return {
        "num_seg": num_seg,
        "w4": w4_f, "t4": t4.reshape(1, 1024),
        "w5g": w5g_f, "w5x": w5x_f, "t5": t5.reshape(1, 512),
        "w6": w6_f, "t6": t6.reshape(1, 256),
        "w7": w7_p.astype(jnp.bfloat16), "b7": b7_p.reshape(1, _LANE),
    }


def _reference_forward(x_bcn, params):
    """Plain-JAX reference using the same folded bf16 weights / f32 shifts."""
    num_seg = params["num_seg"]
    x = jnp.transpose(x_bcn.astype(jnp.bfloat16), (0, 2, 1))              # (B, N, 512)
    lrelu = lambda v: jnp.maximum(v, 0.2 * v)

    h = lrelu(jnp.einsum("bnc,co->bno", x, params["w4"],
                         preferred_element_type=jnp.float32) + params["t4"])
    g = jnp.max(h, axis=1).astype(jnp.bfloat16)                            # (B, 1024)
    t5b = (jnp.einsum("bc,cd->bd", g, params["w5g"],
                      preferred_element_type=jnp.float32) + params["t5"])[:, None, :]

    y = lrelu(jnp.einsum("bnc,co->bno", x, params["w5x"],
                         preferred_element_type=jnp.float32) + t5b)
    z = lrelu(jnp.einsum("bnc,co->bno", y.astype(jnp.bfloat16), params["w6"],
                         preferred_element_type=jnp.float32) + params["t6"])
    o = jnp.einsum("bnc,co->bno", z.astype(jnp.bfloat16), params["w7"],
                   preferred_element_type=jnp.float32) + params["b7"]
    o = o.astype(jnp.bfloat16).astype(jnp.float32)     # mirror the kernel's bf16 store
    return jnp.transpose(o, (0, 2, 1))[:, :num_seg, :]


if __name__ == "__main__":
    B, C_IN, N, NUM_SEG = 2, 512, 512, 16      # C_IN=512 is fixed by the module.

    key = jax.random.PRNGKey(0)
    k_x, k_p = jax.random.split(key)
    x = jax.random.normal(k_x, (B, C_IN, N), jnp.float32)
    params = make_params(k_p, NUM_SEG)

    out = jax.block_until_ready(segmentation_mlp_forward(x, params))
    assert out.shape == (B, NUM_SEG, N), out.shape

    ref = jax.block_until_ready(_reference_forward(x, params))
    max_err = float(jnp.max(jnp.abs(out - ref)))
    assert jnp.allclose(out, ref, atol=5e-3, rtol=5e-3), max_err

    print("KERNEL_OK")
</pallas_src>

<mosaic_0001>
module attributes {stable_mosaic.version = 11 : i64} {
  func.func @_gmax_kernel(%arg0: i32, %arg1: i32, %arg2: i32, %arg3: memref<1x256x512xbf16, #tpu.memory_space<vmem>>, %arg4: memref<512x1024xbf16, #tpu.memory_space<vmem>>, %arg5: memref<1x1024xf32, #tpu.memory_space<vmem>>, %arg6: memref<1x1x1x1024xf32, #tpu.memory_space<vmem>>) attributes {dimension_semantics = [#tpu.dimension_semantics<parallel>, #tpu.dimension_semantics<parallel>, #tpu.dimension_semantics<arbitrary>], iteration_bounds = array<i64: 2, 2, 1>, scalar_prefetch = 0 : i64, scratch_operands = 0 : i64, tpu.core_type = #tpu.core_type<tc>, window_params = [{transform_indices = @transform_0, window_bounds = array<i64: 1, 256, 512>}, {pipeline_mode = #tpu.pipeline_mode<synchronous>, transform_indices = @transform_1, window_bounds = array<i64: 512, 1024>}, {pipeline_mode = #tpu.pipeline_mode<synchronous>, transform_indices = @transform_2, window_bounds = array<i64: 1, 1024>}, {transform_indices = @transform_3, window_bounds = array<i64: 1, 1, 1, 1024>}]} {
    %c0 = arith.constant 0 : index
    %c0_0 = arith.constant 0 : index
    %c0_1 = arith.constant 0 : index
    %0 = vector.load %arg3[%c0, %c0_0, %c0_1] : memref<1x256x512xbf16, #tpu.memory_space<vmem>>, vector<1x256x512xbf16>
    %1 = vector.shape_cast %0 : vector<1x256x512xbf16> to vector<256x512xbf16>
    %c0_2 = arith.constant 0 : index
    %c0_3 = arith.constant 0 : index
    %2 = vector.load %arg4[%c0_2, %c0_3] : memref<512x1024xbf16, #tpu.memory_space<vmem>>, vector<512x1024xbf16>
    %cst = arith.constant dense<0.000000e+00> : vector<256x1024xf32>
    %3 = tpu.matmul %1, %2, %cst {dimension_numbers = #tpu.dot_dimension_numbers<[1], [0], [0], [1], [0, 0, 1, 1], [], []>} : vector<256x512xbf16>, vector<512x1024xbf16>, vector<256x1024xf32> -> vector<256x1024xf32>
    %c0_4 = arith.constant 0 : index
    %c0_5 = arith.constant 0 : index
    %4 = vector.load %arg5[%c0_4, %c0_5] : memref<1x1024xf32, #tpu.memory_space<vmem>>, vector<1x1024xf32>
    %5 = vector.broadcast %4 : vector<1x1024xf32> to vector<256x1024xf32>
    %6 = arith.addf %3, %5 : vector<256x1024xf32>
    %cst_6 = arith.constant 2.000000e-01 : f32
    %7 = vector.broadcast %cst_6 : f32 to vector<256x1024xf32>
    %8 = arith.mulf %7, %6 : vector<256x1024xf32>
    %9 = arith.maximumf %6, %8 : vector<256x1024xf32>
    %cst_7 = arith.constant dense<0xFF800000> : vector<1024xf32>
    %10 = vector.multi_reduction <maximumf>, %9, %cst_7 [0] : vector<256x1024xf32> to vector<1024xf32>
    %11 = vector.shape_cast %10 : vector<1024xf32> to vector<1x1024xf32>
    %c0_i32 = arith.constant 0 : i32
    %12 = arith.cmpi eq, %arg2, %c0_i32 : i32
    %13 = arith.extui %12 : i1 to i32
    %c0_i32_8 = arith.constant 0 : i32
    %14 = arith.cmpi ne, %13, %c0_i32_8 : i32
    scf.if %14 {
      %c0_11 = arith.constant 0 : index
      %c0_12 = arith.constant 0 : index
      %c0_13 = arith.constant 0 : index
      %c0_14 = arith.constant 0 : index
      %18 = vector.load %arg6[%c0_11, %c0_12, %c0_13, %c0_14] : memref<1x1x1x1024xf32, #tpu.memory_space<vmem>>, vector<1x1x1x1024xf32>
      %19 = vector.shape_cast %18 : vector<1x1x1x1024xf32> to vector<1x1024xf32>
      %20 = vector.shape_cast %11 : vector<1x1024xf32> to vector<1x1x1x1024xf32>
      tpu.vector_store %arg6[%c0_11, %c0_12, %c0_13, %c0_14], %20 {strides = array<i32>} : memref<1x1x1x1024xf32, #tpu.memory_space<vmem>>, vector<1x1x1x1024xf32>,
    } else {
    }
    %c0_i32_9 = arith.constant 0 : i32
    %15 = arith.cmpi sgt, %arg2, %c0_i32_9 : i32
    %16 = arith.extui %15 : i1 to i32
    %c0_i32_10 = arith.constant 0 : i32
    %17 = arith.cmpi ne, %16, %c0_i32_10 : i32
    scf.if %17 {
      %c0_11 = arith.constant 0 : index
      %c0_12 = arith.constant 0 : index
      %c0_13 = arith.constant 0 : index
      %c0_14 = arith.constant 0 : index
      %18 = vector.load %arg6[%c0_11, %c0_12, %c0_13, %c0_14] : memref<1x1x1x1024xf32, #tpu.memory_space<vmem>>, vector<1x1x1x1024xf32>
      %19 = vector.shape_cast %18 : vector<1x1x1x1024xf32> to vector<1x1024xf32>
      %20 = arith.maximumf %19, %11 : vector<1x1024xf32>
      %c0_15 = arith.constant 0 : index
      %c0_16 = arith.constant 0 : index
      %c0_17 = arith.constant 0 : index
      %c0_18 = arith.constant 0 : index
      %21 = vector.load %arg6[%c0_15, %c0_16, %c0_17, %c0_18] : memref<1x1x1x1024xf32, #tpu.memory_space<vmem>>, vector<1x1x1x1024xf32>
      %22 = vector.shape_cast %21 : vector<1x1x1x1024xf32> to vector<1x1024xf32>
      %23 = vector.shape_cast %20 : vector<1x1024xf32> to vector<1x1x1x1024xf32>
      tpu.vector_store %arg6[%c0_15, %c0_16, %c0_17, %c0_18], %23 {strides = array<i32>} : memref<1x1x1x1024xf32, #tpu.memory_space<vmem>>, vector<1x1x1x1024xf32>,
    } else {
    }
    return
  }
  func.func @transform_0(%arg0: i32, %arg1: i32, %arg2: i32) -> (i32, i32, i32) {
    %c1_i32 = arith.constant 1 : i32
    %0 = arith.muli %arg1, %c1_i32 : i32
    %1 = arith.addi %0, %arg2 : i32
    %c0_i32 = arith.constant 0 : i32
    %c0_i32_0 = arith.constant 0 : i32
    return %arg0, %1, %c0_i32 : i32, i32, i32
  }
  func.func @transform_1(%arg0: i32, %arg1: i32, %arg2: i32) -> (i32, i32) {
    %c0_i32 = arith.constant 0 : i32
    %c0_i32_0 = arith.constant 0 : i32
    %c0_i32_1 = arith.constant 0 : i32
    return %c0_i32, %c0_i32_0 : i32, i32
  }
  func.func @transform_2(%arg0: i32, %arg1: i32, %arg2: i32) -> (i32, i32) {
    %c0_i32 = arith.constant 0 : i32
    %c0_i32_0 = arith.constant 0 : i32
    %c0_i32_1 = arith.constant 0 : i32
    return %c0_i32, %c0_i32_0 : i32, i32
  }
  func.func @transform_3(%arg0: i32, %arg1: i32, %arg2: i32) -> (i32, i32, i32, i32) {
    %c0_i32 = arith.constant 0 : i32
    %c0_i32_0 = arith.constant 0 : i32
    %c0_i32_1 = arith.constant 0 : i32
    return %arg0, %arg1, %c0_i32, %c0_i32_0 : i32, i32, i32, i32
  }
}

</mosaic_0001>

<bundles_post_ra>
// kernel: tpu_custom_call.1
= control target key start
LH: loop header
LB: loop body
LE: loop exit
PB: predicated region body
PF: predicated region fallthrough
CT: control target
= control target key end

     0   :  { %s6904_s0 = inlined_call_operand.hbm [shape: bf16[2,512,512], index: 0, kind: input, shape index: {}]   ;;  %s6905_s1 = inlined_call_operand.hbm [shape: bf16[512,1024], index: 1, kind: input, shape index: {}]   ;;  %s6906_s2 = inlined_call_operand.hbm [shape: f32[1,1024], index: 2, kind: input, shape index: {}]   ;;  %s6907_s3 = inlined_call_operand.hbm [shape: f32[2,2,1,1024], index: 3, kind: output, shape index: {}]  }
   0x1   :  { %6915 = sst [smem:[#allocation15_spill]] %s6905_s1 }
   0x2   :  { %6916 = sst [smem:[#allocation16_spill]] %s6906_s2 }
   0x3   :  { %8 = vsyncpa [#allocation3], 0 }
   0x4   :  { %10 = vsyncpa [#allocation3 + $0x1], 0 }
   0x5   :  { %11 = vsyncpa [#allocation6], 0 }
   0x6   :  { %12 = vsyncpa [#allocation4], 0 }
   0x7   :  { %14 = vsyncpa [#allocation4 + $0x1], 0  ;;  %s6155_s12 = smov 0   ;;  %s6157_s13 = smov 0  }
   0x8   :  { %s6159_s14 = smov 0   ;;  %s6161_s15 = smov 0  }
   0x9   :  { %s6163_s16 = smov 0   ;;  %s6165_s17 = smov 0  }
   0xa   :  { %s6167_s18 = smov 0   ;;  %s6169_s19 = smov 0  }
   0xb LB: > { %6917 = sst [smem:[#allocation12_spill]] %s6096_s12  ;;  %s4816_s20 = sadd.s32 4294967295, %s6124_s19   ;;  %s6124_s19 = sphi %s6169_s19, %s20_s19   ;;  %s6120_s18 = sphi %s6167_s18, %s6945_s18   ;;  %s6116_s17 = sphi %s6165_s17, %s6944_s17   ;;  %s6112_s16 = sphi %s6163_s16, %s6943_s16   ;;  %s6108_s15 = sphi %s6161_s15, %s6942_s15   ;;  %s6104_s14 = sphi %s6159_s14, %s6941_s14   ;;  %s6100_s13 = sphi %s6157_s13, %s6940_s13   ;;  %s6096_s12 = sphi %s6155_s12, %s6939_s12  }
   0xc   : > { %s4817_s21 = sadd.s32 4294967294, %s6124_s19   ;;  %p63_p0 = scmp.ne.s32.totalorder %s6100_s13, %s6096_s12 }
   0xd   : > { %p6199_p1 = scmp.eq.s32.totalorder %s4816_s20, 0  ;;  %p6203_p2 = scmp.eq.s32.totalorder %s4816_s20, 3 }
   0xe   : > { %p137_p3 = scmp.eq.s32.totalorder %s4817_s21, 3  ;;  %p4818_p5 = scmp.ge.s32.totalorder %s6124_s19, 1 }
   0xf   : > { %s6918_s22 = scalar_select %p6199_p1, 1, 0 }
  0x10   : > { %s6919_s23 = scalar_select %p6203_p2, 1, 0 }
  0x11   : > { %p6209_p4 = por %p6199_p1, %p63_p0  ;;  %p6214_p6 = por %p137_p3, %p63_p0 }
  0x12   : > { %p144_p7 = scmp.lt.s32.totalorder %s6124_s19, 5  ;;  %s6126_s27 = smov [#allocation5]  }
  0x13   : > { %s6920_s24 = scalar_select %p6209_p4, 1, 0 }
  0x14   : > { %s6921_s25 = scalar_select %p6214_p6, 1, 0 }
  0x15   : > { %p6219_p8 = pnand %p4818_p5, %p144_p7  ;;  %s156_s28 = sshll.u32 %s6126_s27, 4  ;;  %s157_s28 = int_to_ptr.vmem [resolvable:$true] %s156_s28 }
  0x16   : > { %6922 = sst [smem:[#allocation13_spill]] %s6921_s25  ;;  %s6127_s30 = smov [#allocation7]  }
  0x17   : > { %s6923_s26 = scalar_select %p6219_p8, 1, 0 }
  0x18   : > { %p5683_p9 = pneg %p6219_p8  ;;  %s170_s4 = sshll.u32 %s6127_s30, 4  ;;  %s6231_s4 = int_to_ptr.vmem [resolvable:$true] %s170_s4 }
  0x19   : > { %s6925_s1 = sld [smem:[#allocation15_spill]] }
  0x1a   : > { %p6227_p10 = pnand %p5683_p9, %p6199_p1 }
  0x1c   : > { %p5938_p12 = pneg %p6227_p10 }
  0x1f   : > { %s5936_s7 = scalar_lea.hbm %s6925_s1, 32768 }
  0x20   : > { %p5937_p11 = scmp.ne.s32.totalorder %s6925_s1, %s5936_s7  ;;  %p5943_p3 = scmp.lt.u32.totalorder %s5936_s7, %s6925_s1 }
  0x22   : > { %p5939_p13 = pnand %p5938_p12, %p5937_p11 }
  0x24   : > { %p5940_p0 = pneg %p5939_p13 }
  0x26   : > { %p5945_p5 = pnand %p5943_p3, %p5940_p0 }
  0x28   : > { %5948 = shalt.err (!%p5945_p5)
}
  0x29   : > { %s5949_s20 = scalar_lea.vmem %s157_s28, 32768  ;;  %p5957_p1 = scmp.lt.s32.totalorder %s157_s28, %s157_s28 }
  0x2a   : > { %p5950_p7 = scmp.ne.s32.totalorder %s157_s28, %s5949_s20  ;;  %p5958_p4 = scmp.lt.s32.totalorder %s5949_s20, %s5949_s20 }
  0x2c   : > { %p5952_p9 = pnand %p5950_p7, %p5938_p12  ;;  %p5959_p8 = por %p5958_p4, %p5957_p1 }
  0x2e   : > { %p5953_p6 = pneg %p5952_p9 }
  0x30   : > { %p5960_p2 = pnand %p5959_p8, %p5953_p6 }
  0x32   : > { %5963 = shalt.err (!%p5960_p2)
}
  0x33   : > { %s6128_s21 = smov 512   ;;  %s6129_s27 = smov 32  }
  0x34   : > { %5686 = dma.hbm_to_vmem [thread:$0]  (!%p6227_p10), %s6925_s1, 32768, %s157_s28, [#allocation6], %s6128_s21, %s6128_s21, %s6129_s27  }
  0x35   : > { %s6926_s2 = sld [smem:[#allocation16_spill]] }
  0x3b   : > { %s5964_s8 = scalar_lea.hbm %s6926_s2, 128 }
  0x3c   : > { %p5965_p11 = scmp.ne.s32.totalorder %s6926_s2, %s5964_s8  ;;  %p5971_p4 = scmp.lt.u32.totalorder %s5964_s8, %s6926_s2 }
  0x3e   : > { %p5967_p1 = pnand %p5965_p11, %p5938_p12 }
  0x40   : > { %p5968_p2 = pneg %p5967_p1 }
  0x42   : > { %p5973_p6 = pnand %p5971_p4, %p5968_p2 }
  0x44   : > { %5976 = shalt.err (!%p5973_p6)
}
  0x45   : > { %s5977_s28 = scalar_lea.vmem %s6231_s4, 128  ;;  %p5985_p3 = scmp.lt.s32.totalorder %s6231_s4, %s6231_s4 }
  0x46   : > { %p5978_p8 = scmp.ne.s32.totalorder %s6231_s4, %s5977_s28  ;;  %p5986_p5 = scmp.lt.s32.totalorder %s5977_s28, %s5977_s28 }
  0x48   : > { %p5980_p13 = pnand %p5978_p8, %p5938_p12  ;;  %p5987_p7 = por %p5986_p5, %p5985_p3 }
  0x4a   : > { %p5981_p0 = pneg %p5980_p13 }
  0x4c   : > { %p5988_p9 = pnand %p5987_p7, %p5981_p0 }
  0x4e   : > { %5991 = shalt.err (!%p5988_p9)
}
  0x4f   : > { %5689 = dma.hbm_to_vmem [thread:$0]  (!%p6227_p10), %s6926_s2, 128, %s6231_s4, [#allocation6]  }
  0x50   : > { %s35_s30 = sadd.s32 1, %s6116_s17  ;;  %s39_s5 = sadd.s32 1, %s6120_s18 }
  0x51   : > { %p37_p12 = scmp.ge.s32.totalorder %s35_s30, 2  ;;  %s50_s29 = sadd.s32 1, %s6104_s14 }
  0x52   : > { %p57_p11 = scmp.ne.s32.totalorder %s6104_s14, %s6100_s13  ;;  %p58_p1 = scmp.eq.s32.totalorder %s6124_s19, 0 }
  0x53   : > { %s6947_s30 = smov (%p37_p12, %s35_s30), 0  ;;  %s6949_s5 = smov (!%p37_p12, %s39_s5), %s6120_s18 }
  0x54   : > { %6927 = sst [smem:[#allocation14_spill]] %s6947_s30  ;;  %s46_s6 = ssub.s32 %s6116_s17, %s6947_s30 }
  0x55   : > { %p6291_p2 = por %p58_p1, %p57_p11  ;;  %p41_p10 = scmp.ge.s32.totalorder %s6949_s5, 2 }
  0x56   : > { %p6929_p4 = scmp.ne.s32.totalorder %s6919_s23, 0  ;;  %p5700_p8 = scmp.lt.s32.totalorder %s6124_s19, 4 }
  0x57   : > { %s181_s8 = sand.u32 1, %s6104_s14   ;;  %s6951_s5 = smov (%p41_p10, %s6949_s5), 0 }
  0x58   : > { %p6297_p6 = por %p6929_p4, %p57_p11  ;;  %s4822_s9 = sshll.u32 %s181_s8, 9 }
  0x59   : > { %s45_s10 = ssub.s32 %s6120_s18, %s6951_s5  ;;  %s5158_s20 = sshll.u32 %s6116_s17, 7 }
  0x5a   : > { %s47_s11 = sor.u32 %s46_s6, %s45_s10  ;;  %s4825_s28 = sshll.u32 %s6120_s18, 8 }
  0x5b   : > { %p48_p13 = scmp.eq.s32.totalorder %s47_s11, 0  ;;  %s193_s21 = sadd.s32 %s5158_s20, %s4825_s28 }
  0x5c   : > { %s185_s27 = scalar_lea.vmem [#allocation2], %s4822_s9  ;;  %s4826_s2 = sshll.u32 %s193_s21, 6 }
  0x5d   : > { %s196_s23 = sshll.u32 %s185_s27, 4  ;;  %s6317_s12 = scalar_lea.hbm %s6904_s0, %s4826_s2  ;;  %s6312_s23 = int_to_ptr.vmem [resolvable:$true] %s196_s23 }
  0x5e   : > { %s6310_s1 = scalar_select %p48_p13, %s6104_s14, %s50_s29  }
  0x5f   : > { %p6323_p0 = pnand %p5700_p8, %p6291_p2  ;;  %s6327_s29 = scalar_lea.sflag [#allocation3], %s181_s8 }
  0x60   : > { %s5992_s9 = scalar_lea.hbm %s6317_s12, 8192  ;;  %s5997_s30 = scalar_lea.hbm %s6904_s0, 32768 }
  0x61   : > { %p5993_p3 = scmp.ne.s32.totalorder %s6317_s12, %s5992_s9  ;;  %p5994_p5 = pneg %p6323_p0 }
  0x62   : > { %p5998_p12 = scmp.lt.u32.totalorder %s6317_s12, %s6904_s0  ;;  %p5999_p11 = scmp.lt.u32.totalorder %s5997_s30, %s5992_s9 }
  0x63   : > { %p5995_p7 = pnand %p5994_p5, %p5993_p3  ;;  %p6001_p2 = scmp.lt.u32.totalorder %s5992_s9, %s6317_s12 }
  0x64   : > { %p6000_p1 = por %p5999_p11, %p5998_p12 }
  0x65   : > { %p5996_p9 = pneg %p5995_p7 }
  0x66   : > { %p6002_p10 = por %p6001_p2, %p6000_p1 }
  0x68   : > { %p6003_p4 = pnand %p6002_p10, %p5996_p9 }
  0x6a   : > { %6006 = shalt.err (!%p6003_p4)
}
  0x6b   : > { %s6007_s8 = scalar_lea.vmem %s6312_s23, 8192  ;;  %s6130_s11 = smov [#allocation2]  }
  0x6c   : > { %p6008_p8 = scmp.ne.s32.totalorder %s6312_s23, %s6007_s8  ;;  %s6012_s20 = sshll.u32 %s6130_s11, 4  ;;  %s6013_s20 = int_to_ptr.vmem [resolvable:$false] %s6012_s20 }
  0x6d   : > { %s6014_s28 = scalar_lea.vmem %s6013_s20, 16384  ;;  %p6015_p7 = scmp.lt.s32.totalorder %s6312_s23, %s6013_s20 }
  0x6e   : > { %p6010_p13 = pnand %p6008_p8, %p5994_p5  ;;  %p6016_p12 = scmp.lt.s32.totalorder %s6014_s28, %s6007_s8 }
  0x70   : > { %p6011_p3 = pneg %p6010_p13  ;;  %p6017_p11 = por %p6016_p12, %p6015_p7 }
  0x72   : > { %p6018_p1 = pnand %p6017_p11, %p6011_p3 }
  0x74   : > { %6021 = shalt.err (!%p6018_p1)
}
  0x75   : > { %s6131_s21 = smov 256   ;;  %s6132_s27 = smov 16  }
  0x76   : > { %5693 = dma.hbm_to_vmem [thread:$0]  (!%p6323_p0), %s6317_s12, 8192, %s6312_s23, %s6327_s29, %s6131_s21, %s6131_s21, %s6132_s27  }
  0x77   : > { %p6932_p5 = scmp.ne.s32.totalorder %s6923_s26, 0 }
  0x78   : > { %s6358_s9 = sand.u32 (!%p6932_p5), 1, %s6100_s13   ;;  %p6933_p9 = scmp.ne.s32.totalorder (!%p6932_p5), %s6920_s24, 0 }
  0x79   : > { %208 = sbr.rel (%p6932_p5) target bundleno = 963 (0x3c3), region = 32  ;;  %s4828_s2 = sshll.u32 (!%p6932_p5), %s6358_s9, 9 }
  0x7a   : > { %s211_s25 = scalar_lea.sflag (!%p6932_p5), [#allocation3], %s6358_s9  ;;  %s6362_s30 = scalar_lea.vmem (!%p6932_p5), [#allocation2], %s4828_s2 }
  0x80   : > { %6083 = dma.done.wait (%p6933_p9), %s211_s25, 8192  }
  0x81   : > { %6085 = vsyncadd (%p6933_p9), %s211_s25, 4294959104  ;;  %p6934_p0 = scmp.ne.s32.totalorder %s6918_s22, 0 }
  0x83   : > { %6087 = dma.done.wait (%p6934_p0), [#allocation6], 32896  }
  0x84   : > { %6089 = vsyncadd (%p6934_p0), [#allocation6], 4294934400  ;;  %v311_v0 = vld [vmem:[#allocation5] sm:$0xff]  ;;  %v312_v2 = vld [vmem:[#allocation5 + $0x8] sm:$0xff]  ;;  %s4831_s12 = sshll.u32 %s6358_s9, 3  ;;  %s5153_s22 = sshll.u32 %s6108_s15, 3 }
  0x85   : > { %v315_v1 = vld [vmem:[#allocation5 + $0x20] sm:$0xff]  ;;  %v316_v4 = vld [vmem:[#allocation5 + $0x28] sm:$0xff]  ;;  %s5154_s24 = sshll.u32 %s6112_s16, 4  ;;  %s244_s6 = scalar_lea.vmem [#allocation8], %s4831_s12 }
  0x86   : > { %v4897_v3 = vcombine.high %v311_v0, %v315_v1  ;;  %v4896_v5 = vcombine.low %v311_v0, %v315_v1  ;;  %v319_v6 = vld [vmem:[#allocation5 + $0x40] sm:$0xff]  ;;  %v4899_v8 = vcombine.high %v312_v2, %v316_v4  ;;  %v4898_v9 = vcombine.low %v312_v2, %v316_v4  ;;  %v320_v11 = vld [vmem:[#allocation5 + $0x48] sm:$0xff]  ;;  %s4702_s26 = sadd.s32 %s5154_s24, %s5153_s22  ;;  %s4706_s29 = sshll.u32 %s244_s6, 4  ;;  %s6852_s29 = int_to_ptr.vmem [resolvable:$true] %s4706_s29 }
  0x87   : > { %v323_v7 = vld [vmem:[#allocation5 + $0x60] sm:$0xff]  ;;  %v324_v12 = vld [vmem:[#allocation5 + $0x68] sm:$0xff]  ;;  %s5155_s23 = sshll.u32 %s4702_s26, 4  ;;  %s4690_s10 = scalar_lea.sflag [#allocation4], %s6358_s9 }
  0x88   : > { %v4905_v10 = vcombine.high %v319_v6, %v323_v7  ;;  %v327_v13 = vld [vmem:[#allocation5 + $0x80] sm:$0xff]  ;;  %2209 = vmatprep.subr.bf16.mxu0 %v4897_v3  ;;  %v4907_v14 = vcombine.high %v320_v11, %v324_v12  ;;  %v328_v16 = vld [vmem:[#allocation5 + $0x88] sm:$0xff]  ;;  %2595 = vmatprep.subr.bf16.mxu1 %v4899_v8  ;;  %v4904_v18 = vcombine.low %v319_v6, %v323_v7  ;;  %s6850_s7 = scalar_lea.hbm %s6907_s3, %s5155_s23  ;;  %s6022_s8 = scalar_lea.vmem %s6852_s29, 128 }
  0x89   : > { %v331_v15 = vld [vmem:[#allocation5 + $0xa0] sm:$0xff]  ;;  %v332_v17 = vld [vmem:[#allocation5 + $0xa8] sm:$0xff]  ;;  %2210 = vmatpush1.bf16.msra.mxu0 %v4896_v5  ;;  %2596 = vmatpush1.bf16.msra.mxu1 %v4898_v9  ;;  %v4906_v19 = vcombine.low %v320_v11, %v324_v12  ;;  %p6023_p2 = scmp.ne.s32.totalorder %s6852_s29, %s6022_s8  ;;  %s6134_s11 = smov [#allocation8]  }
  0x8a   : > { %2211 = vmatprep.subr.bf16.mxu0 %v4905_v10  ;;  %v4913_v20 = vcombine.high %v327_v13, %v331_v15  ;;  %2597 = vmatprep.subr.bf16.mxu1 %v4907_v14  ;;  %v4915_v21 = vcombine.high %v328_v16, %v332_v17  ;;  %v335_v22 = vld [vmem:[#allocation5 + $0xc0] sm:$0xff]  ;;  %v336_v24 = vld [vmem:[#allocation5 + $0xc8] sm:$0xff]  ;;  %v4912_v26 = vcombine.low %v327_v13, %v331_v15  ;;  %s6026_s20 = sshll.u32 %s6134_s11, 4  ;;  %s6027_s20 = int_to_ptr.vmem [resolvable:$false] %s6026_s20 }
  0x8b   : > { %v339_v23 = vld [vmem:[#allocation5 + $0xe0] sm:$0xff]  ;;  %v340_v25 = vld [vmem:[#allocation5 + $0xe8] sm:$0xff]  ;;  %v4914_v27 = vcombine.low %v328_v16, %v332_v17  ;;  %p6024_p10 = pnand %p6023_p2, %p6297_p6  ;;  %s6028_s28 = scalar_lea.vmem %s6027_s20, 256 }
  0x8c   : > { %v4921_v28 = vcombine.high %v335_v22, %v339_v23  ;;  %v4923_v29 = vcombine.high %v336_v24, %v340_v25  ;;  %v343_v30 = vld [vmem:[#allocation5 + $0x100] sm:$0xff]  ;;  %v344_v32 = vld [vmem:[#allocation5 + $0x108] sm:$0xff]  ;;  %v4920_v34 = vcombine.low %v335_v22, %v339_v23  ;;  %v4922_v35 = vcombine.low %v336_v24, %v340_v25  ;;  %p6029_p8 = scmp.lt.s32.totalorder %s6852_s29, %s6027_s20  ;;  %p6030_p13 = scmp.lt.s32.totalorder %s6028_s28, %s6022_s8 }
  0x8d   : > { %2212 = vmatpush1.bf16.msra.mxu0 %v4904_v18  ;;  %2598 = vmatpush1.bf16.msra.mxu1 %v4906_v19  ;;  %v347_v31 = vld [vmem:[#allocation5 + $0x120] sm:$0xff]  ;;  %v348_v33 = vld [vmem:[#allocation5 + $0x128] sm:$0xff]  ;;  %p6025_p4 = pneg %p6024_p10 }
  0x8e   : > { %2213 = vmatprep.subr.bf16.mxu0 %v4913_v20  ;;  %2599 = vmatprep.subr.bf16.mxu1 %v4915_v21  ;;  %v4929_v36 = vcombine.high %v343_v30, %v347_v31  ;;  %v4931_v37 = vcombine.high %v344_v32, %v348_v33  ;;  %v351_v38 = vld [vmem:[#allocation5 + $0x140] sm:$0xff]  ;;  %v352_v40 = vld [vmem:[#allocation5 + $0x148] sm:$0xff]  ;;  %v4928_v42 = vcombine.low %v343_v30, %v347_v31  ;;  %p6031_p3 = por %p6030_p13, %p6029_p8 }
  0x8f   : > { %v355_v39 = vld [vmem:[#allocation5 + $0x160] sm:$0xff]  ;;  %v356_v41 = vld [vmem:[#allocation5 + $0x168] sm:$0xff]  ;;  %v4930_v43 = vcombine.low %v344_v32, %v348_v33 }
  0x90   : > { %v4937_v44 = vcombine.high %v351_v38, %v355_v39  ;;  %v4939_v45 = vcombine.high %v352_v40, %v356_v41  ;;  %v359_v46 = vld [vmem:[#allocation5 + $0x180] sm:$0xff]  ;;  %v360_v48 = vld [vmem:[#allocation5 + $0x188] sm:$0xff]  ;;  %v4936_v50 = vcombine.low %v351_v38, %v355_v39  ;;  %v4938_v51 = vcombine.low %v352_v40, %v356_v41  ;;  %p6032_p7 = pnand %p6031_p3, %p6025_p4 }
  0x91   : > { %2214 = vmatpush1.bf16.msra.mxu0 %v4912_v26  ;;  %2600 = vmatpush1.bf16.msra.mxu1 %v4914_v27  ;;  %v363_v47 = vld [vmem:[#allocation5 + $0x1a0] sm:$0xff]  ;;  %v364_v49 = vld [vmem:[#allocation5 + $0x1a8] sm:$0xff] }
  0x92   : > { %2215 = vmatprep.subr.bf16.mxu0 %v4921_v28  ;;  %2601 = vmatprep.subr.bf16.mxu1 %v4923_v29  ;;  %v4945_v52 = vcombine.high %v359_v46, %v363_v47  ;;  %v4947_v53 = vcombine.high %v360_v48, %v364_v49  ;;  %v367_v54 = vld [vmem:[#allocation5 + $0x1c0] sm:$0xff]  ;;  %v368_v57 = vld [vmem:[#allocation5 + $0x1c8] sm:$0xff]  ;;  %v4944_v59 = vcombine.low %v359_v46, %v363_v47 }
  0x93   : > { %v371_v55 = vld [vmem:[#allocation5 + $0x1e0] sm:$0xff]  ;;  %v372_v58 = vld [vmem:[#allocation5 + $0x1e8] sm:$0xff]  ;;  %v4946_v60 = vcombine.low %v360_v48, %v364_v49 }
  0x94   : > { %v5775_v56 = vld [vmem:[%s6362_s30 + $0x4] ss:$16 sps:$4 sm:$0xff]   ;;  %v4953_v61 = vcombine.high %v367_v54, %v371_v55  ;;  %v4955_v62 = vcombine.high %v368_v57, %v372_v58  ;;  %v376_v1 = vld [vmem:[#allocation5 + $0x208] sm:$0xff]  ;;  %v4952_v3 = vcombine.low %v367_v54, %v371_v55  ;;  %v4954_v4 = vcombine.low %v368_v57, %v372_v58 }
  0x95   : > { %2216 = vmatpush1.bf16.msra.mxu0 %v4920_v34  ;;  %2602 = vmatpush1.bf16.msra.mxu1 %v4922_v35  ;;  %v375_v63 = vld [vmem:[#allocation5 + $0x200] sm:$0xff]  ;;  %v380_v2 = vld [vmem:[#allocation5 + $0x228] sm:$0xff] }
  0x96   : > { %2217 = vmatprep.subr.bf16.mxu0 %v4929_v36  ;;  %2603 = vmatprep.subr.bf16.mxu1 %v4931_v37  ;;  %v379_v0 = vld [vmem:[#allocation5 + $0x220] sm:$0xff]  ;;  %v4963_v6 = vcombine.high %v376_v1, %v380_v2  ;;  %v384_v9 = vld [vmem:[#allocation5 + $0x248] sm:$0xff]  ;;  %v4962_v12 = vcombine.low %v376_v1, %v380_v2 }
  0x97   : > { %2241 = vmatprep.mubr.bf16.mxu0 %v5775_v56  ;;  %2627 = vmatprep.mubr.bf16.mxu1 %v5775_v56  ;;  %v4961_v5 = vcombine.high %v375_v63, %v379_v0  ;;  %v383_v7 = vld [vmem:[#allocation5 + $0x240] sm:$0xff]  ;;  %v388_v10 = vld [vmem:[#allocation5 + $0x268] sm:$0xff]  ;;  %v4960_v11 = vcombine.low %v375_v63, %v379_v0 }
  0x98   : > { %v387_v8 = vld [vmem:[#allocation5 + $0x260] sm:$0xff]  ;;  %v4971_v14 = vcombine.high %v384_v9, %v388_v10  ;;  %v392_v17 = vld [vmem:[#allocation5 + $0x288] sm:$0xff]  ;;  %v4970_v20 = vcombine.low %v384_v9, %v388_v10 }
  0x99   : > { %2218 = vmatpush1.bf16.msra.mxu0 %v4928_v42  ;;  %2604 = vmatpush1.bf16.msra.mxu1 %v4930_v43  ;;  %v4969_v13 = vcombine.high %v383_v7, %v387_v8  ;;  %v391_v15 = vld [vmem:[#allocation5 + $0x280] sm:$0xff]  ;;  %v396_v18 = vld [vmem:[#allocation5 + $0x2a8] sm:$0xff]  ;;  %v4968_v19 = vcombine.low %v383_v7, %v387_v8 }
  0x9a   : > { %2219 = vmatprep.subr.bf16.mxu0 %v4937_v44  ;;  %2605 = vmatprep.subr.bf16.mxu1 %v4939_v45  ;;  %v395_v16 = vld [vmem:[#allocation5 + $0x2a0] sm:$0xff]  ;;  %v4979_v22 = vcombine.high %v392_v17, %v396_v18  ;;  %v400_v25 = vld [vmem:[#allocation5 + $0x2c8] sm:$0xff]  ;;  %v4978_v28 = vcombine.low %v392_v17, %v396_v18 }
  0x9b   : > { %v4977_v21 = vcombine.high %v391_v15, %v395_v16  ;;  %v399_v23 = vld [vmem:[#allocation5 + $0x2c0] sm:$0xff]  ;;  %v404_v26 = vld [vmem:[#allocation5 + $0x2e8] sm:$0xff]  ;;  %v4976_v27 = vcombine.low %v391_v15, %v395_v16 }
  0x9c   : > { %v403_v24 = vld [vmem:[#allocation5 + $0x2e0] sm:$0xff]  ;;  %v4987_v30 = vcombine.high %v400_v25, %v404_v26  ;;  %v408_v33 = vld [vmem:[#allocation5 + $0x308] sm:$0xff]  ;;  %v4986_v36 = vcombine.low %v400_v25, %v404_v26 }
  0x9d   : > { %2220 = vmatpush1.bf16.msra.mxu0 %v4936_v50  ;;  %2606 = vmatpush1.bf16.msra.mxu1 %v4938_v51  ;;  %v4985_v29 = vcombine.high %v399_v23, %v403_v24  ;;  %v407_v31 = vld [vmem:[#allocation5 + $0x300] sm:$0xff]  ;;  %v412_v34 = vld [vmem:[#allocation5 + $0x328] sm:$0xff]  ;;  %v4984_v35 = vcombine.low %v399_v23, %v403_v24  ;;  %v6377_v23 = vld [vmem:[#allocation5 + $0x30] sm:$0xff] }
  0x9e   : > { %2221 = vmatprep.subr.bf16.mxu0 %v4945_v52  ;;  %2607 = vmatprep.subr.bf16.mxu1 %v4947_v53  ;;  %v411_v32 = vld [vmem:[#allocation5 + $0x320] sm:$0xff]  ;;  %v4995_v38 = vcombine.high %v408_v33, %v412_v34  ;;  %v416_v41 = vld [vmem:[#allocation5 + $0x348] sm:$0xff]  ;;  %v4994_v44 = vcombine.low %v408_v33, %v412_v34  ;;  %v6379_v24 = vld [vmem:[#allocation5 + $0x18] sm:$0xff] }
  0x9f   : > { %v4993_v37 = vcombine.high %v407_v31, %v411_v32  ;;  %v415_v39 = vld [vmem:[#allocation5 + $0x340] sm:$0xff]  ;;  %v420_v42 = vld [vmem:[#allocation5 + $0x368] sm:$0xff]  ;;  %v4992_v43 = vcombine.low %v407_v31, %v411_v32  ;;  %v6384_v31 = vld [vmem:[#allocation5 + $0x38] sm:$0xff] }
  0xa0   : > { %v419_v40 = vld [vmem:[#allocation5 + $0x360] sm:$0xff]  ;;  %v5003_v46 = vcombine.high %v416_v41, %v420_v42  ;;  %v424_v49 = vld [vmem:[#allocation5 + $0x388] sm:$0xff]  ;;  %v5002_v52 = vcombine.low %v416_v41, %v420_v42 }
  0xa1   : > { %2222 = vmatpush1.bf16.msra.mxu0 %v4944_v59  ;;  %2608 = vmatpush1.bf16.msra.mxu1 %v4946_v60  ;;  %v5001_v45 = vcombine.high %v415_v39, %v419_v40  ;;  %v423_v47 = vld [vmem:[#allocation5 + $0x380] sm:$0xff]  ;;  %v428_v50 = vld [vmem:[#allocation5 + $0x3a8] sm:$0xff]  ;;  %v5000_v51 = vcombine.low %v415_v39, %v419_v40 }
  0xa2   : > { %2223 = vmatprep.subr.bf16.mxu0 %v4953_v61  ;;  %2609 = vmatprep.subr.bf16.mxu1 %v4955_v62  ;;  %v427_v48 = vld [vmem:[#allocation5 + $0x3a0] sm:$0xff]  ;;  %v5011_v54 = vcombine.high %v424_v49, %v428_v50  ;;  %v432_v57 = vld [vmem:[#allocation5 + $0x3c8] sm:$0xff]  ;;  %v5010_v60 = vcombine.low %v424_v49, %v428_v50 }
  0xa3   : > { %v5009_v53 = vcombine.high %v423_v47, %v427_v48  ;;  %v431_v55 = vld [vmem:[#allocation5 + $0x3c0] sm:$0xff]  ;;  %v436_v58 = vld [vmem:[#allocation5 + $0x3e8] sm:$0xff]  ;;  %v5008_v59 = vcombine.low %v423_v47, %v427_v48 }
  0xa4   : > { %v435_v56 = vld [vmem:[#allocation5 + $0x3e0] sm:$0xff]  ;;  %v5019_v62 = vcombine.high %v432_v57, %v436_v58  ;;  %v440_v1 = vld [vmem:[#allocation5 + $0x408] sm:$0xff] }
  0xa5   : > { %2224 = vmatpush1.bf16.msra.mxu0 %v4952_v3  ;;  %2610 = vmatpush1.bf16.msra.mxu1 %v4954_v4  ;;  %v5017_v61 = vcombine.high %v431_v55, %v435_v56  ;;  %v439_v63 = vld [vmem:[#allocation5 + $0x400] sm:$0xff]  ;;  %v444_v2 = vld [vmem:[#allocation5 + $0x428] sm:$0xff]  ;;  %v5016_v3 = vcombine.low %v431_v55, %v435_v56  ;;  %v5018_v4 = vcombine.low %v432_v57, %v436_v58 }
  0xa6   : > { %2225 = vmatprep.subr.bf16.mxu0 %v4961_v5  ;;  %2611 = vmatprep.subr.bf16.mxu1 %v4963_v6  ;;  %v443_v0 = vld [vmem:[#allocation5 + $0x420] sm:$0xff]  ;;  %v5027_v7 = vcombine.high %v440_v1, %v444_v2  ;;  %v5026_v16 = vcombine.low %v440_v1, %v444_v2  ;;  %v456_v17 = vld [vmem:[#allocation5 + $0x488] sm:$0xff] }
  0xa7   : > { %v5025_v5 = vcombine.high %v439_v63, %v443_v0  ;;  %v5777_v6 = vld [vmem:[%s6362_s30] ss:$16 sps:$4 sm:$0xff]   ;;  %v5778_v9 = vld [vmem:[%s6362_s30 + $0x24] ss:$16 sps:$4 sm:$0xff]   ;;  %v460_v18 = vld [vmem:[#allocation5 + $0x4a8] sm:$0xff] }
  0xa8   : > { %v447_v8 = vld [vmem:[#allocation5 + $0x440] sm:$0xff]  ;;  %v5043_v33 = vcombine.high %v456_v17, %v460_v18  ;;  %v464_v34 = vld [vmem:[#allocation5 + $0x4c8] sm:$0xff]  ;;  %v5042_v40 = vcombine.low %v456_v17, %v460_v18 }
  0xa9   : > { %2226 = vmatpush1.bf16.msra.mxu0 %v4960_v11  ;;  %2612 = vmatpush1.bf16.msra.mxu1 %v4962_v12  ;;  %v451_v10 = vld [vmem:[#allocation5 + $0x460] sm:$0xff]  ;;  %v448_v11 = vld [vmem:[#allocation5 + $0x448] sm:$0xff] }
  0xaa   : > { %2227 = vmatprep.subr.bf16.mxu0 %v4969_v13  ;;  %2613 = vmatprep.subr.bf16.mxu1 %v4971_v14  ;;  %v452_v12 = vld [vmem:[#allocation5 + $0x468] sm:$0xff]  ;;  %v5024_v13 = vcombine.low %v439_v63, %v443_v0  ;;  %v455_v14 = vld [vmem:[#allocation5 + $0x480] sm:$0xff] }
  0xab   : > { %v459_v15 = vld [vmem:[#allocation5 + $0x4a0] sm:$0xff]  ;;  %v5034_v26 = vcombine.low %v448_v11, %v452_v12 }
  0xac   : > { %v5780_v25 = vld [vmem:[%s6362_s30 + $0x20] ss:$16 sps:$4 sm:$0xff]   ;;  %v5781_v32 = vld [vmem:[%s6362_s30 + $0x44] ss:$16 sps:$4 sm:$0xff]  }
  0xad   : > { %2228 = vmatpush1.bf16.msra.mxu0 %v4968_v19  ;;  %2614 = vmatpush1.bf16.msra.mxu1 %v4970_v20  ;;  %v5033_v19 = vcombine.high %v447_v8, %v451_v10  ;;  %v5035_v20 = vcombine.high %v448_v11, %v452_v12  ;;  %v475_v39 = vld [vmem:[#allocation5 + $0x520] sm:$0xff] }
  0xae   : > { %2229 = vmatprep.subr.bf16.mxu0 %v4977_v21  ;;  %2615 = vmatprep.subr.bf16.mxu1 %v4979_v22  ;;  %v5032_v21 = vcombine.low %v447_v8, %v451_v10  ;;  %v6375_v22 = vld [vmem:[#allocation5 + $0x10] sm:$0xff]  ;;  %v479_v50 = vld [vmem:[#allocation5 + $0x540] sm:$0xff]  ;;  %v500_v8 = vld [vmem:[#allocation5 + $0x5e8] sm:$0xff] }
  0xaf   : > { %v5786_v2 = vld [vmem:[%s6362_s30 + $0x60] ss:$16 sps:$4 sm:$0xff]  }
  0xb1   : > { %2230 = vmatpush1.bf16.msra.mxu0 %v4976_v27  ;;  %2616 = vmatpush1.bf16.msra.mxu1 %v4978_v28  ;;  %v5041_v27 = vcombine.high %v455_v14, %v459_v15  ;;  %v463_v28 = vld [vmem:[#allocation5 + $0x4c0] sm:$0xff] }
  0xb2   : > { %2231 = vmatprep.subr.bf16.mxu0 %v4985_v29  ;;  %2617 = vmatprep.subr.bf16.mxu1 %v4987_v30  ;;  %v467_v29 = vld [vmem:[#allocation5 + $0x4e0] sm:$0xff]  ;;  %v4900_v30 = vcombine.low %v6375_v22, %v6377_v23 }
  0xb3   : > { %v5049_v41 = vcombine.high %v463_v28, %v467_v29 }
  0xb5   : > { %2232 = vmatpush1.bf16.msra.mxu0 %v4984_v35  ;;  %2618 = vmatpush1.bf16.msra.mxu1 %v4986_v36  ;;  %v468_v35 = vld [vmem:[#allocation5 + $0x4e8] sm:$0xff]  ;;  %v4902_v36 = vcombine.low %v6379_v24, %v6384_v31 }
  0xb6   : > { %2233 = vmatprep.subr.bf16.mxu0 %v4993_v37  ;;  %2619 = vmatprep.subr.bf16.mxu1 %v4995_v38  ;;  %v5040_v37 = vcombine.low %v455_v14, %v459_v15  ;;  %v471_v38 = vld [vmem:[#allocation5 + $0x500] sm:$0xff]  ;;  %v5051_v42 = vcombine.high %v464_v34, %v468_v35  ;;  %v5050_v47 = vcombine.low %v464_v34, %v468_v35  ;;  %v504_v15 = vld [vmem:[#allocation5 + $0x608] sm:$0xff] }
  0xb7   : > { %v5057_v48 = vcombine.high %v471_v38, %v475_v39  ;;  %v5056_v55 = vcombine.low %v471_v38, %v475_v39  ;;  %v507_v14 = vld [vmem:[#allocation5 + $0x620] sm:$0xff]  ;;  %v520_v39 = vld [vmem:[#allocation5 + $0x688] sm:$0xff] }
  0xb8   : > { %v523_v38 = vld [vmem:[#allocation5 + $0x6a0] sm:$0xff] }
  0xb9   : > { %2234 = vmatpush1.bf16.msra.mxu0 %v4992_v43  ;;  %2620 = vmatpush1.bf16.msra.mxu1 %v4994_v44  ;;  %v472_v43 = vld [vmem:[#allocation5 + $0x508] sm:$0xff] }
  0xba   : > { %2235 = vmatprep.subr.bf16.mxu0 %v5001_v45  ;;  %2621 = vmatprep.subr.bf16.mxu1 %v5003_v46  ;;  %v476_v44 = vld [vmem:[#allocation5 + $0x528] sm:$0xff]  ;;  %v5783_v45 = vld [vmem:[%s6362_s30 + $0x40] ss:$16 sps:$4 sm:$0xff]   ;;  %v5048_v46 = vcombine.low %v463_v28, %v467_v29 }
  0xbb   : > { %v5059_v49 = vcombine.high %v472_v43, %v476_v44  ;;  %v5058_v56 = vcombine.low %v472_v43, %v476_v44  ;;  %v512_v28 = vld [vmem:[#allocation5 + $0x648] sm:$0xff]  ;;  %v5792_v44 = vld [vmem:[%s6362_s30 + $0xa0] ss:$16 sps:$4 sm:$0xff]  }
  0xbc   : > { %v516_v29 = vld [vmem:[#allocation5 + $0x668] sm:$0xff] }
  0xbd   : > { %2236 = vmatpush1.bf16.msra.mxu0 %v5000_v51  ;;  %2622 = vmatpush1.bf16.msra.mxu1 %v5002_v52  ;;  %v483_v51 = vld [vmem:[#allocation5 + $0x560] sm:$0xff]  ;;  %v5099_v35 = vcombine.high %v512_v28, %v516_v29 }
  0xbe   : > { %2237 = vmatprep.subr.bf16.mxu0 %v5009_v53  ;;  %2623 = vmatprep.subr.bf16.mxu1 %v5011_v54  ;;  %v5784_v52 = vld [vmem:[%s6362_s30 + $0x64] ss:$16 sps:$4 sm:$0xff]   ;;  %v480_v53 = vld [vmem:[#allocation5 + $0x548] sm:$0xff]  ;;  %v5065_v57 = vcombine.high %v479_v50, %v483_v51  ;;  %v5064_v63 = vcombine.low %v479_v50, %v483_v51 }
  0xbf   : > { %v484_v54 = vld [vmem:[#allocation5 + $0x568] sm:$0xff] }
  0xc0   : > { %v5067_v58 = vcombine.high %v480_v53, %v484_v54  ;;  %v5066_v0 = vcombine.low %v480_v53, %v484_v54  ;;  %v532_v50 = vld [vmem:[#allocation5 + $0x6e8] sm:$0xff] }
  0xc1   : > { %2238 = vmatpush1.bf16.msra.mxu0 %v5008_v59  ;;  %2624 = vmatpush1.bf16.msra.mxu1 %v5010_v60  ;;  %v487_v59 = vld [vmem:[#allocation5 + $0x580] sm:$0xff] }
  0xc2   : > { %2239 = vmatprep.subr.bf16.mxu0 %v5017_v61  ;;  %2625 = vmatprep.subr.bf16.mxu1 %v5019_v62  ;;  %v491_v60 = vld [vmem:[#allocation5 + $0x5a0] sm:$0xff]  ;;  %v488_v61 = vld [vmem:[#allocation5 + $0x588] sm:$0xff] }
  0xc3   : > { %v492_v62 = vld [vmem:[#allocation5 + $0x5a8] sm:$0xff]  ;;  %v5073_v1 = vcombine.high %v487_v59, %v491_v60 }
  0xc4   : > { %v5074_v10 = vcombine.low %v488_v61, %v492_v62 }
  0xc5   : > { %2240 = vmatpush1.bf16.msra.mxu0 %v5016_v3  ;;  %2626 = vmatpush1.bf16.msra.mxu1 %v5018_v4  ;;  %v5075_v3 = vcombine.high %v488_v61, %v492_v62  ;;  %v495_v4 = vld [vmem:[#allocation5 + $0x5c0] sm:$0xff] }
  0xc6   : > { %2402 = vmatprep.subr.bf16.mxu0 %v5025_v5  ;;  %2788 = vmatprep.subr.bf16.mxu1 %v5027_v7  ;;  %v499_v5 = vld [vmem:[#allocation5 + $0x5e0] sm:$0xff]  ;;  %v496_v7 = vld [vmem:[#allocation5 + $0x5c8] sm:$0xff] }
  0xc7   : > { %v5081_v11 = vcombine.high %v495_v4, %v499_v5  ;;  %v5083_v12 = vcombine.high %v496_v7, %v500_v8  ;;  %v5080_v17 = vcombine.low %v495_v4, %v499_v5  ;;  %v5082_v18 = vcombine.low %v496_v7, %v500_v8  ;;  %v5795_v62 = vld [vmem:[%s6362_s30 + $0xc0] ss:$16 sps:$4 sm:$0xff]   ;;  %v548_v4 = vld [vmem:[#allocation5 + $0x768] sm:$0xff] }
  0xc8   : > { %2242 = vmatmul.mubr.bf16.vlgmr.msra.gmra.mrb[0].mxu0 %v5777_v6  ;;  %2628 = vmatmul.mubr.bf16.vlgmr.msra.gmra.mrb[0].mxu1 %v5777_v6  ;;  %v5787_v6 = vld [vmem:[%s6362_s30 + $0x84] ss:$16 sps:$4 sm:$0xff]  }
  0xc9   : > { %2403 = vmatpush1.bf16.msra.mxu0 %v5024_v13  ;;  %2789 = vmatpush1.bf16.msra.mxu1 %v5026_v16  ;;  %v503_v13 = vld [vmem:[#allocation5 + $0x600] sm:$0xff]  ;;  %v508_v16 = vld [vmem:[#allocation5 + $0x628] sm:$0xff] }
  0xca   : > { %2251 = vmatprep.mubr.bf16.mxu0 %v5778_v9  ;;  %2637 = vmatprep.mubr.bf16.mxu1 %v5778_v9  ;;  %v5072_v9 = vcombine.low %v487_v59, %v491_v60 }
  0xcb   : > { %2404 = vmatprep.subr.bf16.mxu0 %v5033_v19  ;;  %2790 = vmatprep.subr.bf16.mxu1 %v5035_v20  ;;  %v5089_v19 = vcombine.high %v503_v13, %v507_v14  ;;  %v5789_v20 = vld [vmem:[%s6362_s30 + $0x80] ss:$16 sps:$4 sm:$0xff]  }
  0xcd   : > { %2405 = vmatpush1.bf16.msra.mxu0 %v5032_v21  ;;  %2791 = vmatpush1.bf16.msra.mxu1 %v5034_v26  ;;  %v5091_v21 = vcombine.high %v504_v15, %v508_v16  ;;  %v515_v26 = vld [vmem:[#allocation5 + $0x660] sm:$0xff] }
  0xce   : > { %2406 = vmatprep.subr.bf16.mxu0 %v5041_v27  ;;  %2792 = vmatprep.subr.bf16.mxu1 %v5043_v33  ;;  %v5790_v27 = vld [vmem:[%s6362_s30 + $0xa4] ss:$16 sps:$4 sm:$0xff]   ;;  %v5090_v33 = vcombine.low %v504_v15, %v508_v16  ;;  %v5798_v16 = vld [vmem:[%s6362_s30 + $0xe0] ss:$16 sps:$4 sm:$0xff]  }
  0xd0   : > { %2252 = vmatmul.mubr.bf16.gmra.mrb[4].mxu0 %v5780_v25  ;;  %2638 = vmatmul.mubr.bf16.gmra.mrb[4].mxu1 %v5780_v25  ;;  %v511_v25 = vld [vmem:[#allocation5 + $0x640] sm:$0xff] }
  0xd1   : > { %2261 = vmatprep.mubr.bf16.mxu0 %v5781_v32  ;;  %2647 = vmatprep.mubr.bf16.mxu1 %v5781_v32  ;;  %v5088_v32 = vcombine.low %v503_v13, %v507_v14  ;;  %v5097_v34 = vcombine.high %v511_v25, %v515_v26 }
  0xd2   : > { %2407 = vmatpush1.bf16.msra.mxu0 %v5040_v37  ;;  %2793 = vmatpush1.bf16.msra.mxu1 %v5042_v40  ;;  %v519_v37 = vld [vmem:[#allocation5 + $0x680] sm:$0xff]  ;;  %v524_v40 = vld [vmem:[#allocation5 + $0x6a8] sm:$0xff] }
  0xd3   : > { %2408 = vmatprep.subr.bf16.mxu0 %v5049_v41  ;;  %2794 = vmatprep.subr.bf16.mxu1 %v5051_v42  ;;  %v5096_v41 = vcombine.low %v511_v25, %v515_v26  ;;  %v5098_v42 = vcombine.low %v512_v28, %v516_v29  ;;  %v5105_v43 = vcombine.high %v519_v37, %v523_v38  ;;  %v564_v25 = vld [vmem:[#allocation5 + $0x7e8] sm:$0xff] }
  0xd4   : > { %v5104_v51 = vcombine.low %v519_v37, %v523_v38  ;;  %v4903_v37 = vcombine.high %v6379_v24, %v6384_v31  ;;  %v5802_v38 = vld [vmem:[%s6362_s30 + $0x124] ss:$16 sps:$4 sm:$0xff]  }
  0xd6   : > { %2409 = vmatpush1.bf16.msra.mxu0 %v5048_v46  ;;  %2795 = vmatpush1.bf16.msra.mxu1 %v5050_v47  ;;  %v527_v46 = vld [vmem:[#allocation5 + $0x6c0] sm:$0xff] }
  0xd7   : > { %2410 = vmatprep.subr.bf16.mxu0 %v5057_v48  ;;  %2796 = vmatprep.subr.bf16.mxu1 %v5059_v49  ;;  %v531_v47 = vld [vmem:[#allocation5 + $0x6e0] sm:$0xff]  ;;  %v528_v49 = vld [vmem:[#allocation5 + $0x6c8] sm:$0xff] }
  0xd8   : > { %2262 = vmatmul.mubr.bf16.gmra.mrb[8].mxu0 %v5783_v45  ;;  %2648 = vmatmul.mubr.bf16.gmra.mrb[8].mxu1 %v5783_v45  ;;  %v5107_v45 = vcombine.high %v520_v39, %v524_v40  ;;  %v5793_v48 = vld [vmem:[%s6362_s30 + $0xc4] ss:$16 sps:$4 sm:$0xff]   ;;  %v5113_v53 = vcombine.high %v527_v46, %v531_v47  ;;  %v5115_v54 = vcombine.high %v528_v49, %v532_v50 }
  0xd9   : > { %2271 = vmatprep.mubr.bf16.mxu0 %v5784_v52  ;;  %2657 = vmatprep.mubr.bf16.mxu1 %v5784_v52  ;;  %v5106_v52 = vcombine.low %v520_v39, %v524_v40  ;;  %v5112_v59 = vcombine.low %v527_v46, %v531_v47  ;;  %v5114_v60 = vcombine.low %v528_v49, %v532_v50  ;;  %v5804_v39 = vld [vmem:[%s6362_s30 + $0x120] ss:$16 sps:$4 sm:$0xff]   ;;  %v5805_v40 = vld [vmem:[%s6362_s30 + $0x144] ss:$16 sps:$4 sm:$0xff]  }
  0xda   : > { %2411 = vmatpush1.bf16.msra.mxu0 %v5056_v55  ;;  %2797 = vmatpush1.bf16.msra.mxu1 %v5058_v56  ;;  %v535_v55 = vld [vmem:[#allocation5 + $0x700] sm:$0xff] }
  0xdb   : > { %2412 = vmatprep.subr.bf16.mxu0 %v5065_v57  ;;  %2798 = vmatprep.subr.bf16.mxu1 %v5067_v58  ;;  %v539_v56 = vld [vmem:[#allocation5 + $0x720] sm:$0xff]  ;;  %v536_v57 = vld [vmem:[#allocation5 + $0x708] sm:$0xff] }
  0xdc   : > { %v540_v58 = vld [vmem:[#allocation5 + $0x728] sm:$0xff]  ;;  %v5121_v61 = vcombine.high %v535_v55, %v539_v56  ;;  %v5120_v5 = vcombine.low %v535_v55, %v539_v56  ;;  %v5814_v46 = vld [vmem:[%s6362_s30 + $0x1a4] ss:$16 sps:$4 sm:$0xff]   ;;  %v5816_v47 = vld [vmem:[%s6362_s30 + $0x1a0] ss:$16 sps:$4 sm:$0xff]  }
  0xdd   : > { %v5819_v49 = vld [vmem:[%s6362_s30 + $0x1c0] ss:$16 sps:$4 sm:$0xff]   ;;  %v5820_v50 = vld [vmem:[%s6362_s30 + $0x1e4] ss:$16 sps:$4 sm:$0xff]   ;;  %v322_v56 = vld [vmem:[#allocation5 + $0x58] sm:$0xff] }
  0xde   : > { %2413 = vmatpush1.bf16.msra.mxu0 %v5064_v63  ;;  %2799 = vmatpush1.bf16.msra.mxu1 %v5066_v0  ;;  %v5123_v63 = vcombine.high %v536_v57, %v540_v58  ;;  %v543_v0 = vld [vmem:[#allocation5 + $0x740] sm:$0xff]  ;;  %v325_v55 = vld [vmem:[#allocation5 + $0x70] sm:$0xff] }
  0xdf   : > { %2414 = vmatprep.subr.bf16.mxu0 %v5073_v1  ;;  %2800 = vmatprep.subr.bf16.mxu1 %v5075_v3  ;;  %v547_v1 = vld [vmem:[#allocation5 + $0x760] sm:$0xff]  ;;  %v544_v3 = vld [vmem:[#allocation5 + $0x748] sm:$0xff] }
  0xe0   : > { %2272 = vmatmul.mubr.bf16.gmra.mrb[12].mxu0 %v5786_v2  ;;  %2658 = vmatmul.mubr.bf16.gmra.mrb[12].mxu1 %v5786_v2  ;;  %v5796_v2 = vld [vmem:[%s6362_s30 + $0xe4] ss:$16 sps:$4 sm:$0xff]   ;;  %v5129_v7 = vcombine.high %v543_v0, %v547_v1  ;;  %v5131_v8 = vcombine.high %v544_v3, %v548_v4  ;;  %v5128_v13 = vcombine.low %v543_v0, %v547_v1  ;;  %v334_v0 = vld [vmem:[#allocation5 + $0xb8] sm:$0xff] }
  0xe1   : > { %2281 = vmatprep.mubr.bf16.mxu0 %v5787_v6  ;;  %2667 = vmatprep.mubr.bf16.mxu1 %v5787_v6  ;;  %v5122_v6 = vcombine.low %v536_v57, %v540_v58  ;;  %v5130_v14 = vcombine.low %v544_v3, %v548_v4  ;;  %v326_v57 = vld [vmem:[#allocation5 + $0x78] sm:$0xff]  ;;  %v6423_v1 = vld [vmem:[#allocation5 + $0x410] sm:$0xff] }
  0xe2   : > { %2415 = vmatpush1.bf16.msra.mxu0 %v5072_v9  ;;  %2801 = vmatpush1.bf16.msra.mxu1 %v5074_v10  ;;  %v551_v9 = vld [vmem:[#allocation5 + $0x780] sm:$0xff]  ;;  %v5826_v58 = vld [vmem:[%s6362_s30 + $0x2c] ss:$16 sps:$4 sm:$0xff]  }
  0xe3   : > { %2416 = vmatprep.subr.bf16.mxu0 %v5081_v11  ;;  %2802 = vmatprep.subr.bf16.mxu1 %v5083_v12  ;;  %v555_v10 = vld [vmem:[#allocation5 + $0x7a0] sm:$0xff]  ;;  %v552_v11 = vld [vmem:[#allocation5 + $0x788] sm:$0xff] }
  0xe4   : > { %v556_v12 = vld [vmem:[#allocation5 + $0x7a8] sm:$0xff]  ;;  %v5137_v15 = vcombine.high %v551_v9, %v555_v10  ;;  %v5136_v26 = vcombine.low %v551_v9, %v555_v10  ;;  %v337_v9 = vld [vmem:[#allocation5 + $0xd0] sm:$0xff] }
  0xe5   : > { %v341_v10 = vld [vmem:[#allocation5 + $0xf0] sm:$0xff] }
  0xe6   : > { %2417 = vmatpush1.bf16.msra.mxu0 %v5080_v17  ;;  %2803 = vmatpush1.bf16.msra.mxu1 %v5082_v18  ;;  %v5139_v17 = vcombine.high %v552_v11, %v556_v12  ;;  %v559_v18 = vld [vmem:[#allocation5 + $0x7c0] sm:$0xff] }
  0xe7   : > { %2418 = vmatprep.subr.bf16.mxu0 %v5089_v19  ;;  %2804 = vmatprep.subr.bf16.mxu1 %v5091_v21  ;;  %v563_v19 = vld [vmem:[#allocation5 + $0x7e0] sm:$0xff]  ;;  %v560_v21 = vld [vmem:[#allocation5 + $0x7c8] sm:$0xff] }
  0xe8   : > { %2282 = vmatmul.mubr.bf16.gmra.mrb[16].mxu0 %v5789_v20  ;;  %2668 = vmatmul.mubr.bf16.gmra.mrb[16].mxu1 %v5789_v20  ;;  %v5799_v20 = vld [vmem:[%s6362_s30 + $0x104] ss:$16 sps:$4 sm:$0xff]   ;;  %v5145_v28 = vcombine.high %v559_v18, %v563_v19  ;;  %v5147_v29 = vcombine.high %v560_v21, %v564_v25 }
  0xe9   : > { %2291 = vmatprep.mubr.bf16.mxu0 %v5790_v27  ;;  %2677 = vmatprep.mubr.bf16.mxu1 %v5790_v27  ;;  %v5138_v27 = vcombine.low %v552_v11, %v556_v12  ;;  %v5829_v11 = vld [vmem:[%s6362_s30 + $0x4c] ss:$16 sps:$4 sm:$0xff]  }
  0xea   : > { %2419 = vmatpush1.bf16.msra.mxu0 %v5088_v32  ;;  %2805 = vmatpush1.bf16.msra.mxu1 %v5090_v33  ;;  %v5144_v32 = vcombine.low %v559_v18, %v563_v19  ;;  %v5146_v33 = vcombine.low %v560_v21, %v564_v25  ;;  %v338_v12 = vld [vmem:[#allocation5 + $0xd8] sm:$0xff]  ;;  %v4924_v19 = vcombine.low %v337_v9, %v341_v10 }
  0xeb   : > { %2420 = vmatprep.subr.bf16.mxu0 %v5097_v34  ;;  %2806 = vmatprep.subr.bf16.mxu1 %v5099_v35  ;;  %v4901_v34 = vcombine.high %v6375_v22, %v6377_v23  ;;  %v5801_v35 = vld [vmem:[%s6362_s30 + $0x100] ss:$16 sps:$4 sm:$0xff]   ;;  %v350_v18 = vld [vmem:[#allocation5 + $0x138] sm:$0xff] }
  0xec   : > { %v5831_v25 = vld [vmem:[%s6362_s30 + $0x48] ss:$16 sps:$4 sm:$0xff]  }
  0xee   : > { %2421 = vmatpush1.bf16.msra.mxu0 %v5096_v41  ;;  %2807 = vmatpush1.bf16.msra.mxu1 %v5098_v42  ;;  %v5807_v41 = vld [vmem:[%s6362_s30 + $0x140] ss:$16 sps:$4 sm:$0xff]   ;;  %v5808_v42 = vld [vmem:[%s6362_s30 + $0x164] ss:$16 sps:$4 sm:$0xff]  }
  0xef   : > { %2422 = vmatprep.subr.bf16.mxu0 %v5105_v43  ;;  %2808 = vmatprep.subr.bf16.mxu1 %v5107_v45  ;;  %v5810_v43 = vld [vmem:[%s6362_s30 + $0x160] ss:$16 sps:$4 sm:$0xff]  }
  0xf0   : > { %2292 = vmatmul.mubr.bf16.gmra.mrb[20].mxu0 %v5792_v44  ;;  %2678 = vmatmul.mubr.bf16.gmra.mrb[20].mxu1 %v5792_v44  ;;  %v5811_v44 = vld [vmem:[%s6362_s30 + $0x184] ss:$16 sps:$4 sm:$0xff]   ;;  %v5813_v45 = vld [vmem:[%s6362_s30 + $0x180] ss:$16 sps:$4 sm:$0xff]  }
  0xf1   : > { %2301 = vmatprep.mubr.bf16.mxu0 %v5793_v48  ;;  %2687 = vmatprep.mubr.bf16.mxu1 %v5793_v48  ;;  %v5817_v48 = vld [vmem:[%s6362_s30 + $0x1c4] ss:$16 sps:$4 sm:$0xff]  }
  0xf2   : > { %2423 = vmatpush1.bf16.msra.mxu0 %v5104_v51  ;;  %2809 = vmatpush1.bf16.msra.mxu1 %v5106_v52  ;;  %v5822_v51 = vld [vmem:[%s6362_s30 + $0x1e0] ss:$16 sps:$4 sm:$0xff]   ;;  %v5825_v52 = vld [vmem:[%s6362_s30 + $0xc] ss:$16 sps:$4 sm:$0xff]  }
  0xf3   : > { %2424 = vmatprep.subr.bf16.mxu0 %v5113_v53  ;;  %2810 = vmatprep.subr.bf16.mxu1 %v5115_v54  ;;  %v5823_v53 = vld [vmem:[%s6362_s30 + $0x8] ss:$16 sps:$4 sm:$0xff]   ;;  %v321_v54 = vld [vmem:[#allocation5 + $0x50] sm:$0xff] }
  0xf4   : > { %v4908_v3 = vcombine.low %v321_v54, %v325_v55 }
  0xf6   : > { %2425 = vmatpush1.bf16.msra.mxu0 %v5112_v59  ;;  %2811 = vmatpush1.bf16.msra.mxu1 %v5114_v60  ;;  %v4909_v59 = vcombine.high %v321_v54, %v325_v55  ;;  %v329_v60 = vld [vmem:[#allocation5 + $0x90] sm:$0xff] }
  0xf7   : > { %2426 = vmatprep.subr.bf16.mxu0 %v5121_v61  ;;  %2812 = vmatprep.subr.bf16.mxu1 %v5123_v63  ;;  %v333_v61 = vld [vmem:[#allocation5 + $0xb0] sm:$0xff]  ;;  %v4911_v63 = vcombine.high %v322_v56, %v326_v57 }
  0xf8   : > { %2302 = vmatmul.mubr.bf16.gmra.mrb[24].mxu0 %v5795_v62  ;;  %2688 = vmatmul.mubr.bf16.gmra.mrb[24].mxu1 %v5795_v62  ;;  %v330_v62 = vld [vmem:[#allocation5 + $0x98] sm:$0xff]  ;;  %v4916_v24 = vcombine.low %v329_v60, %v333_v61 }
  0xf9   : > { %2311 = vmatprep.mubr.bf16.mxu0 %v5796_v2  ;;  %2697 = vmatprep.mubr.bf16.mxu1 %v5796_v2  ;;  %v6425_v2 = vld [vmem:[#allocation5 + $0x430] sm:$0xff]  ;;  %v4919_v23 = vcombine.high %v330_v62, %v334_v0  ;;  %v4918_v31 = vcombine.low %v330_v62, %v334_v0  ;;  %v5837_v0 = vld [vmem:[%s6362_s30 + $0x88] ss:$16 sps:$4 sm:$0xff]  }
  0xfa   : > { %2427 = vmatpush1.bf16.msra.mxu0 %v5120_v5  ;;  %2813 = vmatpush1.bf16.msra.mxu1 %v5122_v6  ;;  %v5028_v4 = vcombine.low %v6423_v1, %v6425_v2  ;;  %v6432_v5 = vld [vmem:[#allocation5 + $0x418] sm:$0xff] }
  0xfb   : > { %2428 = vmatprep.subr.bf16.mxu0 %v5129_v7  ;;  %2814 = vmatprep.subr.bf16.mxu1 %v5131_v8  ;;  %v6434_v6 = vld [vmem:[#allocation5 + $0x438] sm:$0xff]  ;;  %v4910_v7 = vcombine.low %v322_v56, %v326_v57  ;;  %v4917_v8 = vcombine.high %v329_v60, %v333_v61  ;;  %v377_v57 = vld [vmem:[#allocation5 + $0x210] sm:$0xff] }
  0xfc   : > { %v5030_v22 = vcombine.low %v6432_v5, %v6434_v6  ;;  %v382_v60 = vld [vmem:[#allocation5 + $0x238] sm:$0xff] }
  0xfe   : > { %2429 = vmatpush1.bf16.msra.mxu0 %v5128_v13  ;;  %2815 = vmatpush1.bf16.msra.mxu1 %v5130_v14  ;;  %v342_v13 = vld [vmem:[#allocation5 + $0xf8] sm:$0xff] }
  0xff   : > { %2430 = vmatprep.subr.bf16.mxu0 %v5137_v15  ;;  %2816 = vmatprep.subr.bf16.mxu1 %v5139_v17  ;;  %v4927_v14 = vcombine.high %v338_v12, %v342_v13  ;;  %v345_v15 = vld [vmem:[#allocation5 + $0x110] sm:$0xff]  ;;  %v346_v17 = vld [vmem:[#allocation5 + $0x118] sm:$0xff] }
 0x100   : > { %2312 = vmatmul.mubr.bf16.gmra.mrb[28].mxu0 %v5798_v16  ;;  %2698 = vmatmul.mubr.bf16.gmra.mrb[28].mxu1 %v5798_v16  ;;  %v349_v16 = vld [vmem:[#allocation5 + $0x130] sm:$0xff] }
 0x101   : > { %2321 = vmatprep.mubr.bf16.mxu0 %v5799_v20  ;;  %2707 = vmatprep.mubr.bf16.mxu1 %v5799_v20  ;;  %v4926_v20 = vcombine.low %v338_v12, %v342_v13  ;;  %v4933_v21 = vcombine.high %v345_v15, %v349_v16 }
 0x102   : > { %2431 = vmatpush1.bf16.msra.mxu0 %v5136_v26  ;;  %2817 = vmatpush1.bf16.msra.mxu1 %v5138_v27  ;;  %v4935_v26 = vcombine.high %v346_v17, %v350_v18  ;;  %v353_v27 = vld [vmem:[#allocation5 + $0x150] sm:$0xff] }
 0x103   : > { %2432 = vmatprep.subr.bf16.mxu0 %v5145_v28  ;;  %2818 = vmatprep.subr.bf16.mxu1 %v5147_v29  ;;  %v357_v28 = vld [vmem:[#allocation5 + $0x170] sm:$0xff]  ;;  %v5832_v29 = vld [vmem:[%s6362_s30 + $0x6c] ss:$16 sps:$4 sm:$0xff]  }
 0x106   : > { %2433 = vmatpush1.bf16.msra.mxu0 %v5144_v32  ;;  %2819 = vmatpush1.bf16.msra.mxu1 %v5146_v33  ;;  %v354_v32 = vld [vmem:[#allocation5 + $0x158] sm:$0xff] }
 0x107   : > { %2981 = vmatprep.subr.bf16.mxu0 %v4901_v34  ;;  %3367 = vmatprep.subr.bf16.mxu1 %v4903_v37  ;;  %v358_v33 = vld [vmem:[#allocation5 + $0x178] sm:$0xff]  ;;  %v4932_v34 = vcombine.low %v345_v15, %v349_v16  ;;  %v4941_v37 = vcombine.high %v353_v27, %v357_v28 }
 0x108   : > { %2322 = vmatmul.mubr.bf16.gmra.mrb[32].mxu0 %v5801_v35  ;;  %2708 = vmatmul.mubr.bf16.gmra.mrb[32].mxu1 %v5801_v35  ;;  %v4934_v35 = vcombine.low %v346_v17, %v350_v18  ;;  %v5840_v18 = vld [vmem:[%s6362_s30 + $0xa8] ss:$16 sps:$4 sm:$0xff]  }
 0x109   : > { %2331 = vmatprep.mubr.bf16.mxu0 %v5802_v38  ;;  %2717 = vmatprep.mubr.bf16.mxu1 %v5802_v38  ;;  %v4943_v38 = vcombine.high %v354_v32, %v358_v33 }
 0x110   : > { %2332 = vmatmul.mubr.bf16.gmra.mrb[36].mxu0 %v5804_v39  ;;  %2718 = vmatmul.mubr.bf16.gmra.mrb[36].mxu1 %v5804_v39  ;;  %v361_v39 = vld [vmem:[#allocation5 + $0x190] sm:$0xff] }
 0x111   : > { %2341 = vmatprep.mubr.bf16.mxu0 %v5805_v40  ;;  %2727 = vmatprep.mubr.bf16.mxu1 %v5805_v40  ;;  %v365_v40 = vld [vmem:[#allocation5 + $0x1b0] sm:$0xff] }
 0x118   : > { %2342 = vmatmul.mubr.bf16.gmra.mrb[40].mxu0 %v5807_v41  ;;  %2728 = vmatmul.mubr.bf16.gmra.mrb[40].mxu1 %v5807_v41  ;;  %v362_v41 = vld [vmem:[#allocation5 + $0x198] sm:$0xff] }
 0x119   : > { %2351 = vmatprep.mubr.bf16.mxu0 %v5808_v42  ;;  %2737 = vmatprep.mubr.bf16.mxu1 %v5808_v42  ;;  %v366_v42 = vld [vmem:[#allocation5 + $0x1b8] sm:$0xff] }
 0x11a   : > { %v4950_v54 = vcombine.low %v362_v41, %v366_v42 }
 0x120   : > { %2352 = vmatmul.mubr.bf16.gmra.mrb[44].mxu0 %v5810_v43  ;;  %2738 = vmatmul.mubr.bf16.gmra.mrb[44].mxu1 %v5810_v43  ;;  %v4940_v43 = vcombine.low %v353_v27, %v357_v28  ;;  %v406_v27 = vld [vmem:[#allocation5 + $0x2f8] sm:$0xff] }
 0x121   : > { %2361 = vmatprep.mubr.bf16.mxu0 %v5811_v44  ;;  %2747 = vmatprep.mubr.bf16.mxu1 %v5811_v44  ;;  %v4942_v44 = vcombine.low %v354_v32, %v358_v33 }
 0x128   : > { %2362 = vmatmul.mubr.bf16.gmra.mrb[48].mxu0 %v5813_v45  ;;  %2748 = vmatmul.mubr.bf16.gmra.mrb[48].mxu1 %v5813_v45  ;;  %v4949_v45 = vcombine.high %v361_v39, %v365_v40 }
 0x129   : > { %2371 = vmatprep.mubr.bf16.mxu0 %v5814_v46  ;;  %2757 = vmatprep.mubr.bf16.mxu1 %v5814_v46  ;;  %v5834_v46 = vld [vmem:[%s6362_s30 + $0x68] ss:$16 sps:$4 sm:$0xff]  }
 0x130   : > { %2372 = vmatmul.mubr.bf16.gmra.mrb[52].mxu0 %v5816_v47  ;;  %2758 = vmatmul.mubr.bf16.gmra.mrb[52].mxu1 %v5816_v47  ;;  %v4951_v47 = vcombine.high %v362_v41, %v366_v42  ;;  %v5843_v42 = vld [vmem:[%s6362_s30 + $0xc8] ss:$16 sps:$4 sm:$0xff]  }
 0x131   : > { %2381 = vmatprep.mubr.bf16.mxu0 %v5817_v48  ;;  %2767 = vmatprep.mubr.bf16.mxu1 %v5817_v48  ;;  %v369_v48 = vld [vmem:[#allocation5 + $0x1d0] sm:$0xff] }
 0x138   : > { %2382 = vmatmul.mubr.bf16.gmra.mrb[56].mxu0 %v5819_v49  ;;  %2768 = vmatmul.mubr.bf16.gmra.mrb[56].mxu1 %v5819_v49  ;;  %v373_v49 = vld [vmem:[#allocation5 + $0x1f0] sm:$0xff] }
 0x139   : > { %2391 = vmatprep.mubr.bf16.mxu0 %v5820_v50  ;;  %2777 = vmatprep.mubr.bf16.mxu1 %v5820_v50  ;;  %v5835_v50 = vld [vmem:[%s6362_s30 + $0x8c] ss:$16 sps:$4 sm:$0xff]   ;;  %v4957_v55 = vcombine.high %v369_v48, %v373_v49  ;;  %v4956_v61 = vcombine.low %v369_v48, %v373_v49 }
 0x13a   : > { %v422_v48 = vld [vmem:[#allocation5 + $0x378] sm:$0xff] }
 0x140   : > { %2392 = vmatmul.mubr.bf16.gmra.mrb[60].mxu0 %v5822_v51  ;;  %2778 = vmatmul.mubr.bf16.gmra.mrb[60].mxu1 %v5822_v51  ;;  %v370_v51 = vld [vmem:[#allocation5 + $0x1d8] sm:$0xff] }
 0x141   : > { %2434 = vmatprep.mubr.bf16.mxu0 %v5825_v52  ;;  %2820 = vmatprep.mubr.bf16.mxu1 %v5825_v52  ;;  %v374_v52 = vld [vmem:[#allocation5 + $0x1f8] sm:$0xff] }
 0x142   : > { %v4959_v56 = vcombine.high %v370_v51, %v374_v52  ;;  %v4958_v62 = vcombine.low %v370_v51, %v374_v52 }
 0x148   : > { %2435 = vmatmul.mubr.bf16.vlgmr.msra.gmra.mrb[0].mxu0 %v5823_v53  ;;  %2821 = vmatmul.mubr.bf16.vlgmr.msra.gmra.mrb[0].mxu1 %v5823_v53  ;;  %v4948_v53 = vcombine.low %v361_v39, %v365_v40 }
 0x149   : > { %2982 = vmatpush1.bf16.msra.mxu0 %v4900_v30  ;;  %3368 = vmatpush1.bf16.msra.mxu1 %v4902_v36  ;;  %v5828_v30 = vld [vmem:[%s6362_s30 + $0x28] ss:$16 sps:$4 sm:$0xff]   ;;  %v4925_v36 = vcombine.high %v337_v9, %v341_v10 }
 0x14a   : > { %2444 = vmatprep.mubr.bf16.mxu0 %v5826_v58  ;;  %2830 = vmatprep.mubr.bf16.mxu1 %v5826_v58  ;;  %v381_v58 = vld [vmem:[#allocation5 + $0x230] sm:$0xff]  ;;  %v390_v9 = vld [vmem:[#allocation5 + $0x278] sm:$0xff] }
 0x14b   : > { %2983 = vmatprep.subr.bf16.mxu0 %v4909_v59  ;;  %3369 = vmatprep.subr.bf16.mxu1 %v4911_v63  ;;  %v378_v59 = vld [vmem:[#allocation5 + $0x218] sm:$0xff]  ;;  %v4965_v63 = vcombine.high %v377_v57, %v381_v58  ;;  %v4964_v10 = vcombine.low %v377_v57, %v381_v58 }
 0x14d   : > { %2984 = vmatpush1.bf16.msra.mxu0 %v4908_v3  ;;  %3370 = vmatpush1.bf16.msra.mxu1 %v4910_v7  ;;  %v4967_v3 = vcombine.high %v378_v59, %v382_v60  ;;  %v385_v7 = vld [vmem:[#allocation5 + $0x250] sm:$0xff] }
 0x14e   : > { %2985 = vmatprep.subr.bf16.mxu0 %v4917_v8  ;;  %3371 = vmatprep.subr.bf16.mxu1 %v4919_v23  ;;  %v389_v8 = vld [vmem:[#allocation5 + $0x270] sm:$0xff]  ;;  %v5838_v23 = vld [vmem:[%s6362_s30 + $0xac] ss:$16 sps:$4 sm:$0xff]  }
 0x14f   : > { %v4973_v12 = vcombine.high %v385_v7, %v389_v8  ;;  %v4972_v15 = vcombine.low %v385_v7, %v389_v8  ;;  %v438_v7 = vld [vmem:[#allocation5 + $0x3f8] sm:$0xff] }
 0x150   : > { %2445 = vmatmul.mubr.bf16.gmra.mrb[4].mxu0 %v5828_v30  ;;  %2831 = vmatmul.mubr.bf16.gmra.mrb[4].mxu1 %v5828_v30  ;;  %v386_v30 = vld [vmem:[#allocation5 + $0x258] sm:$0xff] }
 0x151   : > { %2454 = vmatprep.mubr.bf16.mxu0 %v5829_v11  ;;  %2840 = vmatprep.mubr.bf16.mxu1 %v5829_v11  ;;  %v4966_v11 = vcombine.low %v378_v59, %v382_v60  ;;  %v4975_v13 = vcombine.high %v386_v30, %v390_v9  ;;  %v4974_v16 = vcombine.low %v386_v30, %v390_v9  ;;  %v5846_v60 = vld [vmem:[%s6362_s30 + $0xe8] ss:$16 sps:$4 sm:$0xff]  }
 0x152   : > { %2986 = vmatpush1.bf16.msra.mxu0 %v4916_v24  ;;  %3372 = vmatpush1.bf16.msra.mxu1 %v4918_v31  ;;  %v393_v24 = vld [vmem:[#allocation5 + $0x290] sm:$0xff] }
 0x153   : > { %2987 = vmatprep.subr.bf16.mxu0 %v4925_v36  ;;  %3373 = vmatprep.subr.bf16.mxu1 %v4927_v14  ;;  %v397_v31 = vld [vmem:[#allocation5 + $0x2b0] sm:$0xff]  ;;  %v394_v36 = vld [vmem:[#allocation5 + $0x298] sm:$0xff] }
 0x154   : > { %v398_v14 = vld [vmem:[#allocation5 + $0x2b8] sm:$0xff]  ;;  %v4981_v17 = vcombine.high %v393_v24, %v397_v31  ;;  %v4980_v28 = vcombine.low %v393_v24, %v397_v31  ;;  %v5031_v24 = vcombine.high %v6432_v5, %v6434_v6 }
 0x155   : > { %v5850_v31 = vld [vmem:[%s6362_s30 + $0x12c] ss:$16 sps:$4 sm:$0xff]  }
 0x156   : > { %2988 = vmatpush1.bf16.msra.mxu0 %v4924_v19  ;;  %3374 = vmatpush1.bf16.msra.mxu1 %v4926_v20  ;;  %v4983_v19 = vcombine.high %v394_v36, %v398_v14  ;;  %v401_v20 = vld [vmem:[#allocation5 + $0x2d0] sm:$0xff] }
 0x157   : > { %2989 = vmatprep.subr.bf16.mxu0 %v4933_v21  ;;  %3375 = vmatprep.subr.bf16.mxu1 %v4935_v26  ;;  %v405_v21 = vld [vmem:[#allocation5 + $0x2f0] sm:$0xff]  ;;  %v402_v26 = vld [vmem:[#allocation5 + $0x2d8] sm:$0xff] }
 0x158   : > { %2455 = vmatmul.mubr.bf16.gmra.mrb[8].mxu0 %v5831_v25  ;;  %2841 = vmatmul.mubr.bf16.gmra.mrb[8].mxu1 %v5831_v25  ;;  %v5841_v25 = vld [vmem:[%s6362_s30 + $0xcc] ss:$16 sps:$4 sm:$0xff]   ;;  %v4989_v32 = vcombine.high %v401_v20, %v405_v21  ;;  %v4991_v33 = vcombine.high %v402_v26, %v406_v27  ;;  %v4988_v39 = vcombine.low %v401_v20, %v405_v21  ;;  %v5864_v21 = vld [vmem:[%s6362_s30 + $0x1a8] ss:$16 sps:$4 sm:$0xff]  }
 0x159   : > { %2464 = vmatprep.mubr.bf16.mxu0 %v5832_v29  ;;  %2850 = vmatprep.mubr.bf16.mxu1 %v5832_v29  ;;  %v4982_v29 = vcombine.low %v394_v36, %v398_v14  ;;  %v4990_v40 = vcombine.low %v402_v26, %v406_v27  ;;  %v5852_v36 = vld [vmem:[%s6362_s30 + $0x128] ss:$16 sps:$4 sm:$0xff]   ;;  %v5853_v14 = vld [vmem:[%s6362_s30 + $0x14c] ss:$16 sps:$4 sm:$0xff]  }
 0x15a   : > { %2990 = vmatpush1.bf16.msra.mxu0 %v4932_v34  ;;  %3376 = vmatpush1.bf16.msra.mxu1 %v4934_v35  ;;  %v409_v34 = vld [vmem:[#allocation5 + $0x310] sm:$0xff]  ;;  %v5862_v20 = vld [vmem:[%s6362_s30 + $0x1ac] ss:$16 sps:$4 sm:$0xff]   ;;  %v5867_v26 = vld [vmem:[%s6362_s30 + $0x1c8] ss:$16 sps:$4 sm:$0xff]  }
 0x15b   : > { %2991 = vmatprep.subr.bf16.mxu0 %v4941_v37  ;;  %3377 = vmatprep.subr.bf16.mxu1 %v4943_v38  ;;  %v413_v35 = vld [vmem:[#allocation5 + $0x330] sm:$0xff]  ;;  %v410_v37 = vld [vmem:[#allocation5 + $0x318] sm:$0xff] }
 0x15c   : > { %v414_v38 = vld [vmem:[#allocation5 + $0x338] sm:$0xff]  ;;  %v4997_v41 = vcombine.high %v409_v34, %v413_v35  ;;  %v4996_v49 = vcombine.low %v409_v34, %v413_v35 }
 0x15d   : > { %v5868_v27 = vld [vmem:[%s6362_s30 + $0x1ec] ss:$16 sps:$4 sm:$0xff]  }
 0x15e   : > { %2992 = vmatpush1.bf16.msra.mxu0 %v4940_v43  ;;  %3378 = vmatpush1.bf16.msra.mxu1 %v4942_v44  ;;  %v4999_v43 = vcombine.high %v410_v37, %v414_v38  ;;  %v417_v44 = vld [vmem:[#allocation5 + $0x350] sm:$0xff]  ;;  %v450_v34 = vld [vmem:[#allocation5 + $0x458] sm:$0xff] }
 0x15f   : > { %2993 = vmatprep.subr.bf16.mxu0 %v4949_v45  ;;  %3379 = vmatprep.subr.bf16.mxu1 %v4951_v47  ;;  %v421_v45 = vld [vmem:[#allocation5 + $0x370] sm:$0xff]  ;;  %v418_v47 = vld [vmem:[#allocation5 + $0x358] sm:$0xff] }
 0x160   : > { %2465 = vmatmul.mubr.bf16.gmra.mrb[12].mxu0 %v5834_v46  ;;  %2851 = vmatmul.mubr.bf16.gmra.mrb[12].mxu1 %v5834_v46  ;;  %v5844_v46 = vld [vmem:[%s6362_s30 + $0xec] ss:$16 sps:$4 sm:$0xff]   ;;  %v5005_v51 = vcombine.high %v417_v44, %v421_v45  ;;  %v5007_v52 = vcombine.high %v418_v47, %v422_v48  ;;  %v5004_v57 = vcombine.low %v417_v44, %v421_v45  ;;  %v5873_v45 = vld [vmem:[%s6362_s30 + $0x24] ss:$16 sps:$4 sm:$0xff]  }
 0x161   : > { %2474 = vmatprep.mubr.bf16.mxu0 %v5835_v50  ;;  %2860 = vmatprep.mubr.bf16.mxu1 %v5835_v50  ;;  %v4998_v50 = vcombine.low %v410_v37, %v414_v38  ;;  %v5006_v58 = vcombine.low %v418_v47, %v422_v48  ;;  %v454_v35 = vld [vmem:[#allocation5 + $0x478] sm:$0xff]  ;;  %v457_v38 = vld [vmem:[#allocation5 + $0x490] sm:$0xff] }
 0x162   : > { %2994 = vmatpush1.bf16.msra.mxu0 %v4948_v53  ;;  %3380 = vmatpush1.bf16.msra.mxu1 %v4950_v54  ;;  %v425_v53 = vld [vmem:[#allocation5 + $0x390] sm:$0xff] }
 0x163   : > { %2995 = vmatprep.subr.bf16.mxu0 %v4957_v55  ;;  %3381 = vmatprep.subr.bf16.mxu1 %v4959_v56  ;;  %v429_v54 = vld [vmem:[#allocation5 + $0x3b0] sm:$0xff]  ;;  %v426_v55 = vld [vmem:[#allocation5 + $0x398] sm:$0xff] }
 0x164   : > { %v430_v56 = vld [vmem:[#allocation5 + $0x3b8] sm:$0xff]  ;;  %v5013_v59 = vcombine.high %v425_v53, %v429_v54  ;;  %v5012_v8 = vcombine.low %v425_v53, %v429_v54  ;;  %v477_v53 = vld [vmem:[#allocation5 + $0x530] sm:$0xff] }
 0x165   : > { %v5875_v54 = vld [vmem:[%s6362_s30 + $0x44] ss:$16 sps:$4 sm:$0xff]  }
 0x166   : > { %2996 = vmatpush1.bf16.msra.mxu0 %v4956_v61  ;;  %3382 = vmatpush1.bf16.msra.mxu1 %v4958_v62  ;;  %v5015_v61 = vcombine.high %v426_v55, %v430_v56  ;;  %v433_v62 = vld [vmem:[#allocation5 + $0x3d0] sm:$0xff] }
 0x167   : > { %2997 = vmatprep.subr.bf16.mxu0 %v4965_v63  ;;  %3383 = vmatprep.subr.bf16.mxu1 %v4967_v3  ;;  %v437_v63 = vld [vmem:[#allocation5 + $0x3f0] sm:$0xff]  ;;  %v434_v3 = vld [vmem:[#allocation5 + $0x3d8] sm:$0xff] }
 0x168   : > { %2475 = vmatmul.mubr.bf16.gmra.mrb[16].mxu0 %v5837_v0  ;;  %2861 = vmatmul.mubr.bf16.gmra.mrb[16].mxu1 %v5837_v0  ;;  %v5847_v0 = vld [vmem:[%s6362_s30 + $0x10c] ss:$16 sps:$4 sm:$0xff]   ;;  %v5021_v30 = vcombine.high %v433_v62, %v437_v63  ;;  %v5023_v9 = vcombine.high %v434_v3, %v438_v7 }
 0x169   : > { %2484 = vmatprep.mubr.bf16.mxu0 %v5838_v23  ;;  %2870 = vmatprep.mubr.bf16.mxu1 %v5838_v23  ;;  %v5014_v23 = vcombine.low %v426_v55, %v430_v56  ;;  %v474_v55 = vld [vmem:[#allocation5 + $0x518] sm:$0xff] }
 0x16a   : > { %2998 = vmatpush1.bf16.msra.mxu0 %v4964_v10  ;;  %3384 = vmatpush1.bf16.msra.mxu1 %v4966_v11  ;;  %v5020_v10 = vcombine.low %v433_v62, %v437_v63  ;;  %v5022_v11 = vcombine.low %v434_v3, %v438_v7  ;;  %v478_v56 = vld [vmem:[#allocation5 + $0x538] sm:$0xff]  ;;  %v485_v62 = vld [vmem:[#allocation5 + $0x570] sm:$0xff] }
 0x16b   : > { %2999 = vmatprep.subr.bf16.mxu0 %v4973_v12  ;;  %3385 = vmatprep.subr.bf16.mxu1 %v4975_v13  ;;  %v5029_v12 = vcombine.high %v6423_v1, %v6425_v2  ;;  %v5849_v13 = vld [vmem:[%s6362_s30 + $0x108] ss:$16 sps:$4 sm:$0xff]   ;;  %v5062_v7 = vcombine.low %v474_v55, %v478_v56 }
 0x16c   : > { %v466_v1 = vld [vmem:[#allocation5 + $0x4d8] sm:$0xff] }
 0x16d   : > { %v470_v2 = vld [vmem:[#allocation5 + $0x4f8] sm:$0xff] }
 0x16e   : > { %3000 = vmatpush1.bf16.msra.mxu0 %v4972_v15  ;;  %3386 = vmatpush1.bf16.msra.mxu1 %v4974_v16  ;;  %v5855_v15 = vld [vmem:[%s6362_s30 + $0x148] ss:$16 sps:$4 sm:$0xff]   ;;  %v5856_v16 = vld [vmem:[%s6362_s30 + $0x16c] ss:$16 sps:$4 sm:$0xff]  }
 0x16f   : > { %3001 = vmatprep.subr.bf16.mxu0 %v4981_v17  ;;  %3387 = vmatprep.subr.bf16.mxu1 %v4983_v19  ;;  %v5858_v17 = vld [vmem:[%s6362_s30 + $0x168] ss:$16 sps:$4 sm:$0xff]  }
 0x170   : > { %2485 = vmatmul.mubr.bf16.gmra.mrb[20].mxu0 %v5840_v18  ;;  %2871 = vmatmul.mubr.bf16.gmra.mrb[20].mxu1 %v5840_v18  ;;  %v5859_v18 = vld [vmem:[%s6362_s30 + $0x18c] ss:$16 sps:$4 sm:$0xff]   ;;  %v5861_v19 = vld [vmem:[%s6362_s30 + $0x188] ss:$16 sps:$4 sm:$0xff]  }
 0x171   : > { %2494 = vmatprep.mubr.bf16.mxu0 %v5841_v25  ;;  %2880 = vmatprep.mubr.bf16.mxu1 %v5841_v25  ;;  %v5865_v25 = vld [vmem:[%s6362_s30 + $0x1cc] ss:$16 sps:$4 sm:$0xff]  }
 0x172   : > { %3002 = vmatpush1.bf16.msra.mxu0 %v4980_v28  ;;  %3388 = vmatpush1.bf16.msra.mxu1 %v4982_v29  ;;  %v5870_v28 = vld [vmem:[%s6362_s30 + $0x1e8] ss:$16 sps:$4 sm:$0xff]   ;;  %v5871_v29 = vld [vmem:[%s6362_s30 + $0x4] ss:$16 sps:$4 sm:$0xff]  }
 0x173   : > { %3003 = vmatprep.subr.bf16.mxu0 %v4989_v32  ;;  %3389 = vmatprep.subr.bf16.mxu1 %v4991_v33  ;;  %v449_v32 = vld [vmem:[#allocation5 + $0x450] sm:$0xff]  ;;  %v482_v63 = vld [vmem:[#allocation5 + $0x558] sm:$0xff] }
 0x174   : > { %v453_v33 = vld [vmem:[#allocation5 + $0x470] sm:$0xff] }
 0x175   : > { %v5037_v37 = vcombine.high %v449_v32, %v453_v33  ;;  %v5036_v44 = vcombine.low %v449_v32, %v453_v33  ;;  %v506_v32 = vld [vmem:[#allocation5 + $0x618] sm:$0xff] }
 0x176   : > { %3004 = vmatpush1.bf16.msra.mxu0 %v4988_v39  ;;  %3390 = vmatpush1.bf16.msra.mxu1 %v4990_v40  ;;  %v461_v39 = vld [vmem:[#allocation5 + $0x4b0] sm:$0xff]  ;;  %v510_v33 = vld [vmem:[#allocation5 + $0x638] sm:$0xff] }
 0x177   : > { %3005 = vmatprep.subr.bf16.mxu0 %v4997_v41  ;;  %3391 = vmatprep.subr.bf16.mxu1 %v4999_v43  ;;  %v5872_v40 = vld [vmem:[%s6362_s30] ss:$16 sps:$4 sm:$0xff]   ;;  %v5039_v41 = vcombine.high %v450_v34, %v454_v35  ;;  %v462_v43 = vld [vmem:[#allocation5 + $0x4b8] sm:$0xff]  ;;  %v5045_v47 = vcombine.high %v457_v38, %v461_v39 }
 0x178   : > { %2495 = vmatmul.mubr.bf16.gmra.mrb[24].mxu0 %v5843_v42  ;;  %2881 = vmatmul.mubr.bf16.gmra.mrb[24].mxu1 %v5843_v42  ;;  %v458_v42 = vld [vmem:[#allocation5 + $0x498] sm:$0xff] }
 0x179   : > { %2504 = vmatprep.mubr.bf16.mxu0 %v5844_v46  ;;  %2890 = vmatprep.mubr.bf16.mxu1 %v5844_v46  ;;  %v5038_v46 = vcombine.low %v450_v34, %v454_v35  ;;  %v5047_v48 = vcombine.high %v458_v42, %v462_v43  ;;  %v5046_v5 = vcombine.low %v458_v42, %v462_v43  ;;  %v518_v42 = vld [vmem:[#allocation5 + $0x678] sm:$0xff] }
 0x17a   : > { %3006 = vmatpush1.bf16.msra.mxu0 %v4996_v49  ;;  %3392 = vmatpush1.bf16.msra.mxu1 %v4998_v50  ;;  %v465_v49 = vld [vmem:[#allocation5 + $0x4d0] sm:$0xff] }
 0x17b   : > { %3007 = vmatprep.subr.bf16.mxu0 %v5005_v51  ;;  %3393 = vmatprep.subr.bf16.mxu1 %v5007_v52  ;;  %v469_v50 = vld [vmem:[#allocation5 + $0x4f0] sm:$0xff]  ;;  %v5055_v51 = vcombine.high %v466_v1, %v470_v2 }
 0x17c   : > { %v5053_v6 = vcombine.high %v465_v49, %v469_v50  ;;  %v473_v52 = vld [vmem:[#allocation5 + $0x510] sm:$0xff] }
 0x17d   : > { %v5060_v3 = vcombine.low %v473_v52, %v477_v53 }
 0x17e   : > { %3008 = vmatpush1.bf16.msra.mxu0 %v5004_v57  ;;  %3394 = vmatpush1.bf16.msra.mxu1 %v5006_v58  ;;  %v5052_v57 = vcombine.low %v465_v49, %v469_v50  ;;  %v5054_v58 = vcombine.low %v466_v1, %v470_v2  ;;  %v525_v49 = vld [vmem:[#allocation5 + $0x6b0] sm:$0xff]  ;;  %v522_v1 = vld [vmem:[#allocation5 + $0x698] sm:$0xff] }
 0x17f   : > { %3009 = vmatprep.subr.bf16.mxu0 %v5013_v59  ;;  %3395 = vmatprep.subr.bf16.mxu1 %v5015_v61  ;;  %v5061_v59 = vcombine.high %v473_v52, %v477_v53  ;;  %v481_v61 = vld [vmem:[#allocation5 + $0x550] sm:$0xff]  ;;  %v526_v2 = vld [vmem:[#allocation5 + $0x6b8] sm:$0xff] }
 0x180   : > { %2505 = vmatmul.mubr.bf16.gmra.mrb[28].mxu0 %v5846_v60  ;;  %2891 = vmatmul.mubr.bf16.gmra.mrb[28].mxu1 %v5846_v60  ;;  %v5063_v60 = vcombine.high %v474_v55, %v478_v56  ;;  %v5881_v50 = vld [vmem:[%s6362_s30 + $0xa4] ss:$16 sps:$4 sm:$0xff]   ;;  %v530_v53 = vld [vmem:[#allocation5 + $0x6d8] sm:$0xff]  ;;  %v5110_v56 = vcombine.low %v522_v1, %v526_v2 }
 0x181   : > { %2514 = vmatprep.mubr.bf16.mxu0 %v5847_v0  ;;  %2900 = vmatprep.mubr.bf16.mxu1 %v5847_v0  ;;  %v486_v0 = vld [vmem:[#allocation5 + $0x578] sm:$0xff]  ;;  %v533_v52 = vld [vmem:[#allocation5 + $0x6f0] sm:$0xff] }
 0x182   : > { %3010 = vmatpush1.bf16.msra.mxu0 %v5012_v8  ;;  %3396 = vmatpush1.bf16.msra.mxu1 %v5014_v23  ;;  %v5069_v8 = vcombine.high %v481_v61, %v485_v62  ;;  %v5876_v23 = vld [vmem:[%s6362_s30 + $0x40] ss:$16 sps:$4 sm:$0xff]  }
 0x183   : > { %3011 = vmatprep.subr.bf16.mxu0 %v5021_v30  ;;  %3397 = vmatprep.subr.bf16.mxu1 %v5023_v9  ;;  %v5071_v30 = vcombine.high %v482_v63, %v486_v0  ;;  %v489_v9 = vld [vmem:[#allocation5 + $0x590] sm:$0xff] }
 0x186   : > { %3012 = vmatpush1.bf16.msra.mxu0 %v5020_v10  ;;  %3398 = vmatpush1.bf16.msra.mxu1 %v5022_v11  ;;  %v493_v10 = vld [vmem:[#allocation5 + $0x5b0] sm:$0xff] }
 0x187   : > { %3174 = vmatprep.subr.bf16.mxu0 %v5029_v12  ;;  %3560 = vmatprep.subr.bf16.mxu1 %v5031_v24  ;;  %v5877_v11 = vld [vmem:[%s6362_s30 + $0x64] ss:$16 sps:$4 sm:$0xff]   ;;  %v490_v12 = vld [vmem:[#allocation5 + $0x598] sm:$0xff]  ;;  %v5068_v24 = vcombine.low %v481_v61, %v485_v62 }
 0x188   : > { %2515 = vmatmul.mubr.bf16.gmra.mrb[32].mxu0 %v5849_v13  ;;  %2901 = vmatmul.mubr.bf16.gmra.mrb[32].mxu1 %v5849_v13  ;;  %v494_v13 = vld [vmem:[#allocation5 + $0x5b8] sm:$0xff]  ;;  %v541_v61 = vld [vmem:[#allocation5 + $0x730] sm:$0xff] }
 0x189   : > { %2524 = vmatprep.mubr.bf16.mxu0 %v5850_v31  ;;  %2910 = vmatprep.mubr.bf16.mxu1 %v5850_v31  ;;  %v5070_v31 = vcombine.low %v482_v63, %v486_v0  ;;  %v5883_v62 = vld [vmem:[%s6362_s30 + $0xc4] ss:$16 sps:$4 sm:$0xff]   ;;  %v538_v63 = vld [vmem:[#allocation5 + $0x718] sm:$0xff] }
 0x18a   : > { %v542_v0 = vld [vmem:[#allocation5 + $0x738] sm:$0xff] }
 0x190   : > { %2525 = vmatmul.mubr.bf16.gmra.mrb[36].mxu0 %v5852_v36  ;;  %2911 = vmatmul.mubr.bf16.gmra.mrb[36].mxu1 %v5852_v36  ;;  %v5077_v36 = vcombine.high %v489_v9, %v493_v10 }
 0x191   : > { %2534 = vmatprep.mubr.bf16.mxu0 %v5853_v14  ;;  %2920 = vmatprep.mubr.bf16.mxu1 %v5853_v14  ;;  %v5079_v14 = vcombine.high %v490_v12, %v494_v13 }
 0x198   : > { %2535 = vmatmul.mubr.bf16.gmra.mrb[40].mxu0 %v5855_v15  ;;  %2921 = vmatmul.mubr.bf16.gmra.mrb[40].mxu1 %v5855_v15  ;;  %v497_v15 = vld [vmem:[#allocation5 + $0x5d0] sm:$0xff] }
 0x199   : > { %2544 = vmatprep.mubr.bf16.mxu0 %v5856_v16  ;;  %2930 = vmatprep.mubr.bf16.mxu1 %v5856_v16  ;;  %v501_v16 = vld [vmem:[#allocation5 + $0x5f0] sm:$0xff] }
 0x19a   : > { %v5084_v34 = vcombine.low %v497_v15, %v501_v16 }
 0x1a0   : > { %2545 = vmatmul.mubr.bf16.gmra.mrb[44].mxu0 %v5858_v17  ;;  %2931 = vmatmul.mubr.bf16.gmra.mrb[44].mxu1 %v5858_v17  ;;  %v498_v17 = vld [vmem:[#allocation5 + $0x5d8] sm:$0xff] }
 0x1a1   : > { %2554 = vmatprep.mubr.bf16.mxu0 %v5859_v18  ;;  %2940 = vmatprep.mubr.bf16.mxu1 %v5859_v18  ;;  %v502_v18 = vld [vmem:[#allocation5 + $0x5f8] sm:$0xff] }
 0x1a2   : > { %v5086_v35 = vcombine.low %v498_v17, %v502_v18 }
 0x1a8   : > { %2555 = vmatmul.mubr.bf16.gmra.mrb[48].mxu0 %v5861_v19  ;;  %2941 = vmatmul.mubr.bf16.gmra.mrb[48].mxu1 %v5861_v19  ;;  %v5076_v19 = vcombine.low %v489_v9, %v493_v10  ;;  %v549_v9 = vld [vmem:[#allocation5 + $0x770] sm:$0xff]  ;;  %v546_v10 = vld [vmem:[#allocation5 + $0x758] sm:$0xff] }
 0x1a9   : > { %2564 = vmatprep.mubr.bf16.mxu0 %v5862_v20  ;;  %2950 = vmatprep.mubr.bf16.mxu1 %v5862_v20  ;;  %v5078_v20 = vcombine.low %v490_v12, %v494_v13  ;;  %v5126_v13 = vcombine.low %v538_v63, %v542_v0 }
 0x1b0   : > { %2565 = vmatmul.mubr.bf16.gmra.mrb[52].mxu0 %v5864_v21  ;;  %2951 = vmatmul.mubr.bf16.gmra.mrb[52].mxu1 %v5864_v21  ;;  %v5085_v21 = vcombine.high %v497_v15, %v501_v16  ;;  %v557_v15 = vld [vmem:[#allocation5 + $0x7b0] sm:$0xff] }
 0x1b1   : > { %2574 = vmatprep.mubr.bf16.mxu0 %v5865_v25  ;;  %2960 = vmatprep.mubr.bf16.mxu1 %v5865_v25  ;;  %v5878_v25 = vld [vmem:[%s6362_s30 + $0x60] ss:$16 sps:$4 sm:$0xff]   ;;  %v5885_v16 = vld [vmem:[%s6362_s30 + $0xe4] ss:$16 sps:$4 sm:$0xff]  }
 0x1b8   : > { %2575 = vmatmul.mubr.bf16.gmra.mrb[56].mxu0 %v5867_v26  ;;  %2961 = vmatmul.mubr.bf16.gmra.mrb[56].mxu1 %v5867_v26  ;;  %v5087_v26 = vcombine.high %v498_v17, %v502_v18  ;;  %v554_v17 = vld [vmem:[#allocation5 + $0x798] sm:$0xff] }
 0x1b9   : > { %2584 = vmatprep.mubr.bf16.mxu0 %v5868_v27  ;;  %2970 = vmatprep.mubr.bf16.mxu1 %v5868_v27  ;;  %v505_v27 = vld [vmem:[#allocation5 + $0x610] sm:$0xff]  ;;  %v558_v18 = vld [vmem:[#allocation5 + $0x7b8] sm:$0xff] }
 0x1c0   : > { %2585 = vmatmul.mubr.bf16.gmra.mrb[60].mxu0 %v5870_v28  ;;  %2971 = vmatmul.mubr.bf16.gmra.mrb[60].mxu1 %v5870_v28  ;;  %v509_v28 = vld [vmem:[#allocation5 + $0x630] sm:$0xff] }
 0x1c1   : > { %3013 = vmatprep.mubr.bf16.mxu0 %v5871_v29  ;;  %3399 = vmatprep.mubr.bf16.mxu1 %v5871_v29  ;;  %v5879_v29 = vld [vmem:[%s6362_s30 + $0x84] ss:$16 sps:$4 sm:$0xff]   ;;  %v5092_v43 = vcombine.low %v505_v27, %v509_v28 }
 0x1c8   : > { %3014 = vmatmul.mubr.bf16.vlgmr.msra.gmra.mrb[64].mxu0 %v5872_v40  ;;  %3400 = vmatmul.mubr.bf16.vlgmr.msra.gmra.mrb[64].mxu1 %v5872_v40  ;;  %v517_v40 = vld [vmem:[#allocation5 + $0x670] sm:$0xff] }
 0x1c9   : > { %3175 = vmatpush1.bf16.msra.mxu0 %v5028_v4  ;;  %3561 = vmatpush1.bf16.msra.mxu1 %v5030_v22  ;;  %v5044_v4 = vcombine.low %v457_v38, %v461_v39  ;;  %v5874_v22 = vld [vmem:[%s6362_s30 + $0x20] ss:$16 sps:$4 sm:$0xff]   ;;  %v5095_v38 = vcombine.high %v506_v32, %v510_v33 }
 0x1ca   : > { %3023 = vmatprep.mubr.bf16.mxu0 %v5873_v45  ;;  %3409 = vmatprep.mubr.bf16.mxu1 %v5873_v45  ;;  %v513_v39 = vld [vmem:[#allocation5 + $0x650] sm:$0xff] }
 0x1cb   : > { %3176 = vmatprep.subr.bf16.mxu0 %v5037_v37  ;;  %3562 = vmatprep.subr.bf16.mxu1 %v5039_v41  ;;  %v5093_v37 = vcombine.high %v505_v27, %v509_v28  ;;  %v514_v41 = vld [vmem:[#allocation5 + $0x658] sm:$0xff]  ;;  %v5101_v45 = vcombine.high %v513_v39, %v517_v40  ;;  %v565_v27 = vld [vmem:[#allocation5 + $0x7f0] sm:$0xff] }
 0x1cc   : > { %v562_v28 = vld [vmem:[#allocation5 + $0x7d8] sm:$0xff] }
 0x1cd   : > { %3177 = vmatpush1.bf16.msra.mxu0 %v5036_v44  ;;  %3563 = vmatpush1.bf16.msra.mxu1 %v5038_v46  ;;  %v5094_v44 = vcombine.low %v506_v32, %v510_v33  ;;  %v5880_v46 = vld [vmem:[%s6362_s30 + $0x80] ss:$16 sps:$4 sm:$0xff]   ;;  %v5142_v33 = vcombine.low %v554_v17, %v558_v18 }
 0x1ce   : > { %3178 = vmatprep.subr.bf16.mxu0 %v5045_v47  ;;  %3564 = vmatprep.subr.bf16.mxu1 %v5047_v48  ;;  %v5103_v47 = vcombine.high %v514_v41, %v518_v42  ;;  %v521_v48 = vld [vmem:[#allocation5 + $0x690] sm:$0xff] }
 0x1cf   : > { %v5108_v55 = vcombine.low %v521_v48, %v525_v49 }
 0x1d0   : > { %3024 = vmatmul.mubr.bf16.gmra.mrb[68].mxu0 %v5874_v22  ;;  %3410 = vmatmul.mubr.bf16.gmra.mrb[68].mxu1 %v5874_v22  ;;  %v5111_v22 = vcombine.high %v522_v1, %v526_v2  ;;  %v5892_v2 = vld [vmem:[%s6362_s30 + $0x140] ss:$16 sps:$4 sm:$0xff]  }
 0x1d1   : > { %3033 = vmatprep.mubr.bf16.mxu0 %v5875_v54  ;;  %3419 = vmatprep.mubr.bf16.mxu1 %v5875_v54  ;;  %v534_v54 = vld [vmem:[#allocation5 + $0x6f8] sm:$0xff] }
 0x1d2   : > { %3179 = vmatpush1.bf16.msra.mxu0 %v5044_v4  ;;  %3565 = vmatpush1.bf16.msra.mxu1 %v5046_v5  ;;  %v5100_v4 = vcombine.low %v513_v39, %v517_v40  ;;  %v5102_v5 = vcombine.low %v514_v41, %v518_v42  ;;  %v5888_v41 = vld [vmem:[%s6362_s30 + $0x100] ss:$16 sps:$4 sm:$0xff]   ;;  %v5889_v42 = vld [vmem:[%s6362_s30 + $0x124] ss:$16 sps:$4 sm:$0xff]  }
 0x1d3   : > { %3180 = vmatprep.subr.bf16.mxu0 %v5053_v6  ;;  %3566 = vmatprep.subr.bf16.mxu1 %v5055_v51  ;;  %v5109_v6 = vcombine.high %v521_v48, %v525_v49  ;;  %v529_v51 = vld [vmem:[#allocation5 + $0x6d0] sm:$0xff]  ;;  %v567_v48 = vld [vmem:[#allocation7] sm:$0xff] }
 0x1d6   : > { %3181 = vmatpush1.bf16.msra.mxu0 %v5052_v57  ;;  %3567 = vmatpush1.bf16.msra.mxu1 %v5054_v58  ;;  %v5117_v57 = vcombine.high %v529_v51, %v533_v52  ;;  %v5882_v58 = vld [vmem:[%s6362_s30 + $0xa0] ss:$16 sps:$4 sm:$0xff]  }
 0x1d7   : > { %3182 = vmatprep.subr.bf16.mxu0 %v5061_v59  ;;  %3568 = vmatprep.subr.bf16.mxu1 %v5063_v60  ;;  %v5119_v59 = vcombine.high %v530_v53, %v534_v54  ;;  %v537_v60 = vld [vmem:[#allocation5 + $0x710] sm:$0xff] }
 0x1d8   : > { %3034 = vmatmul.mubr.bf16.gmra.mrb[72].mxu0 %v5876_v23  ;;  %3420 = vmatmul.mubr.bf16.gmra.mrb[72].mxu1 %v5876_v23  ;;  %v5127_v23 = vcombine.high %v538_v63, %v542_v0  ;;  %v5124_v12 = vcombine.low %v537_v60, %v541_v61 }
 0x1d9   : > { %3043 = vmatprep.mubr.bf16.mxu0 %v5877_v11  ;;  %3429 = vmatprep.mubr.bf16.mxu1 %v5877_v11  ;;  %v550_v11 = vld [vmem:[#allocation5 + $0x778] sm:$0xff] }
 0x1da   : > { %3183 = vmatpush1.bf16.msra.mxu0 %v5060_v3  ;;  %3569 = vmatpush1.bf16.msra.mxu1 %v5062_v7  ;;  %v5116_v3 = vcombine.low %v529_v51, %v533_v52  ;;  %v5118_v7 = vcombine.low %v530_v53, %v534_v54 }
 0x1db   : > { %3184 = vmatprep.subr.bf16.mxu0 %v5069_v8  ;;  %3570 = vmatprep.subr.bf16.mxu1 %v5071_v30  ;;  %v5125_v8 = vcombine.high %v537_v60, %v541_v61  ;;  %v545_v30 = vld [vmem:[#allocation5 + $0x750] sm:$0xff] }
 0x1de   : > { %3185 = vmatpush1.bf16.msra.mxu0 %v5068_v24  ;;  %3571 = vmatpush1.bf16.msra.mxu1 %v5070_v31  ;;  %v5133_v24 = vcombine.high %v545_v30, %v549_v9  ;;  %v5884_v31 = vld [vmem:[%s6362_s30 + $0xc0] ss:$16 sps:$4 sm:$0xff]  }
 0x1df   : > { %3186 = vmatprep.subr.bf16.mxu0 %v5077_v36  ;;  %3572 = vmatprep.subr.bf16.mxu1 %v5079_v14  ;;  %v5135_v36 = vcombine.high %v546_v10, %v550_v11  ;;  %v553_v14 = vld [vmem:[#allocation5 + $0x790] sm:$0xff] }
 0x1e0   : > { %3044 = vmatmul.mubr.bf16.gmra.mrb[76].mxu0 %v5878_v25  ;;  %3430 = vmatmul.mubr.bf16.gmra.mrb[76].mxu1 %v5878_v25  ;;  %v5143_v25 = vcombine.high %v554_v17, %v558_v18  ;;  %v5140_v32 = vcombine.low %v553_v14, %v557_v15 }
 0x1e1   : > { %3053 = vmatprep.mubr.bf16.mxu0 %v5879_v29  ;;  %3439 = vmatprep.mubr.bf16.mxu1 %v5879_v29  ;;  %v566_v29 = vld [vmem:[#allocation5 + $0x7f8] sm:$0xff] }
 0x1e2   : > { %3187 = vmatpush1.bf16.msra.mxu0 %v5076_v19  ;;  %3573 = vmatpush1.bf16.msra.mxu1 %v5078_v20  ;;  %v5132_v19 = vcombine.low %v545_v30, %v549_v9  ;;  %v5134_v20 = vcombine.low %v546_v10, %v550_v11  ;;  %v5150_v40 = vcombine.low %v562_v28, %v566_v29 }
 0x1e3   : > { %3188 = vmatprep.subr.bf16.mxu0 %v5085_v21  ;;  %3574 = vmatprep.subr.bf16.mxu1 %v5087_v26  ;;  %v5141_v21 = vcombine.high %v553_v14, %v557_v15  ;;  %v561_v26 = vld [vmem:[#allocation5 + $0x7d0] sm:$0xff] }
 0x1e4   : > { %v5148_v39 = vcombine.low %v561_v26, %v565_v27 }
 0x1e6   : > { %3189 = vmatpush1.bf16.msra.mxu0 %v5084_v34  ;;  %3575 = vmatpush1.bf16.msra.mxu1 %v5086_v35  ;;  %v5149_v34 = vcombine.high %v561_v26, %v565_v27  ;;  %v5886_v35 = vld [vmem:[%s6362_s30 + $0xe0] ss:$16 sps:$4 sm:$0xff]  }
 0x1e7   : > { %3190 = vmatprep.subr.bf16.mxu0 %v5093_v37  ;;  %3576 = vmatprep.subr.bf16.mxu1 %v5095_v38  ;;  %v5151_v37 = vcombine.high %v562_v28, %v566_v29  ;;  %v5887_v38 = vld [vmem:[%s6362_s30 + $0x104] ss:$16 sps:$4 sm:$0xff]  }
 0x1e8   : > { %3054 = vmatmul.mubr.bf16.gmra.mrb[80].mxu0 %v5880_v46  ;;  %3440 = vmatmul.mubr.bf16.gmra.mrb[80].mxu1 %v5880_v46  ;;  %v5891_v46 = vld [vmem:[%s6362_s30 + $0x144] ss:$16 sps:$4 sm:$0xff]  }
 0x1e9   : > { %3063 = vmatprep.mubr.bf16.mxu0 %v5881_v50  ;;  %3449 = vmatprep.mubr.bf16.mxu1 %v5881_v50 }
 0x1ea   : > { %3191 = vmatpush1.bf16.msra.mxu0 %v5092_v43  ;;  %3577 = vmatpush1.bf16.msra.mxu1 %v5094_v44  ;;  %v569_v43 = vlaneseq  ;;  %v5890_v44 = vld [vmem:[%s6362_s30 + $0x120] ss:$16 sps:$4 sm:$0xff]  }
 0x1eb   : > { %3192 = vmatprep.subr.bf16.mxu0 %v5101_v45  ;;  %3578 = vmatprep.subr.bf16.mxu1 %v5103_v47 }
 0x1ec   : > { %v6500_v45 = vshrl.u32 %v569_v43, 7 }
 0x1ee   : > { %3193 = vmatpush1.bf16.msra.mxu0 %v5100_v4  ;;  %3579 = vmatpush1.bf16.msra.mxu1 %v5102_v5  ;;  %v571_v47 = vsub.s32 0, %v6500_v45  ;;  %v579_v49 = vsub.s32 2, %v6500_v45  ;;  %v575_v50 = vsub.s32 1, %v6500_v45  ;;  %v583_v1 = vsub.s32 3, %v6500_v45 }
 0x1ef   : > { %3194 = vmatprep.subr.bf16.mxu0 %v5109_v6  ;;  %3580 = vmatprep.subr.bf16.mxu1 %v5111_v22  ;;  %v5893_v22 = vld [vmem:[%s6362_s30 + $0x164] ss:$16 sps:$4 sm:$0xff]  }
 0x1f0   : > { %3064 = vmatmul.mubr.bf16.gmra.mrb[84].mxu0 %v5882_v58  ;;  %3450 = vmatmul.mubr.bf16.gmra.mrb[84].mxu1 %v5882_v58  ;;  %v6508_v4 = vrot.slane %v567_v48, %v571_v47  ;;  %v6510_v5 = vrot.slane %v567_v48, %v579_v49  ;;  %v6512_v6 = vrot.slane %v567_v48, %v575_v50 }
 0x1f1   : > { %3073 = vmatprep.mubr.bf16.mxu0 %v5883_v62  ;;  %3459 = vmatprep.mubr.bf16.mxu1 %v5883_v62  ;;  %v6515_v51 = vrot.slane %v567_v48, %v583_v1 }
 0x1f2   : > { %3195 = vmatpush1.bf16.msra.mxu0 %v5108_v55  ;;  %3581 = vmatpush1.bf16.msra.mxu1 %v5110_v56 }
 0x1f3   : > { %3196 = vmatprep.subr.bf16.mxu0 %v5117_v57  ;;  %3582 = vmatprep.subr.bf16.mxu1 %v5119_v59 }
 0x1f6   : > { %3197 = vmatpush1.bf16.msra.mxu0 %v5116_v3  ;;  %3583 = vmatpush1.bf16.msra.mxu1 %v5118_v7 }
 0x1f7   : > { %3198 = vmatprep.subr.bf16.mxu0 %v5125_v8  ;;  %3584 = vmatprep.subr.bf16.mxu1 %v5127_v23 }
 0x1f8   : > { %3074 = vmatmul.mubr.bf16.gmra.mrb[88].mxu0 %v5884_v31  ;;  %3460 = vmatmul.mubr.bf16.gmra.mrb[88].mxu1 %v5884_v31  ;;  %v5895_v31 = vld [vmem:[%s6362_s30 + $0x184] ss:$16 sps:$4 sm:$0xff]  }
 0x1f9   : > { %3083 = vmatprep.mubr.bf16.mxu0 %v5885_v16  ;;  %3469 = vmatprep.mubr.bf16.mxu1 %v5885_v16 }
 0x1fa   : > { %3199 = vmatpush1.bf16.msra.mxu0 %v5124_v12  ;;  %3585 = vmatpush1.bf16.msra.mxu1 %v5126_v13  ;;  %v5894_v12 = vld [vmem:[%s6362_s30 + $0x160] ss:$16 sps:$4 sm:$0xff]  }
 0x1fb   : > { %3200 = vmatprep.subr.bf16.mxu0 %v5133_v24  ;;  %3586 = vmatprep.subr.bf16.mxu1 %v5135_v36 }
 0x1fe   : > { %3201 = vmatpush1.bf16.msra.mxu0 %v5132_v19  ;;  %3587 = vmatpush1.bf16.msra.mxu1 %v5134_v20 }
 0x1ff   : > { %3202 = vmatprep.subr.bf16.mxu0 %v5141_v21  ;;  %3588 = vmatprep.subr.bf16.mxu1 %v5143_v25 }
 0x200   : > { %3084 = vmatmul.mubr.bf16.gmra.mrb[92].mxu0 %v5886_v35  ;;  %3470 = vmatmul.mubr.bf16.gmra.mrb[92].mxu1 %v5886_v35 }
 0x201   : > { %3093 = vmatprep.mubr.bf16.mxu0 %v5887_v38  ;;  %3479 = vmatprep.mubr.bf16.mxu1 %v5887_v38 }
 0x202   : > { %3203 = vmatpush1.bf16.msra.mxu0 %v5140_v32  ;;  %3589 = vmatpush1.bf16.msra.mxu1 %v5142_v33 }
 0x203   : > { %3204 = vmatprep.subr.bf16.mxu0 %v5149_v34  ;;  %3590 = vmatprep.subr.bf16.mxu1 %v5151_v37 }
 0x206   : > { %3205 = vmatpush1.bf16.msra.mxu0 %v5148_v39  ;;  %3591 = vmatpush1.bf16.msra.mxu1 %v5150_v40 }
 0x208   : > { %3094 = vmatmul.mubr.bf16.gmra.mrb[96].mxu0 %v5888_v41  ;;  %3480 = vmatmul.mubr.bf16.gmra.mrb[96].mxu1 %v5888_v41 }
 0x209   : > { %3103 = vmatprep.mubr.bf16.mxu0 %v5889_v42  ;;  %3489 = vmatprep.mubr.bf16.mxu1 %v5889_v42 }
 0x210   : > { %3104 = vmatmul.mubr.bf16.gmra.mrb[100].mxu0 %v5890_v44  ;;  %3490 = vmatmul.mubr.bf16.gmra.mrb[100].mxu1 %v5890_v44 }
 0x211   : > { %3113 = vmatprep.mubr.bf16.mxu0 %v5891_v46  ;;  %3499 = vmatprep.mubr.bf16.mxu1 %v5891_v46 }
 0x218   : > { %3114 = vmatmul.mubr.bf16.gmra.mrb[104].mxu0 %v5892_v2  ;;  %3500 = vmatmul.mubr.bf16.gmra.mrb[104].mxu1 %v5892_v2 }
 0x219   : > { %3123 = vmatprep.mubr.bf16.mxu0 %v5893_v22  ;;  %3509 = vmatprep.mubr.bf16.mxu1 %v5893_v22 }
 0x21b   : > { %v2436_v52 = vpop.f32.mrb[0].mxu0  ;;  %v2822_v54 = vpop.f32.mrb[0].mxu1 }
 0x21c   : > { %v5159_v53 = vadd.f32 %v2436_v52, %v6508_v4  ;;  %v2438_v55 = vpop.f32.mrb[1].mxu0  ;;  %v5223_v56 = vadd.f32 %v2822_v54, %v6510_v5  ;;  %v2824_v58 = vpop.f32.mrb[1].mxu1 }
 0x21d   : > { %v5160_v57 = vadd.f32 %v2438_v55, %v6512_v6  ;;  %v2440_v59 = vpop.f32.mrb[2].mxu0  ;;  %v5224_v61 = vadd.f32 %v2824_v58, %v6515_v51  ;;  %v2826_v63 = vpop.f32.mrb[2].mxu1  ;;  %v5897_v58 = vld [vmem:[%s6362_s30 + $0x1a4] ss:$16 sps:$4 sm:$0xff]  }
 0x21e   : > { %v3753_v60 = vmul.f32 0.2, %v5159_v53  ;;  %v5161_v62 = vadd.f32 %v2440_v59, %v6508_v4  ;;  %v2442_v0 = vpop.f32.mrb[3].mxu0  ;;  %v3755_v3 = vmul.f32 0.2, %v5223_v56  ;;  %v5225_v8 = vadd.f32 %v2826_v63, %v6510_v5  ;;  %v2828_v30 = vpop.f32.mrb[3].mxu1 }
 0x21f   : > { %v3754_v7 = vmul.f32 0.2, %v5160_v57  ;;  %v5162_v23 = vadd.f32 %v2442_v0, %v6512_v6  ;;  %v3756_v9 = vmul.f32 0.2, %v5224_v61  ;;  %v5226_v11 = vadd.f32 %v2828_v30, %v6515_v51 }
 0x220   : > { %v3761_v10 = vmul.f32 0.2, %v5161_v62  ;;  %3124 = vmatmul.mubr.bf16.gmra.mrb[108].mxu0 %v5894_v12  ;;  %v3763_v13 = vmul.f32 0.2, %v5225_v8  ;;  %3510 = vmatmul.mubr.bf16.gmra.mrb[108].mxu1 %v5894_v12  ;;  %v4009_v36 = vmax.f32 %v5159_v53, %v3753_v60  ;;  %v4011_v16 = vmax.f32 %v5223_v56, %v3755_v3  ;;  %v5896_v53 = vld [vmem:[%s6362_s30 + $0x180] ss:$16 sps:$4 sm:$0xff]  }
 0x221   : > { %v3762_v24 = vmul.f32 0.2, %v5162_v23  ;;  %3133 = vmatprep.mubr.bf16.mxu0 %v5895_v31  ;;  %v3764_v15 = vmul.f32 0.2, %v5226_v11  ;;  %3519 = vmatprep.mubr.bf16.mxu1 %v5895_v31  ;;  %v4010_v17 = vmax.f32 %v5160_v57, %v3754_v7  ;;  %v4012_v21 = vmax.f32 %v5224_v61, %v3756_v9 }
 0x222   : > { %v4017_v14 = vmax.f32 %v5161_v62, %v3761_v10  ;;  %v4019_v18 = vmax.f32 %v5225_v8, %v3763_v13 }
 0x223   : > { %v4018_v19 = vmax.f32 %v5162_v23, %v3762_v24  ;;  %v2446_v20 = vpop.f32.mrb[4].mxu0  ;;  %v4020_v26 = vmax.f32 %v5226_v11, %v3764_v15  ;;  %v2832_v28 = vpop.f32.mrb[4].mxu1 }
 0x224   : > { %v4265_v25 = vmax.f32 %v4009_v36, %v4017_v14  ;;  %v5163_v27 = vadd.f32 %v2446_v20, %v6508_v4  ;;  %v2448_v29 = vpop.f32.mrb[5].mxu0  ;;  %v4339_v32 = vmax.f32 %v4011_v16, %v4019_v18  ;;  %v5227_v34 = vadd.f32 %v2832_v28, %v6510_v5  ;;  %v2834_v37 = vpop.f32.mrb[5].mxu1 }
 0x225   : > { %v4302_v33 = vmax.f32 %v4010_v17, %v4018_v19  ;;  %v5164_v35 = vadd.f32 %v2448_v29, %v6512_v6  ;;  %v2450_v38 = vpop.f32.mrb[6].mxu0  ;;  %v4376_v39 = vmax.f32 %v4012_v21, %v4020_v26  ;;  %v5228_v41 = vadd.f32 %v2834_v37, %v6515_v51  ;;  %v2836_v43 = vpop.f32.mrb[6].mxu1  ;;  %v5898_v37 = vld [vmem:[%s6362_s30 + $0x1a0] ss:$16 sps:$4 sm:$0xff]  }
 0x226   : > { %v3769_v40 = vmul.f32 0.2, %v5163_v27  ;;  %v5165_v42 = vadd.f32 %v2450_v38, %v6508_v4  ;;  %v2452_v44 = vpop.f32.mrb[7].mxu0  ;;  %v3771_v46 = vmul.f32 0.2, %v5227_v34  ;;  %v5229_v48 = vadd.f32 %v2836_v43, %v6510_v5  ;;  %v2838_v50 = vpop.f32.mrb[7].mxu1 }
 0x227   : > { %v3770_v47 = vmul.f32 0.2, %v5164_v35  ;;  %v5166_v49 = vadd.f32 %v2452_v44, %v6512_v6  ;;  %v3772_v2 = vmul.f32 0.2, %v5228_v41  ;;  %v5230_v52 = vadd.f32 %v2838_v50, %v6515_v51 }
 0x228   : > { %v4025_v1 = vmax.f32 %v5163_v27, %v3769_v40  ;;  %v3777_v22 = vmul.f32 0.2, %v5165_v42  ;;  %3134 = vmatmul.mubr.bf16.gmra.mrb[112].mxu0 %v5896_v53  ;;  %v4027_v54 = vmax.f32 %v5227_v34, %v3771_v46  ;;  %v3779_v56 = vmul.f32 0.2, %v5229_v48  ;;  %3520 = vmatmul.mubr.bf16.gmra.mrb[112].mxu1 %v5896_v53 }
 0x229   : > { %v4026_v55 = vmax.f32 %v5164_v35, %v3770_v47  ;;  %v3778_v57 = vmul.f32 0.2, %v5166_v49  ;;  %3143 = vmatprep.mubr.bf16.mxu0 %v5897_v58  ;;  %v4028_v60 = vmax.f32 %v5228_v41, %v3772_v2  ;;  %v3780_v62 = vmul.f32 0.2, %v5230_v52  ;;  %3529 = vmatprep.mubr.bf16.mxu1 %v5897_v58 }
 0x22a   : > { %v4266_v59 = vmax.f32 %v4265_v25, %v4025_v1  ;;  %v4033_v61 = vmax.f32 %v5165_v42, %v3777_v22  ;;  %v4340_v63 = vmax.f32 %v4339_v32, %v4027_v54  ;;  %v4035_v3 = vmax.f32 %v5229_v48, %v3779_v56  ;;  %v5899_v42 = vld [vmem:[%s6362_s30 + $0x1c4] ss:$16 sps:$4 sm:$0xff]  }
 0x22b   : > { %v4303_v0 = vmax.f32 %v4302_v33, %v4026_v55  ;;  %v4034_v7 = vmax.f32 %v5166_v49, %v3778_v57  ;;  %v2456_v8 = vpop.f32.mrb[8].mxu0  ;;  %v4377_v23 = vmax.f32 %v4376_v39, %v4028_v60  ;;  %v4036_v9 = vmax.f32 %v5230_v52, %v3780_v62  ;;  %v2842_v11 = vpop.f32.mrb[8].mxu1 }
 0x22c   : > { %v4267_v30 = vmax.f32 %v4266_v59, %v4033_v61  ;;  %v5167_v10 = vadd.f32 %v2456_v8, %v6508_v4  ;;  %v2458_v12 = vpop.f32.mrb[9].mxu0  ;;  %v4341_v13 = vmax.f32 %v4340_v63, %v4035_v3  ;;  %v5231_v31 = vadd.f32 %v2842_v11, %v6510_v5  ;;  %v2844_v14 = vpop.f32.mrb[9].mxu1 }
 0x22d   : > { %v4304_v24 = vmax.f32 %v4303_v0, %v4034_v7  ;;  %v5168_v36 = vadd.f32 %v2458_v12, %v6512_v6  ;;  %v2460_v15 = vpop.f32.mrb[10].mxu0  ;;  %v4378_v16 = vmax.f32 %v4377_v23, %v4036_v9  ;;  %v5232_v18 = vadd.f32 %v2844_v14, %v6515_v51  ;;  %v2846_v20 = vpop.f32.mrb[10].mxu1  ;;  %v5900_v14 = vld [vmem:[%s6362_s30 + $0x1c0] ss:$16 sps:$4 sm:$0xff]  }
 0x22e   : > { %v3785_v17 = vmul.f32 0.2, %v5167_v10  ;;  %v5169_v19 = vadd.f32 %v2460_v15, %v6508_v4  ;;  %v2462_v21 = vpop.f32.mrb[11].mxu0  ;;  %v3787_v25 = vmul.f32 0.2, %v5231_v31  ;;  %v5233_v27 = vadd.f32 %v2846_v20, %v6510_v5  ;;  %v2848_v29 = vpop.f32.mrb[11].mxu1 }
 0x22f   : > { %v3786_v26 = vmul.f32 0.2, %v5168_v36  ;;  %v5170_v28 = vadd.f32 %v2462_v21, %v6512_v6  ;;  %v3788_v33 = vmul.f32 0.2, %v5232_v18  ;;  %v5234_v35 = vadd.f32 %v2848_v29, %v6515_v51 }
 0x230   : > { %v4041_v32 = vmax.f32 %v5167_v10, %v3785_v17  ;;  %v3793_v34 = vmul.f32 0.2, %v5169_v19  ;;  %3144 = vmatmul.mubr.bf16.gmra.mrb[116].mxu0 %v5898_v37  ;;  %v4043_v38 = vmax.f32 %v5231_v31, %v3787_v25  ;;  %v3795_v40 = vmul.f32 0.2, %v5233_v27  ;;  %3530 = vmatmul.mubr.bf16.gmra.mrb[116].mxu1 %v5898_v37 }
 0x231   : > { %v4042_v39 = vmax.f32 %v5168_v36, %v3786_v26  ;;  %v3794_v41 = vmul.f32 0.2, %v5170_v28  ;;  %3153 = vmatprep.mubr.bf16.mxu0 %v5899_v42  ;;  %v4044_v44 = vmax.f32 %v5232_v18, %v3788_v33  ;;  %v3796_v47 = vmul.f32 0.2, %v5234_v35  ;;  %3539 = vmatprep.mubr.bf16.mxu1 %v5899_v42 }
 0x232   : > { %v4268_v43 = vmax.f32 %v4267_v30, %v4041_v32  ;;  %v4049_v46 = vmax.f32 %v5169_v19, %v3793_v34  ;;  %v4342_v48 = vmax.f32 %v4341_v13, %v4043_v38  ;;  %v4051_v50 = vmax.f32 %v5233_v27, %v3795_v40  ;;  %v5901_v19 = vld [vmem:[%s6362_s30 + $0x1e4] ss:$16 sps:$4 sm:$0xff]  }
 0x233   : > { %v4305_v49 = vmax.f32 %v4304_v24, %v4042_v39  ;;  %v4050_v1 = vmax.f32 %v5170_v28, %v3794_v41  ;;  %v2466_v2 = vpop.f32.mrb[12].mxu0  ;;  %v4379_v22 = vmax.f32 %v4378_v16, %v4044_v44  ;;  %v4052_v53 = vmax.f32 %v5234_v35, %v3796_v47  ;;  %v2852_v55 = vpop.f32.mrb[12].mxu1 }
 0x234   : > { %v4269_v52 = vmax.f32 %v4268_v43, %v4049_v46  ;;  %v5171_v54 = vadd.f32 %v2466_v2, %v6508_v4  ;;  %v2468_v56 = vpop.f32.mrb[13].mxu0  ;;  %v4343_v57 = vmax.f32 %v4342_v48, %v4051_v50  ;;  %v5235_v59 = vadd.f32 %v2852_v55, %v6510_v5  ;;  %v2854_v61 = vpop.f32.mrb[13].mxu1 }
 0x235   : > { %v4306_v58 = vmax.f32 %v4305_v49, %v4050_v1  ;;  %v5172_v60 = vadd.f32 %v2468_v56, %v6512_v6  ;;  %v2470_v62 = vpop.f32.mrb[14].mxu0  ;;  %v4380_v63 = vmax.f32 %v4379_v22, %v4052_v53  ;;  %v5236_v3 = vadd.f32 %v2854_v61, %v6515_v51  ;;  %v2856_v8 = vpop.f32.mrb[14].mxu1  ;;  %v5902_v61 = vld [vmem:[%s6362_s30 + $0x1e0] ss:$16 sps:$4 sm:$0xff]  }
 0x236   : > { %v3801_v0 = vmul.f32 0.2, %v5171_v54  ;;  %v5173_v7 = vadd.f32 %v2470_v62, %v6508_v4  ;;  %v2472_v23 = vpop.f32.mrb[15].mxu0  ;;  %v3803_v30 = vmul.f32 0.2, %v5235_v59  ;;  %v5237_v10 = vadd.f32 %v2856_v8, %v6510_v5  ;;  %v2858_v12 = vpop.f32.mrb[15].mxu1 }
 0x237   : > { %v3802_v9 = vmul.f32 0.2, %v5172_v60  ;;  %v5174_v11 = vadd.f32 %v2472_v23, %v6512_v6  ;;  %v3804_v24 = vmul.f32 0.2, %v5236_v3  ;;  %v5238_v36 = vadd.f32 %v2858_v12, %v6515_v51 }
 0x238   : > { %v4057_v13 = vmax.f32 %v5171_v54, %v3801_v0  ;;  %v3809_v31 = vmul.f32 0.2, %v5173_v7  ;;  %3154 = vmatmul.mubr.bf16.gmra.mrb[120].mxu0 %v5900_v14  ;;  %v4059_v15 = vmax.f32 %v5235_v59, %v3803_v30  ;;  %v3811_v17 = vmul.f32 0.2, %v5237_v10  ;;  %3540 = vmatmul.mubr.bf16.gmra.mrb[120].mxu1 %v5900_v14 }
 0x239   : > { %v4058_v16 = vmax.f32 %v5172_v60, %v3802_v9  ;;  %v3810_v18 = vmul.f32 0.2, %v5174_v11  ;;  %3163 = vmatprep.mubr.bf16.mxu0 %v5901_v19  ;;  %v4060_v21 = vmax.f32 %v5236_v3, %v3804_v24  ;;  %v3812_v26 = vmul.f32 0.2, %v5238_v36  ;;  %3549 = vmatprep.mubr.bf16.mxu1 %v5901_v19 }
 0x23a   : > { %v4270_v20 = vmax.f32 %v4269_v52, %v4057_v13  ;;  %v4065_v25 = vmax.f32 %v5173_v7, %v3809_v31  ;;  %v4344_v27 = vmax.f32 %v4343_v57, %v4059_v15  ;;  %v4067_v29 = vmax.f32 %v5237_v10, %v3811_v17  ;;  %v5903_v7 = vld [vmem:[%s6362_s30 + $0xc] ss:$16 sps:$4 sm:$0xff]  }
 0x23b   : > { %v4307_v28 = vmax.f32 %v4306_v58, %v4058_v16  ;;  %v4066_v32 = vmax.f32 %v5174_v11, %v3810_v18  ;;  %v2476_v33 = vpop.f32.mrb[16].mxu0  ;;  %v4381_v34 = vmax.f32 %v4380_v63, %v4060_v21  ;;  %v4068_v37 = vmax.f32 %v5238_v36, %v3812_v26  ;;  %v2862_v39 = vpop.f32.mrb[16].mxu1 }
 0x23c   : > { %v4271_v35 = vmax.f32 %v4270_v20, %v4065_v25  ;;  %v5175_v38 = vadd.f32 %v2476_v33, %v6508_v4  ;;  %v2478_v40 = vpop.f32.mrb[17].mxu0  ;;  %v4345_v41 = vmax.f32 %v4344_v27, %v4067_v29  ;;  %v5239_v43 = vadd.f32 %v2862_v39, %v6510_v5  ;;  %v2864_v46 = vpop.f32.mrb[17].mxu1 }
 0x23d   : > { %v4308_v42 = vmax.f32 %v4307_v28, %v4066_v32  ;;  %v5176_v44 = vadd.f32 %v2478_v40, %v6512_v6  ;;  %v2480_v47 = vpop.f32.mrb[18].mxu0  ;;  %v4382_v48 = vmax.f32 %v4381_v34, %v4068_v37  ;;  %v5240_v50 = vadd.f32 %v2864_v46, %v6515_v51  ;;  %v2866_v2 = vpop.f32.mrb[18].mxu1  ;;  %v5904_v46 = vld [vmem:[%s6362_s30 + $0x8] ss:$16 sps:$4 sm:$0xff]  }
 0x23e   : > { %v3817_v49 = vmul.f32 0.2, %v5175_v38  ;;  %v5177_v1 = vadd.f32 %v2480_v47, %v6508_v4  ;;  %v2482_v22 = vpop.f32.mrb[19].mxu0  ;;  %v3819_v52 = vmul.f32 0.2, %v5239_v43  ;;  %v5241_v54 = vadd.f32 %v2866_v2, %v6510_v5  ;;  %v2868_v56 = vpop.f32.mrb[19].mxu1 }
 0x23f   : > { %v3818_v53 = vmul.f32 0.2, %v5176_v44  ;;  %v5178_v55 = vadd.f32 %v2482_v22, %v6512_v6  ;;  %v3820_v58 = vmul.f32 0.2, %v5240_v50  ;;  %v5242_v60 = vadd.f32 %v2868_v56, %v6515_v51 }
 0x240   : > { %v4073_v57 = vmax.f32 %v5175_v38, %v3817_v49  ;;  %v3825_v59 = vmul.f32 0.2, %v5177_v1  ;;  %3164 = vmatmul.mubr.bf16.gmra.mrb[124].mxu0 %v5902_v61  ;;  %v4075_v62 = vmax.f32 %v5239_v43, %v3819_v52  ;;  %v3827_v0 = vmul.f32 0.2, %v5241_v54  ;;  %3550 = vmatmul.mubr.bf16.gmra.mrb[124].mxu1 %v5902_v61 }
 0x241   : > { %v4074_v63 = vmax.f32 %v5176_v44, %v3818_v53  ;;  %v3826_v3 = vmul.f32 0.2, %v5178_v55  ;;  %3206 = vmatprep.mubr.bf16.mxu0 %v5903_v7  ;;  %v4076_v23 = vmax.f32 %v5240_v50, %v3820_v58  ;;  %v3828_v9 = vmul.f32 0.2, %v5242_v60  ;;  %3592 = vmatprep.mubr.bf16.mxu1 %v5903_v7 }
 0x242   : > { %v4272_v8 = vmax.f32 %v4271_v35, %v4073_v57  ;;  %v4081_v30 = vmax.f32 %v5177_v1, %v3825_v59  ;;  %v4346_v10 = vmax.f32 %v4345_v41, %v4075_v62  ;;  %v4083_v12 = vmax.f32 %v5241_v54, %v3827_v0  ;;  %v5905_v1 = vld [vmem:[%s6362_s30 + $0x2c] ss:$16 sps:$4 sm:$0xff]  }
 0x243   : > { %v4309_v11 = vmax.f32 %v4308_v42, %v4074_v63  ;;  %v4082_v13 = vmax.f32 %v5178_v55, %v3826_v3  ;;  %v2486_v24 = vpop.f32.mrb[20].mxu0  ;;  %v4383_v31 = vmax.f32 %v4382_v48, %v4076_v23  ;;  %v4084_v14 = vmax.f32 %v5242_v60, %v3828_v9  ;;  %v2872_v16 = vpop.f32.mrb[20].mxu1 }
 0x244   : > { %v4273_v36 = vmax.f32 %v4272_v8, %v4081_v30  ;;  %v5179_v15 = vadd.f32 %v2486_v24, %v6508_v4  ;;  %v2488_v17 = vpop.f32.mrb[21].mxu0  ;;  %v4347_v18 = vmax.f32 %v4346_v10, %v4083_v12  ;;  %v5243_v20 = vadd.f32 %v2872_v16, %v6510_v5  ;;  %v2874_v25 = vpop.f32.mrb[21].mxu1 }
 0x245   : > { %v4310_v19 = vmax.f32 %v4309_v11, %v4082_v13  ;;  %v5180_v21 = vadd.f32 %v2488_v17, %v6512_v6  ;;  %v2490_v26 = vpop.f32.mrb[22].mxu0  ;;  %v4384_v27 = vmax.f32 %v4383_v31, %v4084_v14  ;;  %v5244_v29 = vadd.f32 %v2874_v25, %v6515_v51  ;;  %v2876_v33 = vpop.f32.mrb[22].mxu1  ;;  %v5906_v25 = vld [vmem:[%s6362_s30 + $0x28] ss:$16 sps:$4 sm:$0xff]  }
 0x246   : > { %v3833_v28 = vmul.f32 0.2, %v5179_v15  ;;  %v5181_v32 = vadd.f32 %v2490_v26, %v6508_v4  ;;  %v2492_v34 = vpop.f32.mrb[23].mxu0  ;;  %v3835_v35 = vmul.f32 0.2, %v5243_v20  ;;  %v5245_v38 = vadd.f32 %v2876_v33, %v6510_v5  ;;  %v2878_v40 = vpop.f32.mrb[23].mxu1 }
 0x247   : > { %v3834_v37 = vmul.f32 0.2, %v5180_v21  ;;  %v5182_v39 = vadd.f32 %v2492_v34, %v6512_v6  ;;  %v3836_v42 = vmul.f32 0.2, %v5244_v29  ;;  %v5246_v44 = vadd.f32 %v2878_v40, %v6515_v51 }
 0x248   : > { %v4089_v41 = vmax.f32 %v5179_v15, %v3833_v28  ;;  %v3841_v43 = vmul.f32 0.2, %v5181_v32  ;;  %3207 = vmatmul.mubr.bf16.vlgmr.msra.gmra.mrb[64].mxu0 %v5904_v46  ;;  %v4091_v47 = vmax.f32 %v5243_v20, %v3835_v35  ;;  %v3843_v49 = vmul.f32 0.2, %v5245_v38  ;;  %3593 = vmatmul.mubr.bf16.vlgmr.msra.gmra.mrb[64].mxu1 %v5904_v46 }
 0x249   : > { %v4090_v48 = vmax.f32 %v5180_v21, %v3834_v37  ;;  %v3842_v50 = vmul.f32 0.2, %v5182_v39  ;;  %3216 = vmatprep.mubr.bf16.mxu0 %v5905_v1  ;;  %v4092_v22 = vmax.f32 %v5244_v29, %v3836_v42  ;;  %v3844_v53 = vmul.f32 0.2, %v5246_v44  ;;  %3602 = vmatprep.mubr.bf16.mxu1 %v5905_v1 }
 0x24a   : > { %v4274_v2 = vmax.f32 %v4273_v36, %v4089_v41  ;;  %v4097_v52 = vmax.f32 %v5181_v32, %v3841_v43  ;;  %v4348_v54 = vmax.f32 %v4347_v18, %v4091_v47  ;;  %v4099_v56 = vmax.f32 %v5245_v38, %v3843_v49  ;;  %v5907_v32 = vld [vmem:[%s6362_s30 + $0x4c] ss:$16 sps:$4 sm:$0xff]  }
 0x24b   : > { %v4311_v55 = vmax.f32 %v4310_v19, %v4090_v48  ;;  %v4098_v57 = vmax.f32 %v5182_v39, %v3842_v50  ;;  %v2496_v58 = vpop.f32.mrb[24].mxu0  ;;  %v4385_v59 = vmax.f32 %v4384_v27, %v4092_v22  ;;  %v4100_v61 = vmax.f32 %v5246_v44, %v3844_v53  ;;  %v2882_v63 = vpop.f32.mrb[24].mxu1 }
 0x24c   : > { %v4275_v60 = vmax.f32 %v4274_v2, %v4097_v52  ;;  %v5183_v62 = vadd.f32 %v2496_v58, %v6508_v4  ;;  %v2498_v0 = vpop.f32.mrb[25].mxu0  ;;  %v4349_v3 = vmax.f32 %v4348_v54, %v4099_v56  ;;  %v5247_v8 = vadd.f32 %v2882_v63, %v6510_v5  ;;  %v2884_v30 = vpop.f32.mrb[25].mxu1 }
 0x24d   : > { %v4312_v7 = vmax.f32 %v4311_v55, %v4098_v57  ;;  %v5184_v23 = vadd.f32 %v2498_v0, %v6512_v6  ;;  %v2500_v9 = vpop.f32.mrb[26].mxu0  ;;  %v4386_v10 = vmax.f32 %v4385_v59, %v4100_v61  ;;  %v5248_v12 = vadd.f32 %v2884_v30, %v6515_v51  ;;  %v2886_v24 = vpop.f32.mrb[26].mxu1  ;;  %v5908_v30 = vld [vmem:[%s6362_s30 + $0x48] ss:$16 sps:$4 sm:$0xff]  }
 0x24e   : > { %v3849_v11 = vmul.f32 0.2, %v5183_v62  ;;  %v5185_v13 = vadd.f32 %v2500_v9, %v6508_v4  ;;  %v2502_v31 = vpop.f32.mrb[27].mxu0  ;;  %v3851_v36 = vmul.f32 0.2, %v5247_v8  ;;  %v5249_v15 = vadd.f32 %v2886_v24, %v6510_v5  ;;  %v2888_v17 = vpop.f32.mrb[27].mxu1 }
 0x24f   : > { %v3850_v14 = vmul.f32 0.2, %v5184_v23  ;;  %v5186_v16 = vadd.f32 %v2502_v31, %v6512_v6  ;;  %v3852_v19 = vmul.f32 0.2, %v5248_v12  ;;  %v5250_v21 = vadd.f32 %v2888_v17, %v6515_v51 }
 0x250   : > { %v4105_v18 = vmax.f32 %v5183_v62, %v3849_v11  ;;  %v3857_v20 = vmul.f32 0.2, %v5185_v13  ;;  %3217 = vmatmul.mubr.bf16.gmra.mrb[68].mxu0 %v5906_v25  ;;  %v4107_v26 = vmax.f32 %v5247_v8, %v3851_v36  ;;  %v3859_v28 = vmul.f32 0.2, %v5249_v15  ;;  %3603 = vmatmul.mubr.bf16.gmra.mrb[68].mxu1 %v5906_v25 }
 0x251   : > { %v4106_v27 = vmax.f32 %v5184_v23, %v3850_v14  ;;  %v3858_v29 = vmul.f32 0.2, %v5186_v16  ;;  %3226 = vmatprep.mubr.bf16.mxu0 %v5907_v32  ;;  %v4108_v34 = vmax.f32 %v5248_v12, %v3852_v19  ;;  %v3860_v37 = vmul.f32 0.2, %v5250_v21  ;;  %3612 = vmatprep.mubr.bf16.mxu1 %v5907_v32 }
 0x252   : > { %v4276_v33 = vmax.f32 %v4275_v60, %v4105_v18  ;;  %v4113_v35 = vmax.f32 %v5185_v13, %v3857_v20  ;;  %v4350_v38 = vmax.f32 %v4349_v3, %v4107_v26  ;;  %v4115_v40 = vmax.f32 %v5249_v15, %v3859_v28  ;;  %v5909_v13 = vld [vmem:[%s6362_s30 + $0x6c] ss:$16 sps:$4 sm:$0xff]  }
 0x253   : > { %v4313_v39 = vmax.f32 %v4312_v7, %v4106_v27  ;;  %v4114_v41 = vmax.f32 %v5186_v16, %v3858_v29  ;;  %v2506_v42 = vpop.f32.mrb[28].mxu0  ;;  %v4387_v43 = vmax.f32 %v4386_v10, %v4108_v34  ;;  %v4116_v46 = vmax.f32 %v5250_v21, %v3860_v37  ;;  %v2892_v48 = vpop.f32.mrb[28].mxu1 }
 0x254   : > { %v4277_v44 = vmax.f32 %v4276_v33, %v4113_v35  ;;  %v5187_v47 = vadd.f32 %v2506_v42, %v6508_v4  ;;  %v2508_v49 = vpop.f32.mrb[29].mxu0  ;;  %v4351_v50 = vmax.f32 %v4350_v38, %v4115_v40  ;;  %v5251_v2 = vadd.f32 %v2892_v48, %v6510_v5  ;;  %v2894_v52 = vpop.f32.mrb[29].mxu1 }
 0x255   : > { %v4314_v1 = vmax.f32 %v4313_v39, %v4114_v41  ;;  %v5188_v22 = vadd.f32 %v2508_v49, %v6512_v6  ;;  %v2510_v53 = vpop.f32.mrb[30].mxu0  ;;  %v4388_v54 = vmax.f32 %v4387_v43, %v4116_v46  ;;  %v5252_v56 = vadd.f32 %v2894_v52, %v6515_v51  ;;  %v2896_v58 = vpop.f32.mrb[30].mxu1  ;;  %v5910_v52 = vld [vmem:[%s6362_s30 + $0x68] ss:$16 sps:$4 sm:$0xff]  }
 0x256   : > { %v3865_v55 = vmul.f32 0.2, %v5187_v47  ;;  %v5189_v57 = vadd.f32 %v2510_v53, %v6508_v4  ;;  %v2512_v59 = vpop.f32.mrb[31].mxu0  ;;  %v3867_v60 = vmul.f32 0.2, %v5251_v2  ;;  %v5253_v62 = vadd.f32 %v2896_v58, %v6510_v5  ;;  %v2898_v0 = vpop.f32.mrb[31].mxu1 }
 0x257   : > { %v3866_v61 = vmul.f32 0.2, %v5188_v22  ;;  %v5190_v63 = vadd.f32 %v2512_v59, %v6512_v6  ;;  %v3868_v7 = vmul.f32 0.2, %v5252_v56  ;;  %v5254_v23 = vadd.f32 %v2898_v0, %v6515_v51 }
 0x258   : > { %v4121_v3 = vmax.f32 %v5187_v47, %v3865_v55  ;;  %v3873_v8 = vmul.f32 0.2, %v5189_v57  ;;  %3227 = vmatmul.mubr.bf16.gmra.mrb[72].mxu0 %v5908_v30  ;;  %v4123_v9 = vmax.f32 %v5251_v2, %v3867_v60  ;;  %v3875_v11 = vmul.f32 0.2, %v5253_v62  ;;  %3613 = vmatmul.mubr.bf16.gmra.mrb[72].mxu1 %v5908_v30 }
 0x259   : > { %v4122_v10 = vmax.f32 %v5188_v22, %v3866_v61  ;;  %v3874_v12 = vmul.f32 0.2, %v5190_v63  ;;  %3236 = vmatprep.mubr.bf16.mxu0 %v5909_v13  ;;  %v4124_v31 = vmax.f32 %v5252_v56, %v3868_v7  ;;  %v3876_v14 = vmul.f32 0.2, %v5254_v23  ;;  %3622 = vmatprep.mubr.bf16.mxu1 %v5909_v13 }
 0x25a   : > { %v4278_v24 = vmax.f32 %v4277_v44, %v4121_v3  ;;  %v4129_v36 = vmax.f32 %v5189_v57, %v3873_v8  ;;  %v4352_v15 = vmax.f32 %v4351_v50, %v4123_v9  ;;  %v4131_v17 = vmax.f32 %v5253_v62, %v3875_v11  ;;  %v5911_v57 = vld [vmem:[%s6362_s30 + $0x8c] ss:$16 sps:$4 sm:$0xff]  }
 0x25b   : > { %v4315_v16 = vmax.f32 %v4314_v1, %v4122_v10  ;;  %v4130_v18 = vmax.f32 %v5190_v63, %v3874_v12  ;;  %v2516_v19 = vpop.f32.mrb[32].mxu0  ;;  %v4389_v20 = vmax.f32 %v4388_v54, %v4124_v31  ;;  %v4132_v25 = vmax.f32 %v5254_v23, %v3876_v14  ;;  %v2902_v27 = vpop.f32.mrb[32].mxu1 }
 0x25c   : > { %v4279_v21 = vmax.f32 %v4278_v24, %v4129_v36  ;;  %v5191_v26 = vadd.f32 %v2516_v19, %v6508_v4  ;;  %v2518_v28 = vpop.f32.mrb[33].mxu0  ;;  %v4353_v29 = vmax.f32 %v4352_v15, %v4131_v17  ;;  %v5255_v33 = vadd.f32 %v2902_v27, %v6510_v5  ;;  %v2904_v35 = vpop.f32.mrb[33].mxu1 }
 0x25d   : > { %v4316_v32 = vmax.f32 %v4315_v16, %v4130_v18  ;;  %v5192_v34 = vadd.f32 %v2518_v28, %v6512_v6  ;;  %v2520_v37 = vpop.f32.mrb[34].mxu0  ;;  %v4390_v38 = vmax.f32 %v4389_v20, %v4132_v25  ;;  %v5256_v40 = vadd.f32 %v2904_v35, %v6515_v51  ;;  %v2906_v42 = vpop.f32.mrb[34].mxu1  ;;  %v5912_v35 = vld [vmem:[%s6362_s30 + $0x88] ss:$16 sps:$4 sm:$0xff]  }
 0x25e   : > { %v3881_v39 = vmul.f32 0.2, %v5191_v26  ;;  %v5193_v41 = vadd.f32 %v2520_v37, %v6508_v4  ;;  %v2522_v43 = vpop.f32.mrb[35].mxu0  ;;  %v3883_v44 = vmul.f32 0.2, %v5255_v33  ;;  %v5257_v47 = vadd.f32 %v2906_v42, %v6510_v5  ;;  %v2908_v49 = vpop.f32.mrb[35].mxu1 }
 0x25f   : > { %v3882_v46 = vmul.f32 0.2, %v5192_v34  ;;  %v5194_v48 = vadd.f32 %v2522_v43, %v6512_v6  ;;  %v3884_v1 = vmul.f32 0.2, %v5256_v40  ;;  %v5258_v22 = vadd.f32 %v2908_v49, %v6515_v51 }
 0x260   : > { %v4137_v50 = vmax.f32 %v5191_v26, %v3881_v39  ;;  %v3889_v2 = vmul.f32 0.2, %v5193_v41  ;;  %3237 = vmatmul.mubr.bf16.gmra.mrb[76].mxu0 %v5910_v52  ;;  %v4139_v53 = vmax.f32 %v5255_v33, %v3883_v44  ;;  %v3891_v55 = vmul.f32 0.2, %v5257_v47  ;;  %3623 = vmatmul.mubr.bf16.gmra.mrb[76].mxu1 %v5910_v52 }
 0x261   : > { %v4138_v54 = vmax.f32 %v5192_v34, %v3882_v46  ;;  %v3890_v56 = vmul.f32 0.2, %v5194_v48  ;;  %3246 = vmatprep.mubr.bf16.mxu0 %v5911_v57  ;;  %v4140_v59 = vmax.f32 %v5256_v40, %v3884_v1  ;;  %v3892_v61 = vmul.f32 0.2, %v5258_v22  ;;  %3632 = vmatprep.mubr.bf16.mxu1 %v5911_v57 }
 0x262   : > { %v4280_v58 = vmax.f32 %v4279_v21, %v4137_v50  ;;  %v4145_v60 = vmax.f32 %v5193_v41, %v3889_v2  ;;  %v4354_v62 = vmax.f32 %v4353_v29, %v4139_v53  ;;  %v4147_v0 = vmax.f32 %v5257_v47, %v3891_v55  ;;  %v5913_v41 = vld [vmem:[%s6362_s30 + $0xac] ss:$16 sps:$4 sm:$0xff]  }
 0x263   : > { %v4317_v63 = vmax.f32 %v4316_v32, %v4138_v54  ;;  %v4146_v3 = vmax.f32 %v5194_v48, %v3890_v56  ;;  %v2526_v7 = vpop.f32.mrb[36].mxu0  ;;  %v4391_v8 = vmax.f32 %v4390_v38, %v4140_v59  ;;  %v4148_v30 = vmax.f32 %v5258_v22, %v3892_v61  ;;  %v2912_v10 = vpop.f32.mrb[36].mxu1 }
 0x264   : > { %v4281_v23 = vmax.f32 %v4280_v58, %v4145_v60  ;;  %v5195_v9 = vadd.f32 %v2526_v7, %v6508_v4  ;;  %v2528_v11 = vpop.f32.mrb[37].mxu0  ;;  %v4355_v12 = vmax.f32 %v4354_v62, %v4147_v0  ;;  %v5259_v24 = vadd.f32 %v2912_v10, %v6510_v5  ;;  %v2914_v36 = vpop.f32.mrb[37].mxu1 }
 0x265   : > { %v4318_v13 = vmax.f32 %v4317_v63, %v4146_v3  ;;  %v5196_v31 = vadd.f32 %v2528_v11, %v6512_v6  ;;  %v2530_v14 = vpop.f32.mrb[38].mxu0  ;;  %v4392_v15 = vmax.f32 %v4391_v8, %v4148_v30  ;;  %v5260_v17 = vadd.f32 %v2914_v36, %v6515_v51  ;;  %v2916_v19 = vpop.f32.mrb[38].mxu1  ;;  %v5914_v36 = vld [vmem:[%s6362_s30 + $0xa8] ss:$16 sps:$4 sm:$0xff]  }
 0x266   : > { %v3897_v16 = vmul.f32 0.2, %v5195_v9  ;;  %v5197_v18 = vadd.f32 %v2530_v14, %v6508_v4  ;;  %v2532_v20 = vpop.f32.mrb[39].mxu0  ;;  %v3899_v21 = vmul.f32 0.2, %v5259_v24  ;;  %v5261_v26 = vadd.f32 %v2916_v19, %v6510_v5  ;;  %v2918_v28 = vpop.f32.mrb[39].mxu1 }
 0x267   : > { %v3898_v25 = vmul.f32 0.2, %v5196_v31  ;;  %v5198_v27 = vadd.f32 %v2532_v20, %v6512_v6  ;;  %v3900_v32 = vmul.f32 0.2, %v5260_v17  ;;  %v5262_v34 = vadd.f32 %v2918_v28, %v6515_v51 }
 0x268   : > { %v4153_v29 = vmax.f32 %v5195_v9, %v3897_v16  ;;  %v3905_v33 = vmul.f32 0.2, %v5197_v18  ;;  %3247 = vmatmul.mubr.bf16.gmra.mrb[80].mxu0 %v5912_v35  ;;  %v4155_v37 = vmax.f32 %v5259_v24, %v3899_v21  ;;  %v3907_v39 = vmul.f32 0.2, %v5261_v26  ;;  %3633 = vmatmul.mubr.bf16.gmra.mrb[80].mxu1 %v5912_v35 }
 0x269   : > { %v4154_v38 = vmax.f32 %v5196_v31, %v3898_v25  ;;  %v3906_v40 = vmul.f32 0.2, %v5198_v27  ;;  %3256 = vmatprep.mubr.bf16.mxu0 %v5913_v41  ;;  %v4156_v43 = vmax.f32 %v5260_v17, %v3900_v32  ;;  %v3908_v46 = vmul.f32 0.2, %v5262_v34  ;;  %3642 = vmatprep.mubr.bf16.mxu1 %v5913_v41 }
 0x26a   : > { %v4282_v42 = vmax.f32 %v4281_v23, %v4153_v29  ;;  %v4161_v44 = vmax.f32 %v5197_v18, %v3905_v33  ;;  %v4356_v47 = vmax.f32 %v4355_v12, %v4155_v37  ;;  %v4163_v49 = vmax.f32 %v5261_v26, %v3907_v39  ;;  %v5915_v18 = vld [vmem:[%s6362_s30 + $0xcc] ss:$16 sps:$4 sm:$0xff]  }
 0x26b   : > { %v4319_v48 = vmax.f32 %v4318_v13, %v4154_v38  ;;  %v4162_v50 = vmax.f32 %v5198_v27, %v3906_v40  ;;  %v2536_v1 = vpop.f32.mrb[40].mxu0  ;;  %v4393_v2 = vmax.f32 %v4392_v15, %v4156_v43  ;;  %v4164_v52 = vmax.f32 %v5262_v34, %v3908_v46  ;;  %v2922_v54 = vpop.f32.mrb[40].mxu1 }
 0x26c   : > { %v4283_v22 = vmax.f32 %v4282_v42, %v4161_v44  ;;  %v5199_v53 = vadd.f32 %v2536_v1, %v6508_v4  ;;  %v2538_v55 = vpop.f32.mrb[41].mxu0  ;;  %v4357_v56 = vmax.f32 %v4356_v47, %v4163_v49  ;;  %v5263_v58 = vadd.f32 %v2922_v54, %v6510_v5  ;;  %v2924_v60 = vpop.f32.mrb[41].mxu1 }
 0x26d   : > { %v4320_v57 = vmax.f32 %v4319_v48, %v4162_v50  ;;  %v5200_v59 = vadd.f32 %v2538_v55, %v6512_v6  ;;  %v2540_v61 = vpop.f32.mrb[42].mxu0  ;;  %v4394_v62 = vmax.f32 %v4393_v2, %v4164_v52  ;;  %v5264_v0 = vadd.f32 %v2924_v60, %v6515_v51  ;;  %v2926_v7 = vpop.f32.mrb[42].mxu1  ;;  %v5916_v60 = vld [vmem:[%s6362_s30 + $0xc8] ss:$16 sps:$4 sm:$0xff]  }
 0x26e   : > { %v3913_v63 = vmul.f32 0.2, %v5199_v53  ;;  %v5201_v3 = vadd.f32 %v2540_v61, %v6508_v4  ;;  %v2542_v8 = vpop.f32.mrb[43].mxu0  ;;  %v3915_v23 = vmul.f32 0.2, %v5263_v58  ;;  %v5265_v9 = vadd.f32 %v2926_v7, %v6510_v5  ;;  %v2928_v11 = vpop.f32.mrb[43].mxu1 }
 0x26f   : > { %v3914_v30 = vmul.f32 0.2, %v5200_v59  ;;  %v5202_v10 = vadd.f32 %v2542_v8, %v6512_v6  ;;  %v3916_v13 = vmul.f32 0.2, %v5264_v0  ;;  %v5266_v31 = vadd.f32 %v2928_v11, %v6515_v51 }
 0x270   : > { %v4169_v12 = vmax.f32 %v5199_v53, %v3913_v63  ;;  %v3921_v24 = vmul.f32 0.2, %v5201_v3  ;;  %3257 = vmatmul.mubr.bf16.gmra.mrb[84].mxu0 %v5914_v36  ;;  %v4171_v14 = vmax.f32 %v5263_v58, %v3915_v23  ;;  %v3923_v16 = vmul.f32 0.2, %v5265_v9  ;;  %3643 = vmatmul.mubr.bf16.gmra.mrb[84].mxu1 %v5914_v36 }
 0x271   : > { %v4170_v15 = vmax.f32 %v5200_v59, %v3914_v30  ;;  %v3922_v17 = vmul.f32 0.2, %v5202_v10  ;;  %3266 = vmatprep.mubr.bf16.mxu0 %v5915_v18  ;;  %v4172_v20 = vmax.f32 %v5264_v0, %v3916_v13  ;;  %v3924_v25 = vmul.f32 0.2, %v5266_v31  ;;  %3652 = vmatprep.mubr.bf16.mxu1 %v5915_v18 }
 0x272   : > { %v4284_v19 = vmax.f32 %v4283_v22, %v4169_v12  ;;  %v4177_v21 = vmax.f32 %v5201_v3, %v3921_v24  ;;  %v4358_v26 = vmax.f32 %v4357_v56, %v4171_v14  ;;  %v4179_v28 = vmax.f32 %v5265_v9, %v3923_v16  ;;  %v5917_v3 = vld [vmem:[%s6362_s30 + $0xec] ss:$16 sps:$4 sm:$0xff]  }
 0x273   : > { %v4321_v27 = vmax.f32 %v4320_v57, %v4170_v15  ;;  %v4178_v29 = vmax.f32 %v5202_v10, %v3922_v17  ;;  %v2546_v32 = vpop.f32.mrb[44].mxu0  ;;  %v4395_v33 = vmax.f32 %v4394_v62, %v4172_v20  ;;  %v4180_v35 = vmax.f32 %v5266_v31, %v3924_v25  ;;  %v2932_v38 = vpop.f32.mrb[44].mxu1 }
 0x274   : > { %v4285_v34 = vmax.f32 %v4284_v19, %v4177_v21  ;;  %v5203_v37 = vadd.f32 %v2546_v32, %v6508_v4  ;;  %v2548_v39 = vpop.f32.mrb[45].mxu0  ;;  %v4359_v40 = vmax.f32 %v4358_v26, %v4179_v28  ;;  %v5267_v42 = vadd.f32 %v2932_v38, %v6510_v5  ;;  %v2934_v44 = vpop.f32.mrb[45].mxu1 }
 0x275   : > { %v4322_v41 = vmax.f32 %v4321_v27, %v4178_v29  ;;  %v5204_v43 = vadd.f32 %v2548_v39, %v6512_v6  ;;  %v2550_v46 = vpop.f32.mrb[46].mxu0  ;;  %v4396_v47 = vmax.f32 %v4395_v33, %v4180_v35  ;;  %v5268_v49 = vadd.f32 %v2934_v44, %v6515_v51  ;;  %v2936_v1 = vpop.f32.mrb[46].mxu1  ;;  %v5918_v44 = vld [vmem:[%s6362_s30 + $0xe8] ss:$16 sps:$4 sm:$0xff]  }
 0x276   : > { %v3929_v48 = vmul.f32 0.2, %v5203_v37  ;;  %v5205_v50 = vadd.f32 %v2550_v46, %v6508_v4  ;;  %v2552_v2 = vpop.f32.mrb[47].mxu0  ;;  %v3931_v22 = vmul.f32 0.2, %v5267_v42  ;;  %v5269_v53 = vadd.f32 %v2936_v1, %v6510_v5  ;;  %v2938_v55 = vpop.f32.mrb[47].mxu1 }
 0x277   : > { %v3930_v52 = vmul.f32 0.2, %v5204_v43  ;;  %v5206_v54 = vadd.f32 %v2552_v2, %v6512_v6  ;;  %v3932_v57 = vmul.f32 0.2, %v5268_v49  ;;  %v5270_v59 = vadd.f32 %v2938_v55, %v6515_v51 }
 0x278   : > { %v4185_v56 = vmax.f32 %v5203_v37, %v3929_v48  ;;  %v3937_v58 = vmul.f32 0.2, %v5205_v50  ;;  %3267 = vmatmul.mubr.bf16.gmra.mrb[88].mxu0 %v5916_v60  ;;  %v4187_v61 = vmax.f32 %v5267_v42, %v3931_v22  ;;  %v3939_v63 = vmul.f32 0.2, %v5269_v53  ;;  %3653 = vmatmul.mubr.bf16.gmra.mrb[88].mxu1 %v5916_v60 }
 0x279   : > { %v4186_v62 = vmax.f32 %v5204_v43, %v3930_v52  ;;  %v3938_v0 = vmul.f32 0.2, %v5206_v54  ;;  %3276 = vmatprep.mubr.bf16.mxu0 %v5917_v3  ;;  %v4188_v8 = vmax.f32 %v5268_v49, %v3932_v57  ;;  %v3940_v30 = vmul.f32 0.2, %v5270_v59  ;;  %3662 = vmatprep.mubr.bf16.mxu1 %v5917_v3 }
 0x27a   : > { %v4286_v7 = vmax.f32 %v4285_v34, %v4185_v56  ;;  %v4193_v23 = vmax.f32 %v5205_v50, %v3937_v58  ;;  %v4360_v9 = vmax.f32 %v4359_v40, %v4187_v61  ;;  %v4195_v11 = vmax.f32 %v5269_v53, %v3939_v63  ;;  %v5919_v50 = vld [vmem:[%s6362_s30 + $0x10c] ss:$16 sps:$4 sm:$0xff]  }
 0x27b   : > { %v4323_v10 = vmax.f32 %v4322_v41, %v4186_v62  ;;  %v4194_v12 = vmax.f32 %v5206_v54, %v3938_v0  ;;  %v2556_v13 = vpop.f32.mrb[48].mxu0  ;;  %v4397_v24 = vmax.f32 %v4396_v47, %v4188_v8  ;;  %v4196_v36 = vmax.f32 %v5270_v59, %v3940_v30  ;;  %v2942_v15 = vpop.f32.mrb[48].mxu1 }
 0x27c   : > { %v4287_v31 = vmax.f32 %v4286_v7, %v4193_v23  ;;  %v5207_v14 = vadd.f32 %v2556_v13, %v6508_v4  ;;  %v2558_v16 = vpop.f32.mrb[49].mxu0  ;;  %v4361_v17 = vmax.f32 %v4360_v9, %v4195_v11  ;;  %v5271_v19 = vadd.f32 %v2942_v15, %v6510_v5  ;;  %v2944_v21 = vpop.f32.mrb[49].mxu1 }
 0x27d   : > { %v4324_v18 = vmax.f32 %v4323_v10, %v4194_v12  ;;  %v5208_v20 = vadd.f32 %v2558_v16, %v6512_v6  ;;  %v2560_v25 = vpop.f32.mrb[50].mxu0  ;;  %v4398_v26 = vmax.f32 %v4397_v24, %v4196_v36  ;;  %v5272_v28 = vadd.f32 %v2944_v21, %v6515_v51  ;;  %v2946_v32 = vpop.f32.mrb[50].mxu1  ;;  %v5920_v21 = vld [vmem:[%s6362_s30 + $0x108] ss:$16 sps:$4 sm:$0xff]  }
 0x27e   : > { %v3945_v27 = vmul.f32 0.2, %v5207_v14  ;;  %v5209_v29 = vadd.f32 %v2560_v25, %v6508_v4  ;;  %v2562_v33 = vpop.f32.mrb[51].mxu0  ;;  %v3947_v34 = vmul.f32 0.2, %v5271_v19  ;;  %v5273_v37 = vadd.f32 %v2946_v32, %v6510_v5  ;;  %v2948_v39 = vpop.f32.mrb[51].mxu1 }
 0x27f   : > { %v3946_v35 = vmul.f32 0.2, %v5208_v20  ;;  %v5210_v38 = vadd.f32 %v2562_v33, %v6512_v6  ;;  %v3948_v41 = vmul.f32 0.2, %v5272_v28  ;;  %v5274_v43 = vadd.f32 %v2948_v39, %v6515_v51 }
 0x280   : > { %v4201_v40 = vmax.f32 %v5207_v14, %v3945_v27  ;;  %v3953_v42 = vmul.f32 0.2, %v5209_v29  ;;  %3277 = vmatmul.mubr.bf16.gmra.mrb[92].mxu0 %v5918_v44  ;;  %v4203_v46 = vmax.f32 %v5271_v19, %v3947_v34  ;;  %v3955_v48 = vmul.f32 0.2, %v5273_v37  ;;  %3663 = vmatmul.mubr.bf16.gmra.mrb[92].mxu1 %v5918_v44 }
 0x281   : > { %v4202_v47 = vmax.f32 %v5208_v20, %v3946_v35  ;;  %v3954_v49 = vmul.f32 0.2, %v5210_v38  ;;  %3286 = vmatprep.mubr.bf16.mxu0 %v5919_v50  ;;  %v4204_v2 = vmax.f32 %v5272_v28, %v3948_v41  ;;  %v3956_v52 = vmul.f32 0.2, %v5274_v43  ;;  %3672 = vmatprep.mubr.bf16.mxu1 %v5919_v50 }
 0x282   : > { %v4288_v1 = vmax.f32 %v4287_v31, %v4201_v40  ;;  %v4209_v22 = vmax.f32 %v5209_v29, %v3953_v42  ;;  %v4362_v53 = vmax.f32 %v4361_v17, %v4203_v46  ;;  %v4211_v55 = vmax.f32 %v5273_v37, %v3955_v48  ;;  %v5921_v29 = vld [vmem:[%s6362_s30 + $0x12c] ss:$16 sps:$4 sm:$0xff]  }
 0x283   : > { %v4325_v54 = vmax.f32 %v4324_v18, %v4202_v47  ;;  %v4210_v56 = vmax.f32 %v5210_v38, %v3954_v49  ;;  %v2566_v57 = vpop.f32.mrb[52].mxu0  ;;  %v4399_v58 = vmax.f32 %v4398_v26, %v4204_v2  ;;  %v4212_v60 = vmax.f32 %v5274_v43, %v3956_v52  ;;  %v2952_v62 = vpop.f32.mrb[52].mxu1 }
 0x284   : > { %v4289_v59 = vmax.f32 %v4288_v1, %v4209_v22  ;;  %v5211_v61 = vadd.f32 %v2566_v57, %v6508_v4  ;;  %v2568_v63 = vpop.f32.mrb[53].mxu0  ;;  %v4363_v0 = vmax.f32 %v4362_v53, %v4211_v55  ;;  %v5275_v7 = vadd.f32 %v2952_v62, %v6510_v5  ;;  %v2954_v23 = vpop.f32.mrb[53].mxu1 }
 0x285   : > { %v4326_v3 = vmax.f32 %v4325_v54, %v4210_v56  ;;  %v5212_v8 = vadd.f32 %v2568_v63, %v6512_v6  ;;  %v2570_v30 = vpop.f32.mrb[54].mxu0  ;;  %v4400_v9 = vmax.f32 %v4399_v58, %v4212_v60  ;;  %v5276_v11 = vadd.f32 %v2954_v23, %v6515_v51  ;;  %v2956_v13 = vpop.f32.mrb[54].mxu1  ;;  %v5922_v23 = vld [vmem:[%s6362_s30 + $0x128] ss:$16 sps:$4 sm:$0xff]  }
 0x286   : > { %v3961_v10 = vmul.f32 0.2, %v5211_v61  ;;  %v5213_v12 = vadd.f32 %v2570_v30, %v6508_v4  ;;  %v2572_v24 = vpop.f32.mrb[55].mxu0  ;;  %v3963_v31 = vmul.f32 0.2, %v5275_v7  ;;  %v5277_v14 = vadd.f32 %v2956_v13, %v6510_v5  ;;  %v2958_v16 = vpop.f32.mrb[55].mxu1 }
 0x287   : > { %v3962_v36 = vmul.f32 0.2, %v5212_v8  ;;  %v5214_v15 = vadd.f32 %v2572_v24, %v6512_v6  ;;  %v3964_v18 = vmul.f32 0.2, %v5276_v11  ;;  %v5278_v20 = vadd.f32 %v2958_v16, %v6515_v51 }
 0x288   : > { %v4217_v17 = vmax.f32 %v5211_v61, %v3961_v10  ;;  %v3969_v19 = vmul.f32 0.2, %v5213_v12  ;;  %3287 = vmatmul.mubr.bf16.gmra.mrb[96].mxu0 %v5920_v21  ;;  %v4219_v25 = vmax.f32 %v5275_v7, %v3963_v31  ;;  %v3971_v27 = vmul.f32 0.2, %v5277_v14  ;;  %3673 = vmatmul.mubr.bf16.gmra.mrb[96].mxu1 %v5920_v21 }
 0x289   : > { %v4218_v26 = vmax.f32 %v5212_v8, %v3962_v36  ;;  %v3970_v28 = vmul.f32 0.2, %v5214_v15  ;;  %3296 = vmatprep.mubr.bf16.mxu0 %v5921_v29  ;;  %v4220_v33 = vmax.f32 %v5276_v11, %v3964_v18  ;;  %v3972_v35 = vmul.f32 0.2, %v5278_v20  ;;  %3682 = vmatprep.mubr.bf16.mxu1 %v5921_v29 }
 0x28a   : > { %v4290_v32 = vmax.f32 %v4289_v59, %v4217_v17  ;;  %v4225_v34 = vmax.f32 %v5213_v12, %v3969_v19  ;;  %v4364_v37 = vmax.f32 %v4363_v0, %v4219_v25  ;;  %v4227_v39 = vmax.f32 %v5277_v14, %v3971_v27  ;;  %v5923_v12 = vld [vmem:[%s6362_s30 + $0x14c] ss:$16 sps:$4 sm:$0xff]  }
 0x28b   : > { %v4327_v38 = vmax.f32 %v4326_v3, %v4218_v26  ;;  %v4226_v40 = vmax.f32 %v5214_v15, %v3970_v28  ;;  %v2576_v41 = vpop.f32.mrb[56].mxu0  ;;  %v4401_v42 = vmax.f32 %v4400_v9, %v4220_v33  ;;  %v4228_v44 = vmax.f32 %v5278_v20, %v3972_v35  ;;  %v2962_v47 = vpop.f32.mrb[56].mxu1 }
 0x28c   : > { %v4291_v43 = vmax.f32 %v4290_v32, %v4225_v34  ;;  %v5215_v46 = vadd.f32 %v2576_v41, %v6508_v4  ;;  %v2578_v48 = vpop.f32.mrb[57].mxu0  ;;  %v4365_v49 = vmax.f32 %v4364_v37, %v4227_v39  ;;  %v5279_v1 = vadd.f32 %v2962_v47, %v6510_v5  ;;  %v2964_v22 = vpop.f32.mrb[57].mxu1 }
 0x28d   : > { %v4328_v50 = vmax.f32 %v4327_v38, %v4226_v40  ;;  %v5216_v2 = vadd.f32 %v2578_v48, %v6512_v6  ;;  %v2580_v52 = vpop.f32.mrb[58].mxu0  ;;  %v4402_v53 = vmax.f32 %v4401_v42, %v4228_v44  ;;  %v5280_v55 = vadd.f32 %v2964_v22, %v6515_v51  ;;  %v2966_v57 = vpop.f32.mrb[58].mxu1 }
 0x28e   : > { %v3977_v54 = vmul.f32 0.2, %v5215_v46  ;;  %v5217_v56 = vadd.f32 %v2580_v52, %v6508_v4  ;;  %v2582_v58 = vpop.f32.mrb[59].mxu0  ;;  %v3979_v59 = vmul.f32 0.2, %v5279_v1  ;;  %v5281_v61 = vadd.f32 %v2966_v57, %v6510_v5  ;;  %v2968_v63 = vpop.f32.mrb[59].mxu1 }
 0x28f   : > { %v3978_v60 = vmul.f32 0.2, %v5216_v2  ;;  %v5218_v62 = vadd.f32 %v2582_v58, %v6512_v6  ;;  %v3980_v3 = vmul.f32 0.2, %v5280_v55  ;;  %v5282_v8 = vadd.f32 %v2968_v63, %v6515_v51 }
 0x290   : > { %v4233_v0 = vmax.f32 %v5215_v46, %v3977_v54  ;;  %v3985_v7 = vmul.f32 0.2, %v5217_v56  ;;  %3297 = vmatmul.mubr.bf16.gmra.mrb[100].mxu0 %v5922_v23  ;;  %v4235_v30 = vmax.f32 %v5279_v1, %v3979_v59  ;;  %v3987_v10 = vmul.f32 0.2, %v5281_v61  ;;  %3683 = vmatmul.mubr.bf16.gmra.mrb[100].mxu1 %v5922_v23  ;;  %v5924_v1 = vld [vmem:[%s6362_s30 + $0x148] ss:$16 sps:$4 sm:$0xff]  }
 0x291   : > { %v4234_v9 = vmax.f32 %v5216_v2, %v3978_v60  ;;  %v3986_v11 = vmul.f32 0.2, %v5218_v62  ;;  %3306 = vmatprep.mubr.bf16.mxu0 %v5923_v12  ;;  %v4236_v24 = vmax.f32 %v5280_v55, %v3980_v3  ;;  %v3988_v36 = vmul.f32 0.2, %v5282_v8  ;;  %3692 = vmatprep.mubr.bf16.mxu1 %v5923_v12 }
 0x292   : > { %v4292_v13 = vmax.f32 %v4291_v43, %v4233_v0  ;;  %v4241_v31 = vmax.f32 %v5217_v56, %v3985_v7  ;;  %v4366_v14 = vmax.f32 %v4365_v49, %v4235_v30  ;;  %v4243_v16 = vmax.f32 %v5281_v61, %v3987_v10  ;;  %v5926_v30 = vld [vmem:[%s6362_s30 + $0x168] ss:$16 sps:$4 sm:$0xff]  }
 0x293   : > { %v4329_v15 = vmax.f32 %v4328_v50, %v4234_v9  ;;  %v4242_v17 = vmax.f32 %v5218_v62, %v3986_v11  ;;  %v2586_v18 = vpop.f32.mrb[60].mxu0  ;;  %v4403_v19 = vmax.f32 %v4402_v53, %v4236_v24  ;;  %v4244_v21 = vmax.f32 %v5282_v8, %v3988_v36  ;;  %v2972_v26 = vpop.f32.mrb[60].mxu1  ;;  %v5925_v53 = vld [vmem:[%s6362_s30 + $0x16c] ss:$16 sps:$4 sm:$0xff]  }
 0x294   : > { %v4293_v20 = vmax.f32 %v4292_v13, %v4241_v31  ;;  %v5219_v25 = vadd.f32 %v2586_v18, %v6508_v4  ;;  %v2588_v27 = vpop.f32.mrb[61].mxu0  ;;  %v4367_v28 = vmax.f32 %v4366_v14, %v4243_v16  ;;  %v5283_v32 = vadd.f32 %v2972_v26, %v6510_v5  ;;  %v2974_v34 = vpop.f32.mrb[61].mxu1  ;;  %v5927_v11 = vld [vmem:[%s6362_s30 + $0x18c] ss:$16 sps:$4 sm:$0xff]  }
 0x295   : > { %v4330_v29 = vmax.f32 %v4329_v15, %v4242_v17  ;;  %v5220_v33 = vadd.f32 %v2588_v27, %v6512_v6  ;;  %v2590_v35 = vpop.f32.mrb[62].mxu0  ;;  %v4404_v37 = vmax.f32 %v4403_v19, %v4244_v21  ;;  %v5284_v39 = vadd.f32 %v2974_v34, %v6515_v51  ;;  %v2976_v41 = vpop.f32.mrb[62].mxu1  ;;  %v5928_v21 = vld [vmem:[%s6362_s30 + $0x188] ss:$16 sps:$4 sm:$0xff]   ;;  %v5929_v27 = vld [vmem:[%s6362_s30 + $0x1ac] ss:$16 sps:$4 sm:$0xff]  }
 0x296   : > { %v3993_v38 = vmul.f32 0.2, %v5219_v25  ;;  %v5221_v40 = vadd.f32 %v2590_v35, %v6508_v4  ;;  %v2592_v42 = vpop.f32.mrb[63].mxu0  ;;  %v3995_v43 = vmul.f32 0.2, %v5283_v32  ;;  %v5285_v46 = vadd.f32 %v2976_v41, %v6510_v5  ;;  %v2978_v47 = vpop.f32.mrb[63].mxu1 }
 0x297   : > { %v3994_v44 = vmul.f32 0.2, %v5220_v33  ;;  %v3996_v49 = vmul.f32 0.2, %v5284_v39  ;;  %v5222_v60 = vadd.f32 %v2592_v42, %v6512_v6  ;;  %v5286_v62 = vadd.f32 %v2978_v47, %v6515_v51  ;;  %v5930_v42 = vld [vmem:[%s6362_s30 + $0x1a8] ss:$16 sps:$4 sm:$0xff]  }
 0x298   : > { %v4249_v48 = vmax.f32 %v5219_v25, %v3993_v38  ;;  %v4001_v50 = vmul.f32 0.2, %v5221_v40  ;;  %3307 = vmatmul.mubr.bf16.gmra.mrb[104].mxu0 %v5924_v1  ;;  %v4251_v2 = vmax.f32 %v5283_v32, %v3995_v43  ;;  %v4003_v52 = vmul.f32 0.2, %v5285_v46  ;;  %3693 = vmatmul.mubr.bf16.gmra.mrb[104].mxu1 %v5924_v1  ;;  %v5934_v1 = vld [vmem:[%s6362_s30 + $0x1e8] ss:$16 sps:$4 sm:$0xff]  }
 0x299   : > { %v4250_v22 = vmax.f32 %v5220_v33, %v3994_v44  ;;  %3316 = vmatprep.mubr.bf16.mxu0 %v5925_v53  ;;  %v4252_v54 = vmax.f32 %v5284_v39, %v3996_v49  ;;  %3702 = vmatprep.mubr.bf16.mxu1 %v5925_v53  ;;  %v4002_v0 = vmul.f32 0.2, %v5222_v60  ;;  %v4004_v7 = vmul.f32 0.2, %v5286_v62  ;;  %v5931_v44 = vld [vmem:[%s6362_s30 + $0x1cc] ss:$16 sps:$4 sm:$0xff]  }
 0x29a   : > { %v4294_v4 = vmax.f32 %v4293_v20, %v4249_v48  ;;  %v4257_v55 = vmax.f32 %v5221_v40, %v4001_v50  ;;  %v4368_v56 = vmax.f32 %v4367_v28, %v4251_v2  ;;  %v4259_v5 = vmax.f32 %v5285_v46, %v4003_v52  ;;  %v5932_v49 = vld [vmem:[%s6362_s30 + $0x1c8] ss:$16 sps:$4 sm:$0xff]   ;;  %v5933_v50 = vld [vmem:[%s6362_s30 + $0x1ec] ss:$16 sps:$4 sm:$0xff]  }
 0x29b   : > { %v4331_v57 = vmax.f32 %v4330_v29, %v4250_v22  ;;  %v4405_v58 = vmax.f32 %v4404_v37, %v4252_v54  ;;  %v4258_v23 = vmax.f32 %v5222_v60, %v4002_v0  ;;  %v4260_v10 = vmax.f32 %v5286_v62, %v4004_v7 }
 0x29c   : > { %v4295_v59 = vmax.f32 %v4294_v4, %v4257_v55  ;;  %v4369_v61 = vmax.f32 %v4368_v56, %v4259_v5  ;;  %v6133_v16 = vmov 1966171168   ;;  %v587_v2 = vsub.s32 4, %v6500_v45  ;;  %v5935_v4 = vld [vmem:[#allocation7] sm:$0xff] }
 0x29d   : > { %v4332_v13 = vmax.f32 %v4331_v57, %v4258_v23  ;;  %v4406_v24 = vmax.f32 %v4405_v58, %v4260_v10  ;;  %v4578_v17 = vunpack.c.l.s4 %v6133_v16  ;;  %v591_v22 = vsub.s32 5, %v6500_v45 }
 0x29e   : > { %v4296_v63 = vrot.slane %v4295_v59, 4  ;;  %v4370_v3 = vrot.slane %v4369_v61, 4  ;;  %v595_v52 = vsub.s32 6, %v6500_v45  ;;  %v599_v53 = vsub.s32 7, %v6500_v45 }
 0x29f   : > { %v4333_v31 = vrot.slane %v4332_v13, 4  ;;  %v4407_v14 = vrot.slane %v4406_v24, 4  ;;  %v4579_v29 = vunpack.c.0.s8 %v4578_v17  ;;  %v6701_v54 = vrot.slane %v5935_v4, %v587_v2 }
 0x2a0   : > { %v4297_v8 = vmax.f32 %v4295_v59, %v4296_v63  ;;  %3317 = vmatmul.mubr.bf16.gmra.mrb[108].mxu0 %v5926_v30  ;;  %v4371_v9 = vmax.f32 %v4369_v61, %v4370_v3  ;;  %3703 = vmatmul.mubr.bf16.gmra.mrb[108].mxu1 %v5926_v30  ;;  %v6703_v55 = vrot.slane %v5935_v4, %v591_v22 }
 0x2a1   : > { %3326 = vmatprep.mubr.bf16.mxu0 %v5927_v11  ;;  %3712 = vmatprep.mubr.bf16.mxu1 %v5927_v11  ;;  %v4334_v15 = vmax.f32 %v4332_v13, %v4333_v31  ;;  %v4408_v18 = vmax.f32 %v4406_v24, %v4407_v14  ;;  %v6682_v39 = vsub.s32 %v4579_v29, %v6500_v45 }
 0x2a2   : > { %v4298_v12 = vrot.slane %v4297_v8, 2  ;;  %v4372_v6 = vrot.slane %v4371_v9, 2  ;;  %v6705_v56 = vrot.slane %v5935_v4, %v595_v52  ;;  %v6707_v57 = vrot.slane %v5935_v4, %v599_v53 }
 0x2a3   : > { %v4335_v20 = vrot.slane %v4334_v15, 2  ;;  %v4409_v26 = vrot.slane %v4408_v18, 2 }
 0x2a4   : > { %v4299_v51 = vmax.f32 %v4297_v8, %v4298_v12  ;;  %v4373_v36 = vmax.f32 %v4371_v9, %v4372_v6 }
 0x2a5   : > { %v4336_v28 = vmax.f32 %v4334_v15, %v4335_v20  ;;  %v4410_v32 = vmax.f32 %v4408_v18, %v4409_v26 }
 0x2a6   : > { %v4300_v19 = vrot.slane %v4299_v51, 1  ;;  %v4374_v25 = vrot.slane %v4373_v36, 1 }
 0x2a7   : > { %v4337_v34 = vrot.slane %v4336_v28, 1  ;;  %v4411_v37 = vrot.slane %v4410_v32, 1 }
 0x2a8   : > { %3327 = vmatmul.mubr.bf16.gmra.mrb[112].mxu0 %v5928_v21  ;;  %3713 = vmatmul.mubr.bf16.gmra.mrb[112].mxu1 %v5928_v21  ;;  %v4301_v33 = vmax.f32 %v4299_v51, %v4300_v19  ;;  %v4375_v35 = vmax.f32 %v4373_v36, %v4374_v25 }
 0x2a9   : > { %3336 = vmatprep.mubr.bf16.mxu0 %v5929_v27  ;;  %3722 = vmatprep.mubr.bf16.mxu1 %v5929_v27  ;;  %v4338_v38 = vmax.f32 %v4336_v28, %v4337_v34  ;;  %v4412_v40 = vmax.f32 %v4410_v32, %v4411_v37 }
 0x2ab   : > { %v4573_v41 = vcombine.low %v4301_v33, %v4338_v38  ;;  %v4574_v43 = vcombine.low %v4375_v35, %v4412_v40 }
 0x2ad   : > { %v6687_v46 = vrot.slane %v4573_v41, %v6682_v39  ;;  %v6690_v47 = vrot.slane %v4574_v43, %v6682_v39 }
 0x2af   : > { %v4605_v48 = vcombine.low %v6687_v46, %v6690_v47 }
 0x2b0   : > { %3337 = vmatmul.mubr.bf16.gmra.mrb[116].mxu0 %v5930_v42  ;;  %3723 = vmatmul.mubr.bf16.gmra.mrb[116].mxu1 %v5930_v42 }
 0x2b1   : > { %3346 = vmatprep.mubr.bf16.mxu0 %v5931_v44  ;;  %3732 = vmatprep.mubr.bf16.mxu1 %v5931_v44 }
 0x2b8   : > { %3347 = vmatmul.mubr.bf16.gmra.mrb[120].mxu0 %v5932_v49  ;;  %3733 = vmatmul.mubr.bf16.gmra.mrb[120].mxu1 %v5932_v49 }
 0x2b9   : > { %3356 = vmatprep.mubr.bf16.mxu0 %v5933_v50  ;;  %3742 = vmatprep.mubr.bf16.mxu1 %v5933_v50 }
 0x2c0   : > { %3357 = vmatmul.mubr.bf16.gmra.mrb[124].mxu0 %v5934_v1  ;;  %3743 = vmatmul.mubr.bf16.gmra.mrb[124].mxu1 %v5934_v1 }
 0x31b   : > { %v3208_v5 = vpop.f32.mrb[64].mxu0  ;;  %v3594_v59 = vpop.f32.mrb[64].mxu1 }
 0x31c   : > { %v5287_v58 = vadd.f32 %v3208_v5, %v6701_v54  ;;  %v3210_v60 = vpop.f32.mrb[65].mxu0  ;;  %v5351_v61 = vadd.f32 %v3594_v59, %v6705_v56  ;;  %v3596_v63 = vpop.f32.mrb[65].mxu1 }
 0x31d   : > { %v5288_v62 = vadd.f32 %v3210_v60, %v6703_v55  ;;  %v3212_v45 = vpop.f32.mrb[66].mxu0  ;;  %v5352_v3 = vadd.f32 %v3596_v63, %v6707_v57  ;;  %v3598_v8 = vpop.f32.mrb[66].mxu1 }
 0x31e   : > { %v3757_v0 = vmul.f32 0.2, %v5287_v58  ;;  %v5289_v7 = vadd.f32 %v3212_v45, %v6701_v54  ;;  %v3214_v23 = vpop.f32.mrb[67].mxu0  ;;  %v3759_v30 = vmul.f32 0.2, %v5351_v61  ;;  %v5353_v10 = vadd.f32 %v3598_v8, %v6705_v56  ;;  %v3600_v12 = vpop.f32.mrb[67].mxu1 }
 0x31f   : > { %v3758_v9 = vmul.f32 0.2, %v5288_v62  ;;  %v5290_v11 = vadd.f32 %v3214_v23, %v6703_v55  ;;  %v3760_v13 = vmul.f32 0.2, %v5352_v3  ;;  %v5354_v24 = vadd.f32 %v3600_v12, %v6707_v57 }
 0x320   : > { %v3765_v6 = vmul.f32 0.2, %v5289_v7  ;;  %v3767_v51 = vmul.f32 0.2, %v5353_v10  ;;  %v4013_v36 = vmax.f32 %v5287_v58, %v3757_v0  ;;  %v4015_v16 = vmax.f32 %v5351_v61, %v3759_v30 }
 0x321   : > { %v3766_v31 = vmul.f32 0.2, %v5290_v11  ;;  %v3768_v15 = vmul.f32 0.2, %v5354_v24  ;;  %v4014_v17 = vmax.f32 %v5288_v62, %v3758_v9  ;;  %v4016_v21 = vmax.f32 %v5352_v3, %v3760_v13 }
 0x322   : > { %v4021_v14 = vmax.f32 %v5289_v7, %v3765_v6  ;;  %v4023_v18 = vmax.f32 %v5353_v10, %v3767_v51 }
 0x323   : > { %v4022_v19 = vmax.f32 %v5290_v11, %v3766_v31  ;;  %v3218_v20 = vpop.f32.mrb[68].mxu0  ;;  %v4024_v26 = vmax.f32 %v5354_v24, %v3768_v15  ;;  %v3604_v28 = vpop.f32.mrb[68].mxu1 }
 0x324   : > { %v4413_v25 = vmax.f32 %v4013_v36, %v4021_v14  ;;  %v5291_v27 = vadd.f32 %v3218_v20, %v6701_v54  ;;  %v3220_v29 = vpop.f32.mrb[69].mxu0  ;;  %v4487_v32 = vmax.f32 %v4015_v16, %v4023_v18  ;;  %v5355_v34 = vadd.f32 %v3604_v28, %v6705_v56  ;;  %v3606_v37 = vpop.f32.mrb[69].mxu1 }
 0x325   : > { %v4450_v33 = vmax.f32 %v4014_v17, %v4022_v19  ;;  %v5292_v35 = vadd.f32 %v3220_v29, %v6703_v55  ;;  %v3222_v38 = vpop.f32.mrb[70].mxu0  ;;  %v4524_v40 = vmax.f32 %v4016_v21, %v4024_v26  ;;  %v5356_v42 = vadd.f32 %v3606_v37, %v6707_v57  ;;  %v3608_v44 = vpop.f32.mrb[70].mxu1 }
 0x326   : > { %v3773_v41 = vmul.f32 0.2, %v5291_v27  ;;  %v5293_v43 = vadd.f32 %v3222_v38, %v6701_v54  ;;  %v3224_v49 = vpop.f32.mrb[71].mxu0  ;;  %v3775_v50 = vmul.f32 0.2, %v5355_v34  ;;  %v5357_v2 = vadd.f32 %v3608_v44, %v6705_v56  ;;  %v3610_v52 = vpop.f32.mrb[71].mxu1 }
 0x327   : > { %v3774_v1 = vmul.f32 0.2, %v5292_v35  ;;  %v5294_v22 = vadd.f32 %v3224_v49, %v6703_v55  ;;  %v3776_v4 = vmul.f32 0.2, %v5356_v42  ;;  %v5358_v58 = vadd.f32 %v3610_v52, %v6707_v57 }
 0x328   : > { %v4029_v53 = vmax.f32 %v5291_v27, %v3773_v41  ;;  %v3781_v5 = vmul.f32 0.2, %v5293_v43  ;;  %v4031_v59 = vmax.f32 %v5355_v34, %v3775_v50  ;;  %v3783_v61 = vmul.f32 0.2, %v5357_v2 }
 0x329   : > { %v4030_v60 = vmax.f32 %v5292_v35, %v3774_v1  ;;  %v3782_v62 = vmul.f32 0.2, %v5294_v22  ;;  %v4032_v45 = vmax.f32 %v5356_v42, %v3776_v4  ;;  %v3784_v3 = vmul.f32 0.2, %v5358_v58 }
 0x32a   : > { %v4414_v63 = vmax.f32 %v4413_v25, %v4029_v53  ;;  %v4037_v0 = vmax.f32 %v5293_v43, %v3781_v5  ;;  %v4488_v7 = vmax.f32 %v4487_v32, %v4031_v59  ;;  %v4039_v23 = vmax.f32 %v5357_v2, %v3783_v61 }
 0x32b   : > { %v4451_v8 = vmax.f32 %v4450_v33, %v4030_v60  ;;  %v4038_v30 = vmax.f32 %v5294_v22, %v3782_v62  ;;  %v3228_v9 = vpop.f32.mrb[72].mxu0  ;;  %v4525_v10 = vmax.f32 %v4524_v40, %v4032_v45  ;;  %v4040_v12 = vmax.f32 %v5358_v58, %v3784_v3  ;;  %v3614_v6 = vpop.f32.mrb[72].mxu1 }
 0x32c   : > { %v4415_v11 = vmax.f32 %v4414_v63, %v4037_v0  ;;  %v5295_v13 = vadd.f32 %v3228_v9, %v6701_v54  ;;  %v3230_v24 = vpop.f32.mrb[73].mxu0  ;;  %v4489_v51 = vmax.f32 %v4488_v7, %v4039_v23  ;;  %v5359_v36 = vadd.f32 %v3614_v6, %v6705_v56  ;;  %v3616_v15 = vpop.f32.mrb[73].mxu1 }
 0x32d   : > { %v4452_v31 = vmax.f32 %v4451_v8, %v4038_v30  ;;  %v5296_v14 = vadd.f32 %v3230_v24, %v6703_v55  ;;  %v3232_v16 = vpop.f32.mrb[74].mxu0  ;;  %v4526_v17 = vmax.f32 %v4525_v10, %v4040_v12  ;;  %v5360_v19 = vadd.f32 %v3616_v15, %v6707_v57  ;;  %v3618_v21 = vpop.f32.mrb[74].mxu1 }
 0x32e   : > { %v3789_v18 = vmul.f32 0.2, %v5295_v13  ;;  %v5297_v20 = vadd.f32 %v3232_v16, %v6701_v54  ;;  %v3234_v25 = vpop.f32.mrb[75].mxu0  ;;  %v3791_v26 = vmul.f32 0.2, %v5359_v36  ;;  %v5361_v28 = vadd.f32 %v3618_v21, %v6705_v56  ;;  %v3620_v32 = vpop.f32.mrb[75].mxu1 }
 0x32f   : > { %v3790_v27 = vmul.f32 0.2, %v5296_v14  ;;  %v5298_v29 = vadd.f32 %v3234_v25, %v6703_v55  ;;  %v3792_v34 = vmul.f32 0.2, %v5360_v19  ;;  %v5362_v37 = vadd.f32 %v3620_v32, %v6707_v57 }
 0x330   : > { %v4045_v33 = vmax.f32 %v5295_v13, %v3789_v18  ;;  %v3797_v35 = vmul.f32 0.2, %v5297_v20  ;;  %v4047_v38 = vmax.f32 %v5359_v36, %v3791_v26  ;;  %v3799_v41 = vmul.f32 0.2, %v5361_v28 }
 0x331   : > { %v4046_v40 = vmax.f32 %v5296_v14, %v3790_v27  ;;  %v3798_v42 = vmul.f32 0.2, %v5298_v29  ;;  %v4048_v44 = vmax.f32 %v5360_v19, %v3792_v34  ;;  %v3800_v50 = vmul.f32 0.2, %v5362_v37 }
 0x332   : > { %v4416_v43 = vmax.f32 %v4415_v11, %v4045_v33  ;;  %v4053_v49 = vmax.f32 %v5297_v20, %v3797_v35  ;;  %v4490_v1 = vmax.f32 %v4489_v51, %v4047_v38  ;;  %v4055_v22 = vmax.f32 %v5361_v28, %v3799_v41 }
 0x333   : > { %v4453_v2 = vmax.f32 %v4452_v31, %v4046_v40  ;;  %v4054_v52 = vmax.f32 %v5298_v29, %v3798_v42  ;;  %v3238_v53 = vpop.f32.mrb[76].mxu0  ;;  %v4527_v4 = vmax.f32 %v4526_v17, %v4048_v44  ;;  %v4056_v58 = vmax.f32 %v5362_v37, %v3800_v50  ;;  %v3624_v60 = vpop.f32.mrb[76].mxu1 }
 0x334   : > { %v4417_v5 = vmax.f32 %v4416_v43, %v4053_v49  ;;  %v5299_v59 = vadd.f32 %v3238_v53, %v6701_v54  ;;  %v3240_v61 = vpop.f32.mrb[77].mxu0  ;;  %v4491_v62 = vmax.f32 %v4490_v1, %v4055_v22  ;;  %v5363_v45 = vadd.f32 %v3624_v60, %v6705_v56  ;;  %v3626_v3 = vpop.f32.mrb[77].mxu1 }
 0x335   : > { %v4454_v63 = vmax.f32 %v4453_v2, %v4054_v52  ;;  %v5300_v0 = vadd.f32 %v3240_v61, %v6703_v55  ;;  %v3242_v7 = vpop.f32.mrb[78].mxu0  ;;  %v4528_v8 = vmax.f32 %v4527_v4, %v4056_v58  ;;  %v5364_v30 = vadd.f32 %v3626_v3, %v6707_v57  ;;  %v3628_v10 = vpop.f32.mrb[78].mxu1 }
 0x336   : > { %v3805_v23 = vmul.f32 0.2, %v5299_v59  ;;  %v5301_v9 = vadd.f32 %v3242_v7, %v6701_v54  ;;  %v3244_v11 = vpop.f32.mrb[79].mxu0  ;;  %v3807_v12 = vmul.f32 0.2, %v5363_v45  ;;  %v5365_v6 = vadd.f32 %v3628_v10, %v6705_v56  ;;  %v3630_v51 = vpop.f32.mrb[79].mxu1 }
 0x337   : > { %v3806_v13 = vmul.f32 0.2, %v5300_v0  ;;  %v5302_v24 = vadd.f32 %v3244_v11, %v6703_v55  ;;  %v3808_v36 = vmul.f32 0.2, %v5364_v30  ;;  %v5366_v15 = vadd.f32 %v3630_v51, %v6707_v57 }
 0x338   : > { %v4061_v31 = vmax.f32 %v5299_v59, %v3805_v23  ;;  %v3813_v14 = vmul.f32 0.2, %v5301_v9  ;;  %v4063_v16 = vmax.f32 %v5363_v45, %v3807_v12  ;;  %v3815_v18 = vmul.f32 0.2, %v5365_v6 }
 0x339   : > { %v4062_v17 = vmax.f32 %v5300_v0, %v3806_v13  ;;  %v3814_v19 = vmul.f32 0.2, %v5302_v24  ;;  %v4064_v21 = vmax.f32 %v5364_v30, %v3808_v36  ;;  %v3816_v26 = vmul.f32 0.2, %v5366_v15 }
 0x33a   : > { %v4418_v20 = vmax.f32 %v4417_v5, %v4061_v31  ;;  %v4069_v25 = vmax.f32 %v5301_v9, %v3813_v14  ;;  %v4492_v27 = vmax.f32 %v4491_v62, %v4063_v16  ;;  %v4071_v29 = vmax.f32 %v5365_v6, %v3815_v18 }
 0x33b   : > { %v4455_v28 = vmax.f32 %v4454_v63, %v4062_v17  ;;  %v4070_v32 = vmax.f32 %v5302_v24, %v3814_v19  ;;  %v3248_v33 = vpop.f32.mrb[80].mxu0  ;;  %v4529_v34 = vmax.f32 %v4528_v8, %v4064_v21  ;;  %v4072_v37 = vmax.f32 %v5366_v15, %v3816_v26  ;;  %v3634_v40 = vpop.f32.mrb[80].mxu1 }
 0x33c   : > { %v4419_v35 = vmax.f32 %v4418_v20, %v4069_v25  ;;  %v5303_v38 = vadd.f32 %v3248_v33, %v6701_v54  ;;  %v3250_v41 = vpop.f32.mrb[81].mxu0  ;;  %v4493_v42 = vmax.f32 %v4492_v27, %v4071_v29  ;;  %v5367_v44 = vadd.f32 %v3634_v40, %v6705_v56  ;;  %v3636_v50 = vpop.f32.mrb[81].mxu1 }
 0x33d   : > { %v4456_v43 = vmax.f32 %v4455_v28, %v4070_v32  ;;  %v5304_v49 = vadd.f32 %v3250_v41, %v6703_v55  ;;  %v3252_v1 = vpop.f32.mrb[82].mxu0  ;;  %v4530_v2 = vmax.f32 %v4529_v34, %v4072_v37  ;;  %v5368_v52 = vadd.f32 %v3636_v50, %v6707_v57  ;;  %v3638_v4 = vpop.f32.mrb[82].mxu1 }
 0x33e   : > { %v3821_v22 = vmul.f32 0.2, %v5303_v38  ;;  %v5305_v53 = vadd.f32 %v3252_v1, %v6701_v54  ;;  %v3254_v5 = vpop.f32.mrb[83].mxu0  ;;  %v3823_v58 = vmul.f32 0.2, %v5367_v44  ;;  %v5369_v60 = vadd.f32 %v3638_v4, %v6705_v56  ;;  %v3640_v62 = vpop.f32.mrb[83].mxu1 }
 0x33f   : > { %v3822_v59 = vmul.f32 0.2, %v5304_v49  ;;  %v5306_v61 = vadd.f32 %v3254_v5, %v6703_v55  ;;  %v3824_v45 = vmul.f32 0.2, %v5368_v52  ;;  %v5370_v3 = vadd.f32 %v3640_v62, %v6707_v57 }
 0x340   : > { %v4077_v63 = vmax.f32 %v5303_v38, %v3821_v22  ;;  %v3829_v0 = vmul.f32 0.2, %v5305_v53  ;;  %v4079_v7 = vmax.f32 %v5367_v44, %v3823_v58  ;;  %v3831_v23 = vmul.f32 0.2, %v5369_v60 }
 0x341   : > { %v4078_v8 = vmax.f32 %v5304_v49, %v3822_v59  ;;  %v3830_v30 = vmul.f32 0.2, %v5306_v61  ;;  %v4080_v10 = vmax.f32 %v5368_v52, %v3824_v45  ;;  %v3832_v12 = vmul.f32 0.2, %v5370_v3 }
 0x342   : > { %v4420_v9 = vmax.f32 %v4419_v35, %v4077_v63  ;;  %v4085_v11 = vmax.f32 %v5305_v53, %v3829_v0  ;;  %v4494_v13 = vmax.f32 %v4493_v42, %v4079_v7  ;;  %v4087_v24 = vmax.f32 %v5369_v60, %v3831_v23 }
 0x343   : > { %v4457_v6 = vmax.f32 %v4456_v43, %v4078_v8  ;;  %v4086_v51 = vmax.f32 %v5306_v61, %v3830_v30  ;;  %v3258_v31 = vpop.f32.mrb[84].mxu0  ;;  %v4531_v36 = vmax.f32 %v4530_v2, %v4080_v10  ;;  %v4088_v15 = vmax.f32 %v5370_v3, %v3832_v12  ;;  %v3644_v17 = vpop.f32.mrb[84].mxu1 }
 0x344   : > { %v4421_v14 = vmax.f32 %v4420_v9, %v4085_v11  ;;  %v5307_v16 = vadd.f32 %v3258_v31, %v6701_v54  ;;  %v3260_v18 = vpop.f32.mrb[85].mxu0  ;;  %v4495_v19 = vmax.f32 %v4494_v13, %v4087_v24  ;;  %v5371_v21 = vadd.f32 %v3644_v17, %v6705_v56  ;;  %v3646_v26 = vpop.f32.mrb[85].mxu1 }
 0x345   : > { %v4458_v20 = vmax.f32 %v4457_v6, %v4086_v51  ;;  %v5308_v25 = vadd.f32 %v3260_v18, %v6703_v55  ;;  %v3262_v27 = vpop.f32.mrb[86].mxu0  ;;  %v4532_v28 = vmax.f32 %v4531_v36, %v4088_v15  ;;  %v5372_v32 = vadd.f32 %v3646_v26, %v6707_v57  ;;  %v3648_v34 = vpop.f32.mrb[86].mxu1 }
 0x346   : > { %v3837_v29 = vmul.f32 0.2, %v5307_v16  ;;  %v5309_v33 = vadd.f32 %v3262_v27, %v6701_v54  ;;  %v3264_v35 = vpop.f32.mrb[87].mxu0  ;;  %v3839_v37 = vmul.f32 0.2, %v5371_v21  ;;  %v5373_v40 = vadd.f32 %v3648_v34, %v6705_v56  ;;  %v3650_v42 = vpop.f32.mrb[87].mxu1 }
 0x347   : > { %v3838_v38 = vmul.f32 0.2, %v5308_v25  ;;  %v5310_v41 = vadd.f32 %v3264_v35, %v6703_v55  ;;  %v3840_v44 = vmul.f32 0.2, %v5372_v32  ;;  %v5374_v50 = vadd.f32 %v3650_v42, %v6707_v57 }
 0x348   : > { %v4093_v43 = vmax.f32 %v5307_v16, %v3837_v29  ;;  %v3845_v49 = vmul.f32 0.2, %v5309_v33  ;;  %v4095_v1 = vmax.f32 %v5371_v21, %v3839_v37  ;;  %v3847_v22 = vmul.f32 0.2, %v5373_v40 }
 0x349   : > { %v4094_v2 = vmax.f32 %v5308_v25, %v3838_v38  ;;  %v3846_v52 = vmul.f32 0.2, %v5310_v41  ;;  %v4096_v4 = vmax.f32 %v5372_v32, %v3840_v44  ;;  %v3848_v58 = vmul.f32 0.2, %v5374_v50 }
 0x34a   : > { %v4422_v53 = vmax.f32 %v4421_v14, %v4093_v43  ;;  %v4101_v5 = vmax.f32 %v5309_v33, %v3845_v49  ;;  %v4496_v59 = vmax.f32 %v4495_v19, %v4095_v1  ;;  %v4103_v61 = vmax.f32 %v5373_v40, %v3847_v22 }
 0x34b   : > { %v4459_v60 = vmax.f32 %v4458_v20, %v4094_v2  ;;  %v4102_v62 = vmax.f32 %v5310_v41, %v3846_v52  ;;  %v3268_v63 = vpop.f32.mrb[88].mxu0  ;;  %v4533_v45 = vmax.f32 %v4532_v28, %v4096_v4  ;;  %v4104_v3 = vmax.f32 %v5374_v50, %v3848_v58  ;;  %v3654_v8 = vpop.f32.mrb[88].mxu1 }
 0x34c   : > { %v4423_v0 = vmax.f32 %v4422_v53, %v4101_v5  ;;  %v5311_v7 = vadd.f32 %v3268_v63, %v6701_v54  ;;  %v3270_v23 = vpop.f32.mrb[89].mxu0  ;;  %v4497_v30 = vmax.f32 %v4496_v59, %v4103_v61  ;;  %v5375_v10 = vadd.f32 %v3654_v8, %v6705_v56  ;;  %v3656_v12 = vpop.f32.mrb[89].mxu1 }
 0x34d   : > { %v4460_v9 = vmax.f32 %v4459_v60, %v4102_v62  ;;  %v5312_v11 = vadd.f32 %v3270_v23, %v6703_v55  ;;  %v3272_v13 = vpop.f32.mrb[90].mxu0  ;;  %v4534_v6 = vmax.f32 %v4533_v45, %v4104_v3  ;;  %v5376_v51 = vadd.f32 %v3656_v12, %v6707_v57  ;;  %v3658_v36 = vpop.f32.mrb[90].mxu1 }
 0x34e   : > { %v3853_v24 = vmul.f32 0.2, %v5311_v7  ;;  %v5313_v31 = vadd.f32 %v3272_v13, %v6701_v54  ;;  %v3274_v14 = vpop.f32.mrb[91].mxu0  ;;  %v3855_v15 = vmul.f32 0.2, %v5375_v10  ;;  %v5377_v17 = vadd.f32 %v3658_v36, %v6705_v56  ;;  %v3660_v19 = vpop.f32.mrb[91].mxu1 }
 0x34f   : > { %v3854_v16 = vmul.f32 0.2, %v5312_v11  ;;  %v5314_v18 = vadd.f32 %v3274_v14, %v6703_v55  ;;  %v3856_v21 = vmul.f32 0.2, %v5376_v51  ;;  %v5378_v26 = vadd.f32 %v3660_v19, %v6707_v57 }
 0x350   : > { %v4109_v20 = vmax.f32 %v5311_v7, %v3853_v24  ;;  %v3861_v25 = vmul.f32 0.2, %v5313_v31  ;;  %v4111_v27 = vmax.f32 %v5375_v10, %v3855_v15  ;;  %v3863_v29 = vmul.f32 0.2, %v5377_v17 }
 0x351   : > { %v4110_v28 = vmax.f32 %v5312_v11, %v3854_v16  ;;  %v3862_v32 = vmul.f32 0.2, %v5314_v18  ;;  %v4112_v34 = vmax.f32 %v5376_v51, %v3856_v21  ;;  %v3864_v37 = vmul.f32 0.2, %v5378_v26 }
 0x352   : > { %v4424_v33 = vmax.f32 %v4423_v0, %v4109_v20  ;;  %v4117_v35 = vmax.f32 %v5313_v31, %v3861_v25  ;;  %v4498_v38 = vmax.f32 %v4497_v30, %v4111_v27  ;;  %v4119_v41 = vmax.f32 %v5377_v17, %v3863_v29 }
 0x353   : > { %v4461_v40 = vmax.f32 %v4460_v9, %v4110_v28  ;;  %v4118_v42 = vmax.f32 %v5314_v18, %v3862_v32  ;;  %v3278_v43 = vpop.f32.mrb[92].mxu0  ;;  %v4535_v44 = vmax.f32 %v4534_v6, %v4112_v34  ;;  %v4120_v50 = vmax.f32 %v5378_v26, %v3864_v37  ;;  %v3664_v2 = vpop.f32.mrb[92].mxu1 }
 0x354   : > { %v4425_v49 = vmax.f32 %v4424_v33, %v4117_v35  ;;  %v5315_v1 = vadd.f32 %v3278_v43, %v6701_v54  ;;  %v3280_v22 = vpop.f32.mrb[93].mxu0  ;;  %v4499_v52 = vmax.f32 %v4498_v38, %v4119_v41  ;;  %v5379_v4 = vadd.f32 %v3664_v2, %v6705_v56  ;;  %v3666_v58 = vpop.f32.mrb[93].mxu1 }
 0x355   : > { %v4462_v53 = vmax.f32 %v4461_v40, %v4118_v42  ;;  %v5316_v5 = vadd.f32 %v3280_v22, %v6703_v55  ;;  %v3282_v59 = vpop.f32.mrb[94].mxu0  ;;  %v4536_v60 = vmax.f32 %v4535_v44, %v4120_v50  ;;  %v5380_v62 = vadd.f32 %v3666_v58, %v6707_v57  ;;  %v3668_v45 = vpop.f32.mrb[94].mxu1 }
 0x356   : > { %v3869_v61 = vmul.f32 0.2, %v5315_v1  ;;  %v5317_v63 = vadd.f32 %v3282_v59, %v6701_v54  ;;  %v3284_v0 = vpop.f32.mrb[95].mxu0  ;;  %v3871_v3 = vmul.f32 0.2, %v5379_v4  ;;  %v5381_v8 = vadd.f32 %v3668_v45, %v6705_v56  ;;  %v3670_v30 = vpop.f32.mrb[95].mxu1 }
 0x357   : > { %v3870_v7 = vmul.f32 0.2, %v5316_v5  ;;  %v5318_v23 = vadd.f32 %v3284_v0, %v6703_v55  ;;  %v3872_v10 = vmul.f32 0.2, %v5380_v62  ;;  %v5382_v12 = vadd.f32 %v3670_v30, %v6707_v57 }
 0x358   : > { %v4125_v9 = vmax.f32 %v5315_v1, %v3869_v61  ;;  %v3877_v11 = vmul.f32 0.2, %v5317_v63  ;;  %v4127_v13 = vmax.f32 %v5379_v4, %v3871_v3  ;;  %v3879_v24 = vmul.f32 0.2, %v5381_v8 }
 0x359   : > { %v4126_v6 = vmax.f32 %v5316_v5, %v3870_v7  ;;  %v3878_v51 = vmul.f32 0.2, %v5318_v23  ;;  %v4128_v36 = vmax.f32 %v5380_v62, %v3872_v10  ;;  %v3880_v15 = vmul.f32 0.2, %v5382_v12 }
 0x35a   : > { %v4426_v31 = vmax.f32 %v4425_v49, %v4125_v9  ;;  %v4133_v14 = vmax.f32 %v5317_v63, %v3877_v11  ;;  %v4500_v16 = vmax.f32 %v4499_v52, %v4127_v13  ;;  %v4135_v18 = vmax.f32 %v5381_v8, %v3879_v24 }
 0x35b   : > { %v4463_v17 = vmax.f32 %v4462_v53, %v4126_v6  ;;  %v4134_v19 = vmax.f32 %v5318_v23, %v3878_v51  ;;  %v3288_v20 = vpop.f32.mrb[96].mxu0  ;;  %v4537_v21 = vmax.f32 %v4536_v60, %v4128_v36  ;;  %v4136_v26 = vmax.f32 %v5382_v12, %v3880_v15  ;;  %v3674_v28 = vpop.f32.mrb[96].mxu1 }
 0x35c   : > { %v4427_v25 = vmax.f32 %v4426_v31, %v4133_v14  ;;  %v5319_v27 = vadd.f32 %v3288_v20, %v6701_v54  ;;  %v3290_v29 = vpop.f32.mrb[97].mxu0  ;;  %v4501_v32 = vmax.f32 %v4500_v16, %v4135_v18  ;;  %v5383_v34 = vadd.f32 %v3674_v28, %v6705_v56  ;;  %v3676_v37 = vpop.f32.mrb[97].mxu1 }
 0x35d   : > { %v4464_v33 = vmax.f32 %v4463_v17, %v4134_v19  ;;  %v5320_v35 = vadd.f32 %v3290_v29, %v6703_v55  ;;  %v3292_v38 = vpop.f32.mrb[98].mxu0  ;;  %v4538_v40 = vmax.f32 %v4537_v21, %v4136_v26  ;;  %v5384_v42 = vadd.f32 %v3676_v37, %v6707_v57  ;;  %v3678_v44 = vpop.f32.mrb[98].mxu1 }
 0x35e   : > { %v3885_v41 = vmul.f32 0.2, %v5319_v27  ;;  %v5321_v43 = vadd.f32 %v3292_v38, %v6701_v54  ;;  %v3294_v49 = vpop.f32.mrb[99].mxu0  ;;  %v3887_v50 = vmul.f32 0.2, %v5383_v34  ;;  %v5385_v2 = vadd.f32 %v3678_v44, %v6705_v56  ;;  %v3680_v52 = vpop.f32.mrb[99].mxu1 }
 0x35f   : > { %v3886_v1 = vmul.f32 0.2, %v5320_v35  ;;  %v5322_v22 = vadd.f32 %v3294_v49, %v6703_v55  ;;  %v3888_v4 = vmul.f32 0.2, %v5384_v42  ;;  %v5386_v58 = vadd.f32 %v3680_v52, %v6707_v57 }
 0x360   : > { %v4141_v53 = vmax.f32 %v5319_v27, %v3885_v41  ;;  %v3893_v5 = vmul.f32 0.2, %v5321_v43  ;;  %v4143_v59 = vmax.f32 %v5383_v34, %v3887_v50  ;;  %v3895_v61 = vmul.f32 0.2, %v5385_v2 }
 0x361   : > { %v4142_v60 = vmax.f32 %v5320_v35, %v3886_v1  ;;  %v3894_v62 = vmul.f32 0.2, %v5322_v22  ;;  %v4144_v45 = vmax.f32 %v5384_v42, %v3888_v4  ;;  %v3896_v3 = vmul.f32 0.2, %v5386_v58 }
 0x362   : > { %v4428_v63 = vmax.f32 %v4427_v25, %v4141_v53  ;;  %v4149_v0 = vmax.f32 %v5321_v43, %v3893_v5  ;;  %v4502_v7 = vmax.f32 %v4501_v32, %v4143_v59  ;;  %v4151_v23 = vmax.f32 %v5385_v2, %v3895_v61 }
 0x363   : > { %v4465_v8 = vmax.f32 %v4464_v33, %v4142_v60  ;;  %v4150_v30 = vmax.f32 %v5322_v22, %v3894_v62  ;;  %v3298_v9 = vpop.f32.mrb[100].mxu0  ;;  %v4539_v10 = vmax.f32 %v4538_v40, %v4144_v45  ;;  %v4152_v12 = vmax.f32 %v5386_v58, %v3896_v3  ;;  %v3684_v6 = vpop.f32.mrb[100].mxu1 }
 0x364   : > { %v4429_v11 = vmax.f32 %v4428_v63, %v4149_v0  ;;  %v5323_v13 = vadd.f32 %v3298_v9, %v6701_v54  ;;  %v3300_v24 = vpop.f32.mrb[101].mxu0  ;;  %v4503_v51 = vmax.f32 %v4502_v7, %v4151_v23  ;;  %v5387_v36 = vadd.f32 %v3684_v6, %v6705_v56  ;;  %v3686_v15 = vpop.f32.mrb[101].mxu1 }
 0x365   : > { %v4466_v31 = vmax.f32 %v4465_v8, %v4150_v30  ;;  %v5324_v14 = vadd.f32 %v3300_v24, %v6703_v55  ;;  %v3302_v16 = vpop.f32.mrb[102].mxu0  ;;  %v4540_v17 = vmax.f32 %v4539_v10, %v4152_v12  ;;  %v5388_v19 = vadd.f32 %v3686_v15, %v6707_v57  ;;  %v3688_v21 = vpop.f32.mrb[102].mxu1 }
 0x366   : > { %v3901_v18 = vmul.f32 0.2, %v5323_v13  ;;  %v5325_v20 = vadd.f32 %v3302_v16, %v6701_v54  ;;  %v3304_v25 = vpop.f32.mrb[103].mxu0  ;;  %v3903_v26 = vmul.f32 0.2, %v5387_v36  ;;  %v5389_v28 = vadd.f32 %v3688_v21, %v6705_v56  ;;  %v3690_v32 = vpop.f32.mrb[103].mxu1 }
 0x367   : > { %v3902_v27 = vmul.f32 0.2, %v5324_v14  ;;  %v5326_v29 = vadd.f32 %v3304_v25, %v6703_v55  ;;  %v3904_v34 = vmul.f32 0.2, %v5388_v19  ;;  %v5390_v37 = vadd.f32 %v3690_v32, %v6707_v57 }
 0x368   : > { %v4157_v33 = vmax.f32 %v5323_v13, %v3901_v18  ;;  %v3909_v35 = vmul.f32 0.2, %v5325_v20  ;;  %v4159_v38 = vmax.f32 %v5387_v36, %v3903_v26  ;;  %v3911_v41 = vmul.f32 0.2, %v5389_v28 }
 0x369   : > { %v4158_v40 = vmax.f32 %v5324_v14, %v3902_v27  ;;  %v3910_v42 = vmul.f32 0.2, %v5326_v29  ;;  %v4160_v44 = vmax.f32 %v5388_v19, %v3904_v34  ;;  %v3912_v50 = vmul.f32 0.2, %v5390_v37 }
 0x36a   : > { %v4430_v43 = vmax.f32 %v4429_v11, %v4157_v33  ;;  %v4165_v49 = vmax.f32 %v5325_v20, %v3909_v35  ;;  %v4504_v1 = vmax.f32 %v4503_v51, %v4159_v38  ;;  %v4167_v22 = vmax.f32 %v5389_v28, %v3911_v41 }
 0x36b   : > { %v4467_v2 = vmax.f32 %v4466_v31, %v4158_v40  ;;  %v4166_v52 = vmax.f32 %v5326_v29, %v3910_v42  ;;  %v3308_v53 = vpop.f32.mrb[104].mxu0  ;;  %v4541_v4 = vmax.f32 %v4540_v17, %v4160_v44  ;;  %v4168_v58 = vmax.f32 %v5390_v37, %v3912_v50  ;;  %v3694_v60 = vpop.f32.mrb[104].mxu1 }
 0x36c   : > { %v4431_v5 = vmax.f32 %v4430_v43, %v4165_v49  ;;  %v5327_v59 = vadd.f32 %v3308_v53, %v6701_v54  ;;  %v3310_v61 = vpop.f32.mrb[105].mxu0  ;;  %v4505_v62 = vmax.f32 %v4504_v1, %v4167_v22  ;;  %v5391_v45 = vadd.f32 %v3694_v60, %v6705_v56  ;;  %v3696_v3 = vpop.f32.mrb[105].mxu1 }
 0x36d   : > { %v4468_v63 = vmax.f32 %v4467_v2, %v4166_v52  ;;  %v5328_v0 = vadd.f32 %v3310_v61, %v6703_v55  ;;  %v3312_v7 = vpop.f32.mrb[106].mxu0  ;;  %v4542_v8 = vmax.f32 %v4541_v4, %v4168_v58  ;;  %v5392_v30 = vadd.f32 %v3696_v3, %v6707_v57  ;;  %v3698_v10 = vpop.f32.mrb[106].mxu1 }
 0x36e   : > { %v3917_v23 = vmul.f32 0.2, %v5327_v59  ;;  %v5329_v9 = vadd.f32 %v3312_v7, %v6701_v54  ;;  %v3314_v11 = vpop.f32.mrb[107].mxu0  ;;  %v3919_v12 = vmul.f32 0.2, %v5391_v45  ;;  %v5393_v6 = vadd.f32 %v3698_v10, %v6705_v56  ;;  %v3700_v51 = vpop.f32.mrb[107].mxu1 }
 0x36f   : > { %v3918_v13 = vmul.f32 0.2, %v5328_v0  ;;  %v5330_v24 = vadd.f32 %v3314_v11, %v6703_v55  ;;  %v3920_v36 = vmul.f32 0.2, %v5392_v30  ;;  %v5394_v15 = vadd.f32 %v3700_v51, %v6707_v57 }
 0x370   : > { %v4173_v31 = vmax.f32 %v5327_v59, %v3917_v23  ;;  %v3925_v14 = vmul.f32 0.2, %v5329_v9  ;;  %v4175_v16 = vmax.f32 %v5391_v45, %v3919_v12  ;;  %v3927_v18 = vmul.f32 0.2, %v5393_v6 }
 0x371   : > { %v4174_v17 = vmax.f32 %v5328_v0, %v3918_v13  ;;  %v3926_v19 = vmul.f32 0.2, %v5330_v24  ;;  %v4176_v21 = vmax.f32 %v5392_v30, %v3920_v36  ;;  %v3928_v26 = vmul.f32 0.2, %v5394_v15 }
 0x372   : > { %v4432_v20 = vmax.f32 %v4431_v5, %v4173_v31  ;;  %v4181_v25 = vmax.f32 %v5329_v9, %v3925_v14  ;;  %v4506_v27 = vmax.f32 %v4505_v62, %v4175_v16  ;;  %v4183_v29 = vmax.f32 %v5393_v6, %v3927_v18 }
 0x373   : > { %v4469_v28 = vmax.f32 %v4468_v63, %v4174_v17  ;;  %v4182_v32 = vmax.f32 %v5330_v24, %v3926_v19  ;;  %v3318_v33 = vpop.f32.mrb[108].mxu0  ;;  %v4543_v34 = vmax.f32 %v4542_v8, %v4176_v21  ;;  %v4184_v37 = vmax.f32 %v5394_v15, %v3928_v26  ;;  %v3704_v40 = vpop.f32.mrb[108].mxu1 }
 0x374   : > { %v4433_v35 = vmax.f32 %v4432_v20, %v4181_v25  ;;  %v5331_v38 = vadd.f32 %v3318_v33, %v6701_v54  ;;  %v3320_v41 = vpop.f32.mrb[109].mxu0  ;;  %v4507_v42 = vmax.f32 %v4506_v27, %v4183_v29  ;;  %v5395_v44 = vadd.f32 %v3704_v40, %v6705_v56  ;;  %v3706_v50 = vpop.f32.mrb[109].mxu1 }
 0x375   : > { %v4470_v43 = vmax.f32 %v4469_v28, %v4182_v32  ;;  %v5332_v49 = vadd.f32 %v3320_v41, %v6703_v55  ;;  %v3322_v1 = vpop.f32.mrb[110].mxu0  ;;  %v4544_v2 = vmax.f32 %v4543_v34, %v4184_v37  ;;  %v5396_v52 = vadd.f32 %v3706_v50, %v6707_v57  ;;  %v3708_v4 = vpop.f32.mrb[110].mxu1 }
 0x376   : > { %v3933_v22 = vmul.f32 0.2, %v5331_v38  ;;  %v5333_v53 = vadd.f32 %v3322_v1, %v6701_v54  ;;  %v3324_v5 = vpop.f32.mrb[111].mxu0  ;;  %v3935_v58 = vmul.f32 0.2, %v5395_v44  ;;  %v5397_v60 = vadd.f32 %v3708_v4, %v6705_v56  ;;  %v3710_v62 = vpop.f32.mrb[111].mxu1 }
 0x377   : > { %v3934_v59 = vmul.f32 0.2, %v5332_v49  ;;  %v5334_v61 = vadd.f32 %v3324_v5, %v6703_v55  ;;  %v3936_v45 = vmul.f32 0.2, %v5396_v52  ;;  %v5398_v3 = vadd.f32 %v3710_v62, %v6707_v57 }
 0x378   : > { %v4189_v63 = vmax.f32 %v5331_v38, %v3933_v22  ;;  %v3941_v0 = vmul.f32 0.2, %v5333_v53  ;;  %v4191_v7 = vmax.f32 %v5395_v44, %v3935_v58  ;;  %v3943_v23 = vmul.f32 0.2, %v5397_v60 }
 0x379   : > { %v4190_v8 = vmax.f32 %v5332_v49, %v3934_v59  ;;  %v3942_v30 = vmul.f32 0.2, %v5334_v61  ;;  %v4192_v10 = vmax.f32 %v5396_v52, %v3936_v45  ;;  %v3944_v12 = vmul.f32 0.2, %v5398_v3 }
 0x37a   : > { %v4434_v9 = vmax.f32 %v4433_v35, %v4189_v63  ;;  %v4197_v11 = vmax.f32 %v5333_v53, %v3941_v0  ;;  %v4508_v13 = vmax.f32 %v4507_v42, %v4191_v7  ;;  %v4199_v24 = vmax.f32 %v5397_v60, %v3943_v23 }
 0x37b   : > { %v4471_v6 = vmax.f32 %v4470_v43, %v4190_v8  ;;  %v4198_v51 = vmax.f32 %v5334_v61, %v3942_v30  ;;  %v3328_v31 = vpop.f32.mrb[112].mxu0  ;;  %v4545_v36 = vmax.f32 %v4544_v2, %v4192_v10  ;;  %v4200_v15 = vmax.f32 %v5398_v3, %v3944_v12  ;;  %v3714_v17 = vpop.f32.mrb[112].mxu1 }
 0x37c   : > { %v4435_v14 = vmax.f32 %v4434_v9, %v4197_v11  ;;  %v5335_v16 = vadd.f32 %v3328_v31, %v6701_v54  ;;  %v3330_v18 = vpop.f32.mrb[113].mxu0  ;;  %v4509_v19 = vmax.f32 %v4508_v13, %v4199_v24  ;;  %v5399_v21 = vadd.f32 %v3714_v17, %v6705_v56  ;;  %v3716_v26 = vpop.f32.mrb[113].mxu1 }
 0x37d   : > { %v4472_v20 = vmax.f32 %v4471_v6, %v4198_v51  ;;  %v5336_v25 = vadd.f32 %v3330_v18, %v6703_v55  ;;  %v3332_v27 = vpop.f32.mrb[114].mxu0  ;;  %v4546_v28 = vmax.f32 %v4545_v36, %v4200_v15  ;;  %v5400_v32 = vadd.f32 %v3716_v26, %v6707_v57  ;;  %v3718_v34 = vpop.f32.mrb[114].mxu1 }
 0x37e   : > { %v3949_v29 = vmul.f32 0.2, %v5335_v16  ;;  %v5337_v33 = vadd.f32 %v3332_v27, %v6701_v54  ;;  %v3334_v35 = vpop.f32.mrb[115].mxu0  ;;  %v3951_v37 = vmul.f32 0.2, %v5399_v21  ;;  %v5401_v40 = vadd.f32 %v3718_v34, %v6705_v56  ;;  %v3720_v42 = vpop.f32.mrb[115].mxu1 }
 0x37f   : > { %v3950_v38 = vmul.f32 0.2, %v5336_v25  ;;  %v5338_v41 = vadd.f32 %v3334_v35, %v6703_v55  ;;  %v3952_v44 = vmul.f32 0.2, %v5400_v32  ;;  %v5402_v50 = vadd.f32 %v3720_v42, %v6707_v57 }
 0x380   : > { %v4205_v43 = vmax.f32 %v5335_v16, %v3949_v29  ;;  %v3957_v49 = vmul.f32 0.2, %v5337_v33  ;;  %v4207_v1 = vmax.f32 %v5399_v21, %v3951_v37  ;;  %v3959_v22 = vmul.f32 0.2, %v5401_v40 }
 0x381   : > { %v4206_v2 = vmax.f32 %v5336_v25, %v3950_v38  ;;  %v3958_v52 = vmul.f32 0.2, %v5338_v41  ;;  %v4208_v4 = vmax.f32 %v5400_v32, %v3952_v44  ;;  %v3960_v58 = vmul.f32 0.2, %v5402_v50 }
 0x382   : > { %v4436_v53 = vmax.f32 %v4435_v14, %v4205_v43  ;;  %v4213_v5 = vmax.f32 %v5337_v33, %v3957_v49  ;;  %v4510_v59 = vmax.f32 %v4509_v19, %v4207_v1  ;;  %v4215_v61 = vmax.f32 %v5401_v40, %v3959_v22 }
 0x383   : > { %v4473_v60 = vmax.f32 %v4472_v20, %v4206_v2  ;;  %v4214_v62 = vmax.f32 %v5338_v41, %v3958_v52  ;;  %v3338_v63 = vpop.f32.mrb[116].mxu0  ;;  %v4547_v45 = vmax.f32 %v4546_v28, %v4208_v4  ;;  %v4216_v3 = vmax.f32 %v5402_v50, %v3960_v58  ;;  %v3724_v8 = vpop.f32.mrb[116].mxu1 }
 0x384   : > { %v4437_v0 = vmax.f32 %v4436_v53, %v4213_v5  ;;  %v5339_v7 = vadd.f32 %v3338_v63, %v6701_v54  ;;  %v3340_v23 = vpop.f32.mrb[117].mxu0  ;;  %v4511_v30 = vmax.f32 %v4510_v59, %v4215_v61  ;;  %v5403_v10 = vadd.f32 %v3724_v8, %v6705_v56  ;;  %v3726_v12 = vpop.f32.mrb[117].mxu1 }
 0x385   : > { %v4474_v9 = vmax.f32 %v4473_v60, %v4214_v62  ;;  %v5340_v11 = vadd.f32 %v3340_v23, %v6703_v55  ;;  %v3342_v13 = vpop.f32.mrb[118].mxu0  ;;  %v4548_v6 = vmax.f32 %v4547_v45, %v4216_v3  ;;  %v5404_v51 = vadd.f32 %v3726_v12, %v6707_v57  ;;  %v3728_v36 = vpop.f32.mrb[118].mxu1 }
 0x386   : > { %v3965_v24 = vmul.f32 0.2, %v5339_v7  ;;  %v5341_v31 = vadd.f32 %v3342_v13, %v6701_v54  ;;  %v3344_v14 = vpop.f32.mrb[119].mxu0  ;;  %v3967_v15 = vmul.f32 0.2, %v5403_v10  ;;  %v5405_v17 = vadd.f32 %v3728_v36, %v6705_v56  ;;  %v3730_v19 = vpop.f32.mrb[119].mxu1 }
 0x387   : > { %v3966_v16 = vmul.f32 0.2, %v5340_v11  ;;  %v5342_v18 = vadd.f32 %v3344_v14, %v6703_v55  ;;  %v3968_v21 = vmul.f32 0.2, %v5404_v51  ;;  %v5406_v26 = vadd.f32 %v3730_v19, %v6707_v57 }
 0x388   : > { %v4221_v20 = vmax.f32 %v5339_v7, %v3965_v24  ;;  %v3973_v25 = vmul.f32 0.2, %v5341_v31  ;;  %v4223_v27 = vmax.f32 %v5403_v10, %v3967_v15  ;;  %v3975_v29 = vmul.f32 0.2, %v5405_v17 }
 0x389   : > { %v4222_v28 = vmax.f32 %v5340_v11, %v3966_v16  ;;  %v3974_v32 = vmul.f32 0.2, %v5342_v18  ;;  %v4224_v34 = vmax.f32 %v5404_v51, %v3968_v21  ;;  %v3976_v37 = vmul.f32 0.2, %v5406_v26 }
 0x38a   : > { %v4438_v33 = vmax.f32 %v4437_v0, %v4221_v20  ;;  %v4229_v35 = vmax.f32 %v5341_v31, %v3973_v25  ;;  %v4512_v38 = vmax.f32 %v4511_v30, %v4223_v27  ;;  %v4231_v41 = vmax.f32 %v5405_v17, %v3975_v29 }
 0x38b   : > { %v4475_v40 = vmax.f32 %v4474_v9, %v4222_v28  ;;  %v4230_v42 = vmax.f32 %v5342_v18, %v3974_v32  ;;  %v3348_v43 = vpop.f32.mrb[120].mxu0  ;;  %v4549_v44 = vmax.f32 %v4548_v6, %v4224_v34  ;;  %v4232_v50 = vmax.f32 %v5406_v26, %v3976_v37  ;;  %v3734_v2 = vpop.f32.mrb[120].mxu1 }
 0x38c   : > { %v4439_v49 = vmax.f32 %v4438_v33, %v4229_v35  ;;  %v5343_v1 = vadd.f32 %v3348_v43, %v6701_v54  ;;  %v3350_v22 = vpop.f32.mrb[121].mxu0  ;;  %v4513_v52 = vmax.f32 %v4512_v38, %v4231_v41  ;;  %v5407_v4 = vadd.f32 %v3734_v2, %v6705_v56  ;;  %v3736_v58 = vpop.f32.mrb[121].mxu1 }
 0x38d   : > { %v4476_v53 = vmax.f32 %v4475_v40, %v4230_v42  ;;  %v5344_v5 = vadd.f32 %v3350_v22, %v6703_v55  ;;  %v3352_v59 = vpop.f32.mrb[122].mxu0  ;;  %v4550_v60 = vmax.f32 %v4549_v44, %v4232_v50  ;;  %v5408_v62 = vadd.f32 %v3736_v58, %v6707_v57  ;;  %v3738_v45 = vpop.f32.mrb[122].mxu1 }
 0x38e   : > { %v3981_v61 = vmul.f32 0.2, %v5343_v1  ;;  %v5345_v63 = vadd.f32 %v3352_v59, %v6701_v54  ;;  %v3354_v0 = vpop.f32.mrb[123].mxu0  ;;  %v3983_v3 = vmul.f32 0.2, %v5407_v4  ;;  %v5409_v8 = vadd.f32 %v3738_v45, %v6705_v56  ;;  %v3740_v30 = vpop.f32.mrb[123].mxu1 }
 0x38f   : > { %v3982_v7 = vmul.f32 0.2, %v5344_v5  ;;  %v5346_v23 = vadd.f32 %v3354_v0, %v6703_v55  ;;  %v3984_v10 = vmul.f32 0.2, %v5408_v62  ;;  %v5410_v12 = vadd.f32 %v3740_v30, %v6707_v57 }
 0x390   : > { %v4237_v9 = vmax.f32 %v5343_v1, %v3981_v61  ;;  %v3989_v11 = vmul.f32 0.2, %v5345_v63  ;;  %v4239_v13 = vmax.f32 %v5407_v4, %v3983_v3  ;;  %v3991_v24 = vmul.f32 0.2, %v5409_v8 }
 0x391   : > { %v4238_v6 = vmax.f32 %v5344_v5, %v3982_v7  ;;  %v3990_v51 = vmul.f32 0.2, %v5346_v23  ;;  %v4240_v36 = vmax.f32 %v5408_v62, %v3984_v10  ;;  %v3992_v15 = vmul.f32 0.2, %v5410_v12 }
 0x392   : > { %v4440_v31 = vmax.f32 %v4439_v49, %v4237_v9  ;;  %v4245_v14 = vmax.f32 %v5345_v63, %v3989_v11  ;;  %v4514_v16 = vmax.f32 %v4513_v52, %v4239_v13  ;;  %v4247_v18 = vmax.f32 %v5409_v8, %v3991_v24 }
 0x393   : > { %v4477_v17 = vmax.f32 %v4476_v53, %v4238_v6  ;;  %v4246_v19 = vmax.f32 %v5346_v23, %v3990_v51  ;;  %v3358_v20 = vpop.f32.mrb[124].mxu0  ;;  %v4551_v21 = vmax.f32 %v4550_v60, %v4240_v36  ;;  %v4248_v26 = vmax.f32 %v5410_v12, %v3992_v15  ;;  %v3744_v28 = vpop.f32.mrb[124].mxu1 }
 0x394   : > { %v4441_v25 = vmax.f32 %v4440_v31, %v4245_v14  ;;  %v5347_v27 = vadd.f32 %v3358_v20, %v6701_v54  ;;  %v3360_v29 = vpop.f32.mrb[125].mxu0  ;;  %v4515_v32 = vmax.f32 %v4514_v16, %v4247_v18  ;;  %v5411_v34 = vadd.f32 %v3744_v28, %v6705_v56  ;;  %v3746_v37 = vpop.f32.mrb[125].mxu1 }
 0x395   : > { %v4478_v33 = vmax.f32 %v4477_v17, %v4246_v19  ;;  %v5348_v35 = vadd.f32 %v3360_v29, %v6703_v55  ;;  %v3362_v38 = vpop.f32.mrb[126].mxu0  ;;  %v4552_v40 = vmax.f32 %v4551_v21, %v4248_v26  ;;  %v5412_v42 = vadd.f32 %v3746_v37, %v6707_v57  ;;  %v3748_v44 = vpop.f32.mrb[126].mxu1 }
 0x396   : > { %v3997_v41 = vmul.f32 0.2, %v5347_v27  ;;  %v5349_v43 = vadd.f32 %v3362_v38, %v6701_v54  ;;  %v3364_v49 = vpop.f32.mrb[127].mxu0  ;;  %v3999_v50 = vmul.f32 0.2, %v5411_v34  ;;  %v5413_v2 = vadd.f32 %v3748_v44, %v6705_v56  ;;  %v3750_v52 = vpop.f32.mrb[127].mxu1 }
 0x397   : > { %v3998_v1 = vmul.f32 0.2, %v5348_v35  ;;  %v5350_v22 = vadd.f32 %v3364_v49, %v6703_v55  ;;  %v4000_v4 = vmul.f32 0.2, %v5412_v42  ;;  %v5414_v58 = vadd.f32 %v3750_v52, %v6707_v57 }
 0x398   : > { %v4253_v53 = vmax.f32 %v5347_v27, %v3997_v41  ;;  %v4005_v5 = vmul.f32 0.2, %v5349_v43  ;;  %v4255_v59 = vmax.f32 %v5411_v34, %v3999_v50  ;;  %v4007_v61 = vmul.f32 0.2, %v5413_v2 }
 0x399   : > { %v4254_v60 = vmax.f32 %v5348_v35, %v3998_v1  ;;  %v4006_v62 = vmul.f32 0.2, %v5350_v22  ;;  %v4256_v54 = vmax.f32 %v5412_v42, %v4000_v4  ;;  %v4008_v0 = vmul.f32 0.2, %v5414_v58 }
 0x39a   : > { %v4442_v63 = vmax.f32 %v4441_v25, %v4253_v53  ;;  %v4261_v45 = vmax.f32 %v5349_v43, %v4005_v5  ;;  %v4516_v3 = vmax.f32 %v4515_v32, %v4255_v59  ;;  %v4263_v8 = vmax.f32 %v5413_v2, %v4007_v61 }
 0x39b   : > { %v4479_v7 = vmax.f32 %v4478_v33, %v4254_v60  ;;  %v4262_v56 = vmax.f32 %v5350_v22, %v4006_v62  ;;  %v4553_v23 = vmax.f32 %v4552_v40, %v4256_v54  ;;  %v4264_v30 = vmax.f32 %v5414_v58, %v4008_v0 }
 0x39c   : > { %v4443_v55 = vmax.f32 %v4442_v63, %v4261_v45  ;;  %v4517_v9 = vmax.f32 %v4516_v3, %v4263_v8  ;;  %v4613_v42 = vrot.slane %v4605_v48, %v6682_v39 }
 0x39d   : > { %v4480_v10 = vmax.f32 %v4479_v7, %v4262_v56  ;;  %v4554_v12 = vmax.f32 %v4553_v23, %v4264_v30 }
 0x39e   : > { %v4444_v11 = vrot.slane %v4443_v55, 4  ;;  %v4518_v57 = vrot.slane %v4517_v9, 4 }
 0x39f   : > { %v4481_v13 = vrot.slane %v4480_v10, 4  ;;  %v4555_v24 = vrot.slane %v4554_v12, 4 }
 0x3a0   : > { %v4445_v6 = vmax.f32 %v4443_v55, %v4444_v11  ;;  %v4519_v51 = vmax.f32 %v4517_v9, %v4518_v57 }
 0x3a1   : > { %v4482_v31 = vmax.f32 %v4480_v10, %v4481_v13  ;;  %v4556_v14 = vmax.f32 %v4554_v12, %v4555_v24 }
 0x3a2   : > { %v4446_v36 = vrot.slane %v4445_v6, 2  ;;  %v4520_v15 = vrot.slane %v4519_v51, 2 }
 0x3a3   : > { %v4483_v16 = vrot.slane %v4482_v31, 2  ;;  %v4557_v18 = vrot.slane %v4556_v14, 2 }
 0x3a4   : > { %v4447_v17 = vmax.f32 %v4445_v6, %v4446_v36  ;;  %v4521_v19 = vmax.f32 %v4519_v51, %v4520_v15 }
 0x3a5   : > { %v4484_v20 = vmax.f32 %v4482_v31, %v4483_v16  ;;  %v4558_v25 = vmax.f32 %v4556_v14, %v4557_v18 }
 0x3a6   : > { %v4448_v21 = vrot.slane %v4447_v17, 1  ;;  %v4522_v26 = vrot.slane %v4521_v19, 1 }
 0x3a7   : > { %v4485_v27 = vrot.slane %v4484_v20, 1  ;;  %v4559_v29 = vrot.slane %v4558_v25, 1 }
 0x3a8   : > { %v4449_v28 = vmax.f32 %v4447_v17, %v4448_v21  ;;  %v4523_v32 = vmax.f32 %v4521_v19, %v4522_v26 }
 0x3a9   : > { %v4486_v33 = vmax.f32 %v4484_v20, %v4485_v27  ;;  %v4560_v34 = vmax.f32 %v4558_v25, %v4559_v29 }
 0x3ab   : > { %v4575_v35 = vcombine.low %v4449_v28, %v4486_v33  ;;  %v4576_v37 = vcombine.low %v4523_v32, %v4560_v34 }
 0x3ad   : > { %v4597_v38 = vrot.slane %v4575_v35, %v6682_v39  ;;  %v4604_v40 = vrot.slane %v4576_v37, %v6682_v39 }
 0x3af   : > { %v4606_v41 = vcombine.low %v4597_v38, %v4604_v40 }
 0x3b1   : > { %v4620_v43 = vrot.slane %v4606_v41, %v6682_v39 }
 0x3b3   : > { %v4621_v44 = vcombine.low %v4613_v42, %v4620_v43 }
 0x3b5   : > { %4623 = vst [vmem:[%s244_s6] sm:$0xff] %v4621_v44 }
 0x3b6   : > { %6035 = shalt.err (!%p6032_p7)
}
 0x3b7   : > { %s6036_s21 = scalar_lea.hbm %s6850_s7, 128  ;;  %s6040_s2 = scalar_lea.hbm %s6907_s3, 512 }
 0x3b8   : > { %p6037_p12 = scmp.ne.s32.totalorder %s6850_s7, %s6036_s21  ;;  %p6041_p5 = scmp.lt.u32.totalorder %s6850_s7, %s6907_s3 }
 0x3b9   : > { %p6042_p9 = scmp.lt.u32.totalorder %s6040_s2, %s6036_s21  ;;  %p6044_p2 = scmp.lt.u32.totalorder %s6036_s21, %s6850_s7 }
 0x3ba   : > { %p6038_p11 = pnand %p6037_p12, %p6297_p6 }
 0x3bb   : > { %p6043_p0 = por %p6042_p9, %p6041_p5 }
 0x3bc   : > { %p6039_p1 = pneg %p6038_p11 }
 0x3bd   : > { %p6045_p10 = por %p6044_p2, %p6043_p0 }
 0x3bf   : > { %p6046_p4 = pnand %p6045_p10, %p6039_p1 }
 0x3c1   : > { %6049 = shalt.err (!%p6046_p4)
}
 0x3c2   : > { %5681 = dma.vmem_to_hbm [thread:$0]  (%p6297_p6), %s6852_s29, 128, %s6850_s7, %s4690_s10  }
 0x3c3 PF: > { %s6935_s12 = sld [smem:[#allocation12_spill]]  ;;  %s6936_s22 = sld [smem:[#allocation13_spill]] }
 0x3c4   : > { %p5703_p8 = scmp.ge.s32.totalorder %s6124_s19, 2 }
 0x3c9   : > { %s4718_s24 = sand.u32 1, %s6935_s12   ;;  %p6937_p13 = scmp.ne.s32.totalorder %s6936_s22, 0 }
 0x3ca   : > { %s4719_s26 = scalar_lea.sflag [#allocation4], %s4718_s24 }
 0x3cb   : > { %p5695_p3 = pnand %p5703_p8, %p6937_p13 }
 0x3cd   : > { %6091 = dma.done.wait (!%p5695_p3), %s4719_s26, 128  }
 0x3ce   : > { %6093 = vsyncadd (!%p5695_p3), %s4719_s26, 4294967168  ;;  %s20_s19 = sadd.s32 1, %s6124_s19   ;;  %s6938_s4 = sld [smem:[#allocation14_spill]] }
 0x3cf   : > { %p17_p7 = scmp.ge.s32.totalorder %s20_s19, 6   ;;  %s6939_s12 = smov %s6100_s13 }
 0x3d0   : > { %s6940_s13 = smov %s6104_s14  ;;  %s6941_s14 = smov %s6310_s1 }
 0x3d1   : > { %s6942_s15 = smov %s6116_s17  ;;  %s6943_s16 = smov %s6120_s18 }
 0x3d2   : > { %s6945_s18 = smov %s6951_s5  ;;  %19 = sbr.rel (!%p17_p7) target bundleno = 11 (0xb), region = 93 }
 0x3d4   : > { %s6944_s17 = smov %s6938_s4 }
 0x3d9   :  { %4724 = vsyncpa [#allocation3], 1 }
 0x3da   :  { %4726 = vsyncpa [#allocation3 + $0x1], 1 }
 0x3db   :  { %4727 = vsyncpa [#allocation6], 1 }
 0x3dc   :  { %4728 = vsyncpa [#allocation4], 1 }
 0x3dd   :  { %4730 = vsyncpa [#allocation4 + $0x1], 1 }

</bundles_post_ra>
